<compile_context>
chip_gen: v6e
topology: v6e:2x2x1
jax: 0.10.0
libtpu: 0.0.40
codegen_flags: <defaults>
</compile_context>

<pallas_src>
import functools

import jax
import jax.numpy as jnp
from jax import lax
from jax.experimental import pallas as pl
from jax.experimental.pallas import tpu as pltpu


def _sigmoid_1eup(z):
    # One transcendental per element (tanh) instead of exp + divide.
    return 0.5 * (jnp.tanh(0.5 * z) + 1.0)


def _attn_cls_kernel(x_ref, wvu_ref, bvu_ref, ww_ref, bw_ref, wc_ref, bc_ref,
                     o_ref, m_sc, l_sc, acc_sc, *, n_valid, n_padded, d, k):
    """Fused gated-attention + pooled classifier with online softmax over row tiles.

    Scratch (all f32):
      m_sc   (1, K)  running max of attention logits
      l_sc   (1, K)  running sum of exp(logit - m)
      acc_sc (K, L)  running sum_n exp(logit_n - m) * x_n   (lane-dense)
    """
    i = pl.program_id(0)
    block_n = x_ref.shape[0]

    @pl.when(i == 0)
    def _():
        m_sc[...] = jnp.full_like(m_sc, -jnp.inf)
        l_sc[...] = jnp.zeros_like(l_sc)
        acc_sc[...] = jnp.zeros_like(acc_sc)

    x = x_ref[...]                                             # (TN, L) bf16, MXU feed

    # Fused V/U gate: a single MXU pass over x, then split + activations in f32.
    vu = jnp.dot(x, wvu_ref[...],
                 preferred_element_type=jnp.float32) + bvu_ref[...]     # (TN, 2D) f32
    gated = jnp.tanh(vu[:, :d]) * _sigmoid_1eup(vu[:, d:])              # (TN, D) f32

    if k == 1:
        # K == 1: VPU multiply + XLU lane reduce; keeps the MXU free.
        a = jnp.sum(gated * ww_ref[...], axis=1, keepdims=True) + bw_ref[...]
    else:
        # General K: small (TN, D) x (K, D)^T matmul.
        a = lax.dot_general(gated, ww_ref[...],
                            (((1,), (1,)), ((), ())),
                            preferred_element_type=jnp.float32) + bw_ref[...]

    if n_padded != n_valid:
        # Tail masking: padded rows must not enter the softmax.
        row_ids = i * block_n + lax.broadcasted_iota(jnp.int32, a.shape, 0)
        a = jnp.where(row_ids < n_valid, a, -jnp.inf)

    # --- online softmax update over the N (row) axis ---
    m_new = jnp.maximum(m_sc[...], jnp.max(a, axis=0, keepdims=True))   # (1, K)
    alpha = jnp.exp(m_sc[...] - m_new)                                  # (1, K)
    p = jnp.exp(a - m_new)                                              # (TN, K)

    l_sc[...] = alpha * l_sc[...] + jnp.sum(p, axis=0, keepdims=True)   # (1, K)
    # acc (K, L) += p^T @ x : contract the row axis; x stays in MXU-RHS orientation.
    px = lax.dot_general(p.astype(jnp.bfloat16), x,
                         (((0,), (0,)), ((), ())),
                         preferred_element_type=jnp.float32)            # (K, L)
    acc_sc[...] = alpha.T * acc_sc[...] + px
    m_sc[...] = m_new

    @pl.when(i == pl.num_programs(0) - 1)
    def _():
        inv_l = pl.reciprocal(l_sc[...], approx=True)                   # (1, K), EUP
        afeat = acc_sc[...] * inv_l.T                                   # (K, L) f32
        # pred (K, C) = afeat @ Wc^T ; tiny epilogue, kept in f32 for output precision.
        pred = lax.dot_general(afeat, wc_ref[...],
                               (((1,), (1,)), ((), ())),
                               preferred_element_type=jnp.float32) + bc_ref[...]
        o_ref[...] = pred.astype(o_ref.dtype)


def _round_up(v, m):
    return ((v + m - 1) // m) * m


def attention_with_classifier(params, x, *, block_n=512):
    """Fused forward. `params` is the canonical f32 dict from init_params."""
    n, l = x.shape
    d = params["wv_t"].shape[1]
    k = params["ww_t"].shape[1]
    c = params["wc_t"].shape[1]

    # Kernel-layout parameters.  Big matmul weights go to bf16 (fast MXU path); biases,
    # the tiny attention-weight row and the classifier weight stay f32.
    wvu_t = jnp.concatenate([params["wv_t"], params["wu_t"]],
                            axis=1).astype(jnp.bfloat16)          # (L, 2D)
    bvu = jnp.concatenate([params["bv"], params["bu"]],
                          axis=1).astype(jnp.float32)             # (1, 2D)
    ww_row = params["ww_t"].T.astype(jnp.float32)                 # (K, D) torch layout
    bw = params["bw"].astype(jnp.float32)                         # (1, K)
    wc_row = params["wc_t"].T.astype(jnp.float32)                 # (C, L) torch layout
    bc = params["bc"].astype(jnp.float32)                         # (1, C)

    # Tile the row (N) axis.  bf16 sublane tile is 16, so tiles are multiples of 16;
    # pad x with zero rows whose logits are masked to -inf inside the kernel.
    block_n = max(16, (block_n // 16) * 16)
    num_tiles = pl.cdiv(n, block_n)
    block_n_eff = _round_up(pl.cdiv(n, num_tiles), 16)
    n_pad = num_tiles * block_n_eff

    x_bf = x.astype(jnp.bfloat16)                                 # halves HBM traffic
    if n_pad != n:
        x_bf = jnp.pad(x_bf, ((0, n_pad - n), (0, 0)))

    kernel = functools.partial(_attn_cls_kernel,
                               n_valid=n, n_padded=n_pad, d=d, k=k)

    def const_spec(shape):
        return pl.BlockSpec(shape, lambda i: (0, 0))

    return pl.pallas_call(
        kernel,
        out_shape=jax.ShapeDtypeStruct((k, c), jnp.float32),
        grid=(num_tiles,),
        in_specs=[
            pl.BlockSpec((block_n_eff, l), lambda i: (i, 0)),     # x row tiles
            const_spec((l, 2 * d)), const_spec((1, 2 * d)),       # fused V/U linear
            const_spec((k, d)), const_spec((1, k)),               # attention_weights
            const_spec((c, l)), const_spec((1, c)),               # classifier fc
        ],
        out_specs=pl.BlockSpec((k, c), lambda i: (0, 0)),
        scratch_shapes=[
            pltpu.VMEM((1, k), jnp.float32),   # running max
            pltpu.VMEM((1, k), jnp.float32),   # running denom
            pltpu.VMEM((k, l), jnp.float32),   # running weighted sum of x (lane-dense)
        ],
        compiler_params=pltpu.CompilerParams(
            dimension_semantics=("arbitrary",)),   # serial online-softmax reduction
    )(x_bf, wvu_t, bvu, ww_row, bw, wc_row, bc)


def init_params(key, L=512, D=128, K=1, num_cls=2, dtype=jnp.float32):
    """Torch-Linear-style init; canonical f32 weights stored pre-transposed [in, out]."""
    ks = jax.random.split(key, 8)
    bl = 1.0 / float(jnp.sqrt(L))
    bd = 1.0 / float(jnp.sqrt(D))
    p = {}
    p["wv_t"] = jax.random.uniform(ks[0], (L, D), dtype, -bl, bl)
    p["bv"] = jax.random.uniform(ks[1], (1, D), dtype, -bl, bl)
    p["wu_t"] = jax.random.uniform(ks[2], (L, D), dtype, -bl, bl)
    p["bu"] = jax.random.uniform(ks[3], (1, D), dtype, -bl, bl)
    p["ww_t"] = jax.random.uniform(ks[4], (D, K), dtype, -bd, bd)
    p["bw"] = jax.random.uniform(ks[5], (1, K), dtype, -bd, bd)
    p["wc_t"] = jax.random.uniform(ks[6], (L, num_cls), dtype, -bl, bl)
    p["bc"] = jax.random.uniform(ks[7], (1, num_cls), dtype, -bl, bl)
    return p


def _reference_forward(params, x):
    av = jnp.tanh(x @ params["wv_t"] + params["bv"])
    au = jax.nn.sigmoid(x @ params["wu_t"] + params["bu"])
    a = (av * au) @ params["ww_t"] + params["bw"]     # (N, K)
    a = jax.nn.softmax(a.T, axis=1)                   # (K, N)
    afeat = a @ x                                     # (K, L)
    return afeat @ params["wc_t"] + params["bc"]      # (K, num_cls)


if __name__ == "__main__":
    key = jax.random.PRNGKey(0)
    k_params, k_x = jax.random.split(key)

    N = 600          # instances in the MIL bag (2 row tiles + masked tail)
    L = 512          # feature dim (module default)
    D = 128          # attention hidden dim (module default)
    K = 1            # attention heads (module default)
    NUM_CLS = 2      # classes (module default)

    params = init_params(k_params, L, D, K, NUM_CLS)
    x = jax.random.normal(k_x, (N, L), jnp.float32)

    out = attention_with_classifier(params, x)
    out = jax.block_until_ready(out)

    ref = _reference_forward(params, x)
    assert out.shape == (K, NUM_CLS)
    # bf16 MXU path + approx reciprocal -> slightly looser tolerance vs f32 reference.
    assert jnp.allclose(out, ref, atol=1e-2, rtol=5e-2), (out, ref)

    print("KERNEL_OK")
</pallas_src>

<mosaic_0001>
module attributes {stable_mosaic.version = 11 : i64} {
  func.func @_attn_cls_kernel(%arg0: i32, %arg1: memref<304x512xbf16, #tpu.memory_space<vmem>>, %arg2: memref<512x256xbf16, #tpu.memory_space<vmem>>, %arg3: memref<1x256xf32, #tpu.memory_space<vmem>>, %arg4: memref<1x128xf32, #tpu.memory_space<vmem>>, %arg5: memref<1x1xf32, #tpu.memory_space<vmem>>, %arg6: memref<2x512xf32, #tpu.memory_space<vmem>>, %arg7: memref<1x2xf32, #tpu.memory_space<vmem>>, %arg8: memref<1x2xf32, #tpu.memory_space<vmem>>, %arg9: memref<1x1xf32, #tpu.memory_space<vmem>>, %arg10: memref<1x1xf32, #tpu.memory_space<vmem>>, %arg11: memref<1x512xf32, #tpu.memory_space<vmem>>) attributes {dimension_semantics = [#tpu.dimension_semantics<arbitrary>], iteration_bounds = array<i64: 2>, scalar_prefetch = 0 : i64, scratch_operands = 3 : i64, tpu.core_type = #tpu.core_type<tc>, window_params = [{transform_indices = @transform_0, window_bounds = array<i64: 304, 512>}, {pipeline_mode = #tpu.pipeline_mode<synchronous>, transform_indices = @transform_1, window_bounds = array<i64: 512, 256>}, {pipeline_mode = #tpu.pipeline_mode<synchronous>, transform_indices = @transform_2, window_bounds = array<i64: 1, 256>}, {pipeline_mode = #tpu.pipeline_mode<synchronous>, transform_indices = @transform_3, window_bounds = array<i64: 1, 128>}, {pipeline_mode = #tpu.pipeline_mode<synchronous>, transform_indices = @transform_4, window_bounds = array<i64: 1, 1>}, {pipeline_mode = #tpu.pipeline_mode<synchronous>, transform_indices = @transform_5, window_bounds = array<i64: 2, 512>}, {pipeline_mode = #tpu.pipeline_mode<synchronous>, transform_indices = @transform_6, window_bounds = array<i64: 1, 2>}, {pipeline_mode = #tpu.pipeline_mode<synchronous>, transform_indices = @transform_7, window_bounds = array<i64: 1, 2>}]} {
    %c0_i32 = arith.constant 0 : i32
    %0 = arith.cmpi eq, %arg0, %c0_i32 : i32
    %1 = arith.extui %0 : i1 to i32
    %c0_i32_0 = arith.constant 0 : i32
    %2 = arith.cmpi ne, %1, %c0_i32_0 : i32
    scf.if %2 {
      %cst_33 = arith.constant 0xFF800000 : f32
      %64 = vector.broadcast %cst_33 : f32 to vector<1x1xf32>
      %c0_34 = arith.constant 0 : index
      %c0_35 = arith.constant 0 : index
      %65 = vector.load %arg9[%c0_34, %c0_35] : memref<1x1xf32, #tpu.memory_space<vmem>>, vector<1x1xf32>
      tpu.vector_store %arg9[%c0_34, %c0_35], %64 {strides = array<i32>} : memref<1x1xf32, #tpu.memory_space<vmem>>, vector<1x1xf32>,
      %cst_36 = arith.constant 0.000000e+00 : f32
      %66 = vector.broadcast %cst_36 : f32 to vector<1x1xf32>
      %c0_37 = arith.constant 0 : index
      %c0_38 = arith.constant 0 : index
      %67 = vector.load %arg10[%c0_37, %c0_38] : memref<1x1xf32, #tpu.memory_space<vmem>>, vector<1x1xf32>
      tpu.vector_store %arg10[%c0_37, %c0_38], %66 {strides = array<i32>} : memref<1x1xf32, #tpu.memory_space<vmem>>, vector<1x1xf32>,
      %cst_39 = arith.constant 0.000000e+00 : f32
      %68 = vector.broadcast %cst_39 : f32 to vector<1x512xf32>
      %c0_40 = arith.constant 0 : index
      %c0_41 = arith.constant 0 : index
      %69 = vector.load %arg11[%c0_40, %c0_41] : memref<1x512xf32, #tpu.memory_space<vmem>>, vector<1x512xf32>
      tpu.vector_store %arg11[%c0_40, %c0_41], %68 {strides = array<i32>} : memref<1x512xf32, #tpu.memory_space<vmem>>, vector<1x512xf32>,
    } else {
    }
    %c0 = arith.constant 0 : index
    %c0_1 = arith.constant 0 : index
    %3 = vector.load %arg1[%c0, %c0_1] : memref<304x512xbf16, #tpu.memory_space<vmem>>, vector<304x512xbf16>
    %c0_2 = arith.constant 0 : index
    %c0_3 = arith.constant 0 : index
    %4 = vector.load %arg2[%c0_2, %c0_3] : memref<512x256xbf16, #tpu.memory_space<vmem>>, vector<512x256xbf16>
    %cst = arith.constant dense<0.000000e+00> : vector<304x256xf32>
    %5 = tpu.matmul %3, %4, %cst {dimension_numbers = #tpu.dot_dimension_numbers<[1], [0], [0], [1], [0, 0, 1, 1], [], []>} : vector<304x512xbf16>, vector<512x256xbf16>, vector<304x256xf32> -> vector<304x256xf32>
    %c0_4 = arith.constant 0 : index
    %c0_5 = arith.constant 0 : index
    %6 = vector.load %arg3[%c0_4, %c0_5] : memref<1x256xf32, #tpu.memory_space<vmem>>, vector<1x256xf32>
    %7 = vector.broadcast %6 : vector<1x256xf32> to vector<304x256xf32>
    %8 = arith.addf %5, %7 : vector<304x256xf32>
    %9 = vector.extract_strided_slice %8 {offsets = [0, 0], sizes = [304, 128], strides = [1, 1]} : vector<304x256xf32> to vector<304x128xf32>
    %10 = math.tanh %9 : vector<304x128xf32>
    %11 = vector.extract_strided_slice %8 {offsets = [0, 128], sizes = [304, 128], strides = [1, 1]} : vector<304x256xf32> to vector<304x128xf32>
    %cst_6 = arith.constant 5.000000e-01 : f32
    %12 = vector.broadcast %cst_6 : f32 to vector<304x128xf32>
    %13 = arith.mulf %12, %11 : vector<304x128xf32>
    %14 = math.tanh %13 : vector<304x128xf32>
    %cst_7 = arith.constant 1.000000e+00 : f32
    %15 = vector.broadcast %cst_7 : f32 to vector<304x128xf32>
    %16 = arith.addf %14, %15 : vector<304x128xf32>
    %cst_8 = arith.constant 5.000000e-01 : f32
    %17 = vector.broadcast %cst_8 : f32 to vector<304x128xf32>
    %18 = arith.mulf %17, %16 : vector<304x128xf32>
    %19 = arith.mulf %10, %18 : vector<304x128xf32>
    %c0_9 = arith.constant 0 : index
    %c0_10 = arith.constant 0 : index
    %20 = vector.load %arg4[%c0_9, %c0_10] : memref<1x128xf32, #tpu.memory_space<vmem>>, vector<1x128xf32>
    %21 = vector.broadcast %20 : vector<1x128xf32> to vector<304x128xf32>
    %22 = arith.mulf %19, %21 : vector<304x128xf32>
    %cst_11 = arith.constant dense<0.000000e+00> : vector<304xf32>
    %23 = vector.multi_reduction <add>, %22, %cst_11 [1] : vector<304x128xf32> to vector<304xf32>
    %24 = vector.shape_cast %23 : vector<304xf32> to vector<304x1xf32>
    %c0_12 = arith.constant 0 : index
    %c0_13 = arith.constant 0 : index
    %25 = vector.load %arg5[%c0_12, %c0_13] : memref<1x1xf32, #tpu.memory_space<vmem>>, vector<1x1xf32>
    %26 = vector.broadcast %25 : vector<1x1xf32> to vector<304x1xf32>
    %27 = arith.addf %24, %26 : vector<304x1xf32>
    %c304_i32 = arith.constant 304 : i32
    %28 = arith.muli %arg0, %c304_i32 : i32
    %29 = tpu.iota {dimensions = array<i32: 0>} : vector<304x1xi32>
    %30 = vector.broadcast %28 : i32 to vector<304x1xi32>
    %31 = arith.addi %30, %29 : vector<304x1xi32>
    %c600_i32 = arith.constant 600 : i32
    %32 = vector.broadcast %c600_i32 : i32 to vector<304x1xi32>
    %33 = arith.cmpi slt, %31, %32 : vector<304x1xi32>
    %cst_14 = arith.constant 0xFF800000 : f32
    %34 = vector.broadcast %cst_14 : f32 to vector<304x1xf32>
    %35 = arith.select %33, %27, %34 : vector<304x1xi1>, vector<304x1xf32>
    %c0_15 = arith.constant 0 : index
    %c0_16 = arith.constant 0 : index
    %36 = vector.load %arg9[%c0_15, %c0_16] : memref<1x1xf32, #tpu.memory_space<vmem>>, vector<1x1xf32>
    %cst_17 = arith.constant dense<0xFF800000> : vector<1xf32>
    %37 = vector.multi_reduction <maximumf>, %35, %cst_17 [0] : vector<304x1xf32> to vector<1xf32>
    %38 = vector.shape_cast %37 : vector<1xf32> to vector<1x1xf32>
    %39 = arith.maximumf %36, %38 : vector<1x1xf32>
    %c0_18 = arith.constant 0 : index
    %c0_19 = arith.constant 0 : index
    %40 = vector.load %arg9[%c0_18, %c0_19] : memref<1x1xf32, #tpu.memory_space<vmem>>, vector<1x1xf32>
    %41 = arith.subf %40, %39 : vector<1x1xf32>
    %42 = math.exp %41 : vector<1x1xf32>
    %43 = vector.broadcast %39 : vector<1x1xf32> to vector<304x1xf32>
    %44 = arith.subf %35, %43 : vector<304x1xf32>
    %45 = math.exp %44 : vector<304x1xf32>
    %c0_20 = arith.constant 0 : index
    %c0_21 = arith.constant 0 : index
    %46 = vector.load %arg10[%c0_20, %c0_21] : memref<1x1xf32, #tpu.memory_space<vmem>>, vector<1x1xf32>
    %47 = arith.mulf %42, %46 : vector<1x1xf32>
    %cst_22 = arith.constant dense<0.000000e+00> : vector<1xf32>
    %48 = vector.multi_reduction <add>, %45, %cst_22 [0] : vector<304x1xf32> to vector<1xf32>
    %49 = vector.shape_cast %48 : vector<1xf32> to vector<1x1xf32>
    %50 = arith.addf %47, %49 : vector<1x1xf32>
    %c0_23 = arith.constant 0 : index
    %c0_24 = arith.constant 0 : index
    %51 = vector.load %arg10[%c0_23, %c0_24] : memref<1x1xf32, #tpu.memory_space<vmem>>, vector<1x1xf32>
    tpu.vector_store %arg10[%c0_23, %c0_24], %50 {strides = array<i32>} : memref<1x1xf32, #tpu.memory_space<vmem>>, vector<1x1xf32>,
    %52 = arith.truncf %45 : vector<304x1xf32> to vector<304x1xbf16>
    %cst_25 = arith.constant dense<0.000000e+00> : vector<1x512xf32>
    %53 = tpu.matmul %52, %3, %cst_25 {dimension_numbers = #tpu.dot_dimension_numbers<[0], [0], [1], [1], [0, 1, 1, 1], [], []>} : vector<304x1xbf16>, vector<304x512xbf16>, vector<1x512xf32> -> vector<1x512xf32>
    %54 = tpu.transpose %42, [1, 0] : vector<1x1xf32> -> vector<1x1xf32>
    %c0_26 = arith.constant 0 : index
    %c0_27 = arith.constant 0 : index
    %55 = vector.load %arg11[%c0_26, %c0_27] : memref<1x512xf32, #tpu.memory_space<vmem>>, vector<1x512xf32>
    %56 = vector.broadcast %54 : vector<1x1xf32> to vector<1x512xf32>
    %57 = arith.mulf %56, %55 : vector<1x512xf32>
    %58 = arith.addf %57, %53 : vector<1x512xf32>
    %c0_28 = arith.constant 0 : index
    %c0_29 = arith.constant 0 : index
    %59 = vector.load %arg11[%c0_28, %c0_29] : memref<1x512xf32, #tpu.memory_space<vmem>>, vector<1x512xf32>
    tpu.vector_store %arg11[%c0_28, %c0_29], %58 {strides = array<i32>} : memref<1x512xf32, #tpu.memory_space<vmem>>, vector<1x512xf32>,
    %c0_30 = arith.constant 0 : index
    %c0_31 = arith.constant 0 : index
    %60 = vector.load %arg9[%c0_30, %c0_31] : memref<1x1xf32, #tpu.memory_space<vmem>>, vector<1x1xf32>
    tpu.vector_store %arg9[%c0_30, %c0_31], %39 {strides = array<i32>} : memref<1x1xf32, #tpu.memory_space<vmem>>, vector<1x1xf32>,
    %c1_i32 = arith.constant 1 : i32
    %61 = arith.cmpi eq, %arg0, %c1_i32 : i32
    %62 = arith.extui %61 : i1 to i32
    %c0_i32_32 = arith.constant 0 : i32
    %63 = arith.cmpi ne, %62, %c0_i32_32 : i32
    scf.if %63 {
      %c0_33 = arith.constant 0 : index
      %c0_34 = arith.constant 0 : index
      %64 = vector.load %arg10[%c0_33, %c0_34] : memref<1x1xf32, #tpu.memory_space<vmem>>, vector<1x1xf32>
      %65 = tpu.reciprocal %64 {approx = true} : vector<1x1xf32> -> vector<1x1xf32>
      %c0_35 = arith.constant 0 : index
      %c0_36 = arith.constant 0 : index
      %66 = vector.load %arg11[%c0_35, %c0_36] : memref<1x512xf32, #tpu.memory_space<vmem>>, vector<1x512xf32>
      %67 = tpu.transpose %65, [1, 0] : vector<1x1xf32> -> vector<1x1xf32>
      %68 = vector.broadcast %67 : vector<1x1xf32> to vector<1x512xf32>
      %69 = arith.mulf %66, %68 : vector<1x512xf32>
      %c0_37 = arith.constant 0 : index
      %c0_38 = arith.constant 0 : index
      %70 = vector.load %arg6[%c0_37, %c0_38] : memref<2x512xf32, #tpu.memory_space<vmem>>, vector<2x512xf32>
      %cst_39 = arith.constant dense<0.000000e+00> : vector<1x2xf32>
      %71 = tpu.matmul %69, %70, %cst_39 {dimension_numbers = #tpu.dot_dimension_numbers<[1], [1], [0], [0], [0, 0, 1, 0], [], []>} : vector<1x512xf32>, vector<2x512xf32>, vector<1x2xf32> -> vector<1x2xf32>
      %c0_40 = arith.constant 0 : index
      %c0_41 = arith.constant 0 : index
      %72 = vector.load %arg7[%c0_40, %c0_41] : memref<1x2xf32, #tpu.memory_space<vmem>>, vector<1x2xf32>
      %73 = arith.addf %71, %72 : vector<1x2xf32>
      %c0_42 = arith.constant 0 : index
      %c0_43 = arith.constant 0 : index
      %74 = vector.load %arg8[%c0_42, %c0_43] : memref<1x2xf32, #tpu.memory_space<vmem>>, vector<1x2xf32>
      tpu.vector_store %arg8[%c0_42, %c0_43], %73 {strides = array<i32>} : memref<1x2xf32, #tpu.memory_space<vmem>>, vector<1x2xf32>,
    } else {
    }
    return
  }
  func.func @transform_0(%arg0: i32) -> (i32, i32) {
    %c0_i32 = arith.constant 0 : i32
    %c0_i32_0 = arith.constant 0 : i32
    return %arg0, %c0_i32 : i32, i32
  }
  func.func @transform_1(%arg0: i32) -> (i32, i32) {
    %c0_i32 = arith.constant 0 : i32
    %c0_i32_0 = arith.constant 0 : i32
    %c0_i32_1 = arith.constant 0 : i32
    return %c0_i32, %c0_i32_0 : i32, i32
  }
  func.func @transform_2(%arg0: i32) -> (i32, i32) {
    %c0_i32 = arith.constant 0 : i32
    %c0_i32_0 = arith.constant 0 : i32
    %c0_i32_1 = arith.constant 0 : i32
    return %c0_i32, %c0_i32_0 : i32, i32
  }
  func.func @transform_3(%arg0: i32) -> (i32, i32) {
    %c0_i32 = arith.constant 0 : i32
    %c0_i32_0 = arith.constant 0 : i32
    %c0_i32_1 = arith.constant 0 : i32
    return %c0_i32, %c0_i32_0 : i32, i32
  }
  func.func @transform_4(%arg0: i32) -> (i32, i32) {
    %c0_i32 = arith.constant 0 : i32
    %c0_i32_0 = arith.constant 0 : i32
    %c0_i32_1 = arith.constant 0 : i32
    return %c0_i32, %c0_i32_0 : i32, i32
  }
  func.func @transform_5(%arg0: i32) -> (i32, i32) {
    %c0_i32 = arith.constant 0 : i32
    %c0_i32_0 = arith.constant 0 : i32
    %c0_i32_1 = arith.constant 0 : i32
    return %c0_i32, %c0_i32_0 : i32, i32
  }
  func.func @transform_6(%arg0: i32) -> (i32, i32) {
    %c0_i32 = arith.constant 0 : i32
    %c0_i32_0 = arith.constant 0 : i32
    %c0_i32_1 = arith.constant 0 : i32
    return %c0_i32, %c0_i32_0 : i32, i32
  }
  func.func @transform_7(%arg0: i32) -> (i32, i32) {
    %c0_i32 = arith.constant 0 : i32
    %c0_i32_0 = arith.constant 0 : i32
    %c0_i32_1 = arith.constant 0 : i32
    return %c0_i32, %c0_i32_0 : i32, i32
  }
}

</mosaic_0001>

<bundles_post_ra>
// kernel: tpu_custom_call.1
= control target key start
LH: loop header
LB: loop body
LE: loop exit
PB: predicated region body
PF: predicated region fallthrough
CT: control target
= control target key end

     0   :  { %s5257_s0 = inlined_call_operand.hbm [shape: bf16[608,512], index: 0, kind: input, shape index: {}]   ;;  %s5258_s1 = inlined_call_operand.hbm [shape: bf16[512,256], index: 1, kind: input, shape index: {}]   ;;  %s5259_s2 = inlined_call_operand.hbm [shape: f32[1,256], index: 2, kind: input, shape index: {}]   ;;  %s5260_s3 = inlined_call_operand.vmem [shape: f32[1,128], index: 3, kind: input, shape index: {}]   ;;  %s5261_s4 = inlined_call_operand.<no memory space> [shape: f32[1,1], index: 4, kind: input, shape index: {}]   ;;  %s5262_s5 = inlined_call_operand.vmem [shape: f32[2,512], index: 5, kind: input, shape index: {}]   ;;  %s5263_s6 = inlined_call_operand.vmem [shape: f32[1,2], index: 6, kind: input, shape index: {}]   ;;  %s5264_s7 = inlined_call_operand.hbm [shape: f32[1,2], index: 7, kind: output, shape index: {}]  }
   0x1   :  { %v12_v0 = vstv %s5261_s4 }
   0x2   :  { %13 = vst [vmem:[#allocation5] sm:$0x1] %v12_v0 }
   0x3   :  { %14 = vsyncpa [#allocation7], 0 }
   0x4   :  { %16 = vsyncpa [#allocation7 + $0x1], 0 }
   0x5   :  { %17 = vsyncpa [#allocation10], 0 }
   0x6   :  { %18 = vsyncpa [#allocation8], 0  ;;  %s4024_s26 = smov 0   ;;  %s4026_s27 = smov 0  }
   0x7   :  { %s4028_s28 = smov 0   ;;  %s4030_s29 = smov 0  }
   0x8 LB: > { %s4043_s4 = sadd.s32 4294967295, %s3965_s29   ;;  %p44_p0 = scmp.ne.s32.totalorder %s3957_s27, %s3953_s26  ;;  %s3965_s29 = sphi %s4030_s29, %s5320_s29   ;;  %s3961_s28 = sphi %s4028_s28, %s5319_s28   ;;  %s3957_s27 = sphi %s4026_s27, %s5318_s27   ;;  %s3953_s26 = sphi %s4024_s26, %s5317_s26  }
   0x9   : > { %p5265_p1 = scmp.eq.s32.totalorder %s4043_s4, 0  ;;  %p3119_p2 = scmp.ge.s32.totalorder %s3965_s29, 1 }
   0xa   : > { %p202_p3 = scmp.lt.s32.totalorder %s3965_s29, 3  ;;  %s3967_s9 = smov [#allocation9]  }
   0xb   : > { %p4052_p5 = por %p5265_p1, %p44_p0  ;;  %s214_s10 = sshll.u32 %s3967_s9, 4  ;;  %s215_s10 = int_to_ptr.vmem [resolvable:$true] %s214_s10 }
   0xc   : > { %p4056_p6 = pnand %p3119_p2, %p202_p3  ;;  %s3968_s12 = smov [#allocation11]  }
   0xd   : > { %s5283_s30 = scalar_select %p4052_p5, 1, 0 }
   0xe   : > { %s5284_s8 = scalar_select %p4056_p6, 1, 0 }
   0xf   : > { %p3297_p7 = pneg %p4056_p6  ;;  %s228_s13 = sshll.u32 %s3968_s12, 4  ;;  %s229_s13 = int_to_ptr.vmem [resolvable:$true] %s228_s13 }
  0x10   : > { %s3830_s14 = scalar_lea.vmem %s215_s10, 8192  ;;  %p3838_p13 = scmp.lt.s32.totalorder %s215_s10, %s215_s10 }
  0x11   : > { %p4064_p8 = pnand %p3297_p7, %p5265_p1  ;;  %p3831_p10 = scmp.ne.s32.totalorder %s215_s10, %s3830_s14 }
  0x12   : > { %p3839_p0 = scmp.lt.s32.totalorder %s3830_s14, %s3830_s14 }
  0x13   : > { %p3821_p9 = pneg %p4064_p8 }
  0x14   : > { %p3840_p2 = por %p3839_p0, %p3838_p13 }
  0x15   : > { %p3833_p11 = pnand %p3831_p10, %p3821_p9 }
  0x17   : > { %p3834_p12 = pneg %p3833_p11 }
  0x19   : > { %p3841_p3 = pnand %p3840_p2, %p3834_p12 }
  0x1b   : > { %3844 = shalt.err (!%p3841_p3)
}
  0x1c   : > { %s3969_s15 = smov 128   ;;  %s3970_s16 = smov 8  }
  0x1d   : > { %3300 = dma.hbm_to_vmem [thread:$0]  (!%p4064_p8), %s5258_s1, 8192, %s215_s10, [#allocation10], %s3969_s15, %s3969_s15, %s3970_s16  }
  0x1e   : > { %s3856_s19 = scalar_lea.vmem %s229_s13, 32  ;;  %p3864_p4 = scmp.lt.s32.totalorder %s229_s13, %s229_s13 }
  0x1f   : > { %p3857_p7 = scmp.ne.s32.totalorder %s229_s13, %s3856_s19  ;;  %p3865_p1 = scmp.lt.s32.totalorder %s3856_s19, %s3856_s19 }
  0x21   : > { %p3859_p10 = pnand %p3857_p7, %p3821_p9  ;;  %p3866_p13 = por %p3865_p1, %p3864_p4 }
  0x23   : > { %p3860_p11 = pneg %p3859_p10 }
  0x25   : > { %p3867_p12 = pnand %p3866_p13, %p3860_p11 }
  0x27   : > { %3870 = shalt.err (!%p3867_p12)
}
  0x28   : > { %3303 = dma.hbm_to_vmem [thread:$0]  (!%p4064_p8), %s5259_s2, 32, %s229_s13, [#allocation10]  }
  0x29   : > { %s4087_s22 = sadd.s32 1, %s3965_s29   ;;  %s31_s23 = sadd.s32 1, %s3961_s28 }
  0x2a   : > { %s28_s24 = ssub.s32 %s3965_s29, %s4087_s22  ;;  %p38_p1 = scmp.ne.s32.totalorder %s3961_s28, %s3957_s27 }
  0x2b   : > { %p29_p4 = scmp.eq.s32.totalorder %s28_s24, 0  ;;  %p39_p9 = scmp.eq.s32.totalorder %s3965_s29, 0 }
  0x2c   : > { %p3310_p0 = scmp.lt.s32.totalorder %s3965_s29, 2  ;;  %s251_s25 = sand.u32 1, %s3961_s28  }
  0x2d   : > { %s4098_s26 = scalar_select %p29_p4, %s3961_s28, %s31_s23  }
  0x2e   : > { %p40_p2 = por %p39_p9, %p38_p1  ;;  %s3281_s9 = smul.u32 608, %s251_s25 }
  0x2f   : > { %s3280_s10 = smul.u32 9728, %s3965_s29  ;;  %s4112_s17 = scalar_lea.sflag [#allocation7], %s251_s25 }
  0x30   : > { %p4101_p3 = pnand %p3310_p0, %p40_p2  ;;  %s255_s15 = scalar_lea.vmem [#allocation6], %s3281_s9 }
  0x31   : > { %s4108_s14 = scalar_lea.hbm %s5257_s0, %s3280_s10  ;;  %s263_s16 = sshll.u32 %s255_s15, 4  ;;  %s4110_s16 = int_to_ptr.vmem [resolvable:$true] %s263_s16 }
  0x32   : > { %s3871_s29 = scalar_lea.hbm %s4108_s14, 9728  ;;  %p3873_p7 = pneg %p4101_p3 }
  0x33   : > { %p3872_p8 = scmp.ne.s32.totalorder %s4108_s14, %s3871_s29  ;;  %s3876_s20 = scalar_lea.hbm %s5257_s0, 19456 }
  0x34   : > { %p3877_p13 = scmp.lt.s32.totalorder %s4108_s14, %s5257_s0  ;;  %p3878_p12 = scmp.lt.s32.totalorder %s3876_s20, %s3871_s29 }
  0x35   : > { %p3874_p10 = pnand %p3873_p7, %p3872_p8 }
  0x36   : > { %p3879_p1 = por %p3878_p12, %p3877_p13 }
  0x37   : > { %p3875_p11 = pneg %p3874_p10 }
  0x39   : > { %p3880_p4 = pnand %p3879_p1, %p3875_p11 }
  0x3b   : > { %3883 = shalt.err (!%p3880_p4)
}
  0x3c   : > { %s3884_s24 = scalar_lea.vmem %s4110_s16, 9728  ;;  %s3971_s25 = smov [#allocation6]  }
  0x3d   : > { %p3885_p9 = scmp.ne.s32.totalorder %s4110_s16, %s3884_s24  ;;  %s3889_s9 = sshll.u32 %s3971_s25, 4  ;;  %s3890_s9 = int_to_ptr.vmem [resolvable:$false] %s3889_s9 }
  0x3e   : > { %s3891_s10 = scalar_lea.vmem %s3890_s9, 19456  ;;  %p3892_p8 = scmp.lt.s32.totalorder %s4110_s16, %s3890_s9 }
  0x3f   : > { %p3887_p0 = pnand %p3885_p9, %p3873_p7  ;;  %p3893_p10 = scmp.lt.s32.totalorder %s3891_s10, %s3884_s24 }
  0x41   : > { %p3888_p2 = pneg %p3887_p0  ;;  %p3894_p5 = por %p3893_p10, %p3892_p8 }
  0x43   : > { %p3895_p6 = pnand %p3894_p5, %p3888_p2 }
  0x45   : > { %3898 = shalt.err (!%p3895_p6)
}
  0x46   : > { %s3972_s12 = smov 256   ;;  %s3973_s13 = smov 16  }
  0x47   : > { %3307 = dma.hbm_to_vmem [thread:$0]  (!%p4101_p3), %s4108_s14, 9728, %s4110_s16, %s4112_s17, %s3972_s12, %s3972_s12, %s3973_s13  }
  0x48   : > { %p5287_p7 = scmp.ne.s32.totalorder %s5284_s8, 0 }
  0x4a   : > { %275 = sbr.rel (%p5287_p7) target bundleno = 1556 (0x614), region = 48 }
  0x4f   : > { %s277_s15 = sand.u32 1, %s3957_s27   ;;  %p5288_p5 = scmp.ne.s32.totalorder %s5283_s30, 0 }
  0x50   : > { %s3282_s29 = smul.u32 608, %s277_s15  ;;  %s278_s18 = scalar_lea.sflag [#allocation7], %s277_s15 }
  0x52   : > { %s4136_s19 = scalar_lea.vmem [#allocation6], %s3282_s29 }
  0x53   : > { %3940 = dma.done.wait (%p5288_p5), %s278_s18, 9728  }
  0x54   : > { %3942 = vsyncadd (%p5288_p5), %s278_s18, 4294957568  ;;  %p5289_p6 = scmp.eq.s32.totalorder %s4043_s4, 0 }
  0x56   : > { %3944 = dma.done.wait (%p5289_p6), [#allocation10], 8224   ;;  %p5290_p3 = pmov %p5289_p6 }
  0x57   : > { %p5291_p11 = scmp.ne.s32.totalorder %s4043_s4, 0 }
  0x58   : > { %3946 = vsyncadd (%p5290_p3), [#allocation10], 4294959072 }
  0x59   : > { %320 = sbr.rel (%p5291_p11) target bundleno = 98 (0x62), region = 64 }
  0x5e   : > { %vm321_vm0 = vcmask 0   ;;  %v324_v1 = vlaneseq  ;;  %v3974_v2 = vmov -inf   ;;  %v3975_v3 = vmov 0.0  }
  0x5f   : > { %322 = vst.msk [vmem:[#allocation2] sm:$0x1] %vm321_vm0, %v3974_v2  ;;  %323 = vst.msk [vmem:[#allocation3] sm:$0x1] %vm321_vm0, %v3975_v3 }
  0x60   : > { %vm326_vm1 = vcmp.lt.s32.totalorder %v324_v1, 512 }
  0x61   : > { %328 = vst.msk [vmem:[#allocation4] sm:$0xf] %vm326_vm1, %v3975_v3 }
  0x62 PF: > { %v3364_v4 = vld [vmem:[#allocation9 + $0x74] ss:$8 sps:$4 sm:$0xff]   ;;  %v3368_v6 = vld [vmem:[#allocation9 + $0x70] ss:$8 sps:$4 sm:$0xff]   ;;  %v3370_v8 = vld [vmem:[#allocation9 + $0x64] ss:$8 sps:$4 sm:$0xff]  }
  0x63   : > { %v3366_v5 = vld [vmem:[#allocation9 + $0x174] ss:$8 sps:$4 sm:$0xff]   ;;  %1181 = vmatprep.subr.bf16.mxu0 %v3364_v4  ;;  %v3369_v7 = vld [vmem:[#allocation9 + $0x170] ss:$8 sps:$4 sm:$0xff]   ;;  %v3372_v9 = vld [vmem:[#allocation9 + $0x164] ss:$8 sps:$4 sm:$0xff]  }
  0x64   : > { %1404 = vmatprep.subr.bf16.mxu1 %v3366_v5  ;;  %1182 = vmatpush1.bf16.msra.mxu0 %v3368_v6  ;;  %v3374_v10 = vld [vmem:[#allocation9 + $0x60] ss:$8 sps:$4 sm:$0xff]   ;;  %v3376_v12 = vld [vmem:[#allocation9 + $0x54] ss:$8 sps:$4 sm:$0xff]   ;;  %v3380_v14 = vld [vmem:[#allocation9 + $0x50] ss:$8 sps:$4 sm:$0xff]  }
  0x65   : > { %1405 = vmatpush1.bf16.msra.mxu1 %v3369_v7  ;;  %1183 = vmatprep.subr.bf16.mxu0 %v3370_v8  ;;  %v3375_v11 = vld [vmem:[#allocation9 + $0x160] ss:$8 sps:$4 sm:$0xff]   ;;  %v3378_v13 = vld [vmem:[#allocation9 + $0x154] ss:$8 sps:$4 sm:$0xff]   ;;  %v3381_v15 = vld [vmem:[#allocation9 + $0x150] ss:$8 sps:$4 sm:$0xff]  }
  0x66   : > { %1406 = vmatprep.subr.bf16.mxu1 %v3372_v9  ;;  %v3382_v16 = vld [vmem:[#allocation9 + $0x44] ss:$8 sps:$4 sm:$0xff]   ;;  %v3386_v18 = vld [vmem:[#allocation9 + $0x40] ss:$8 sps:$4 sm:$0xff]   ;;  %v3388_v20 = vld [vmem:[#allocation9 + $0x34] ss:$8 sps:$4 sm:$0xff]  }
  0x67   : > { %v3384_v17 = vld [vmem:[#allocation9 + $0x144] ss:$8 sps:$4 sm:$0xff]   ;;  %v3387_v19 = vld [vmem:[#allocation9 + $0x140] ss:$8 sps:$4 sm:$0xff]   ;;  %v3390_v21 = vld [vmem:[#allocation9 + $0x134] ss:$8 sps:$4 sm:$0xff]  }
  0x68   : > { %1184 = vmatpush1.bf16.msra.mxu0 %v3374_v10  ;;  %v3392_v22 = vld [vmem:[#allocation9 + $0x30] ss:$8 sps:$4 sm:$0xff]   ;;  %v3394_v24 = vld [vmem:[#allocation9 + $0x24] ss:$8 sps:$4 sm:$0xff]   ;;  %v3398_v26 = vld [vmem:[#allocation9 + $0x20] ss:$8 sps:$4 sm:$0xff]  }
  0x69   : > { %1407 = vmatpush1.bf16.msra.mxu1 %v3375_v11  ;;  %1185 = vmatprep.subr.bf16.mxu0 %v3376_v12  ;;  %v3393_v23 = vld [vmem:[#allocation9 + $0x130] ss:$8 sps:$4 sm:$0xff]   ;;  %v3396_v25 = vld [vmem:[#allocation9 + $0x124] ss:$8 sps:$4 sm:$0xff]   ;;  %v3399_v27 = vld [vmem:[#allocation9 + $0x120] ss:$8 sps:$4 sm:$0xff]  }
  0x6a   : > { %1408 = vmatprep.subr.bf16.mxu1 %v3378_v13  ;;  %v3400_v28 = vld [vmem:[#allocation9 + $0x14] ss:$8 sps:$4 sm:$0xff]   ;;  %v3404_v30 = vld [vmem:[#allocation9 + $0x10] ss:$8 sps:$4 sm:$0xff]   ;;  %v3406_v32 = vld [vmem:[#allocation9 + $0x4] ss:$8 sps:$4 sm:$0xff]  }
  0x6b   : > { %v3402_v29 = vld [vmem:[#allocation9 + $0x114] ss:$8 sps:$4 sm:$0xff]   ;;  %v3405_v31 = vld [vmem:[#allocation9 + $0x110] ss:$8 sps:$4 sm:$0xff]   ;;  %v3408_v33 = vld [vmem:[#allocation9 + $0x104] ss:$8 sps:$4 sm:$0xff]  }
  0x6c   : > { %1186 = vmatpush1.bf16.msra.mxu0 %v3380_v14  ;;  %v3410_v34 = vld [vmem:[#allocation9] ss:$8 sps:$4 sm:$0xff]   ;;  %v3412_v36 = vld [vmem:[#allocation9 + $0xf4] ss:$8 sps:$4 sm:$0xff]   ;;  %v3416_v38 = vld [vmem:[#allocation9 + $0xf0] ss:$8 sps:$4 sm:$0xff]  }
  0x6d   : > { %1409 = vmatpush1.bf16.msra.mxu1 %v3381_v15  ;;  %1187 = vmatprep.subr.bf16.mxu0 %v3382_v16  ;;  %v3411_v35 = vld [vmem:[#allocation9 + $0x100] ss:$8 sps:$4 sm:$0xff]   ;;  %v3414_v37 = vld [vmem:[#allocation9 + $0x1f4] ss:$8 sps:$4 sm:$0xff]   ;;  %v3417_v39 = vld [vmem:[#allocation9 + $0x1f0] ss:$8 sps:$4 sm:$0xff]  }
  0x6e   : > { %1410 = vmatprep.subr.bf16.mxu1 %v3384_v17  ;;  %v3418_v40 = vld [vmem:[#allocation9 + $0xe4] ss:$8 sps:$4 sm:$0xff]   ;;  %v3422_v42 = vld [vmem:[#allocation9 + $0xe0] ss:$8 sps:$4 sm:$0xff]   ;;  %v3424_v44 = vld [vmem:[#allocation9 + $0xd4] ss:$8 sps:$4 sm:$0xff]  }
  0x6f   : > { %v3420_v41 = vld [vmem:[#allocation9 + $0x1e4] ss:$8 sps:$4 sm:$0xff]   ;;  %v3423_v43 = vld [vmem:[#allocation9 + $0x1e0] ss:$8 sps:$4 sm:$0xff]   ;;  %v3426_v45 = vld [vmem:[#allocation9 + $0x1d4] ss:$8 sps:$4 sm:$0xff]  }
  0x70   : > { %1188 = vmatpush1.bf16.msra.mxu0 %v3386_v18  ;;  %v3428_v46 = vld [vmem:[#allocation9 + $0xd0] ss:$8 sps:$4 sm:$0xff]   ;;  %v3430_v48 = vld [vmem:[#allocation9 + $0xc4] ss:$8 sps:$4 sm:$0xff]   ;;  %v3434_v50 = vld [vmem:[#allocation9 + $0xc0] ss:$8 sps:$4 sm:$0xff]  }
  0x71   : > { %1411 = vmatpush1.bf16.msra.mxu1 %v3387_v19  ;;  %1189 = vmatprep.subr.bf16.mxu0 %v3388_v20  ;;  %v3429_v47 = vld [vmem:[#allocation9 + $0x1d0] ss:$8 sps:$4 sm:$0xff]   ;;  %v3432_v49 = vld [vmem:[#allocation9 + $0x1c4] ss:$8 sps:$4 sm:$0xff]   ;;  %v3435_v51 = vld [vmem:[#allocation9 + $0x1c0] ss:$8 sps:$4 sm:$0xff]  }
  0x72   : > { %1412 = vmatprep.subr.bf16.mxu1 %v3390_v21  ;;  %v3436_v52 = vld [vmem:[#allocation9 + $0xb4] ss:$8 sps:$4 sm:$0xff]   ;;  %v3440_v56 = vld [vmem:[#allocation9 + $0xb0] ss:$8 sps:$4 sm:$0xff]   ;;  %v3442_v58 = vld [vmem:[#allocation9 + $0xa4] ss:$8 sps:$4 sm:$0xff]  }
  0x73   : > { %v4149_v53 = vld [vmem:[%s4136_s19 + $0x4] ss:$16 sps:$4 sm:$0xff]   ;;  %v4152_v55 = vld [vmem:[%s4136_s19 + $0xc] ss:$16 sps:$4 sm:$0xff]   ;;  %v3441_v57 = vld [vmem:[#allocation9 + $0x1b0] ss:$8 sps:$4 sm:$0xff]  }
  0x74   : > { %1190 = vmatpush1.bf16.msra.mxu0 %v3392_v22  ;;  %v3438_v54 = vld [vmem:[#allocation9 + $0x1b4] ss:$8 sps:$4 sm:$0xff]   ;;  %1213 = vmatprep.mubr.bf16.mxu0 %v4149_v53  ;;  %v3444_v59 = vld [vmem:[#allocation9 + $0x1a4] ss:$8 sps:$4 sm:$0xff]   ;;  %v3446_v60 = vld [vmem:[#allocation9 + $0xa0] ss:$8 sps:$4 sm:$0xff]  }
  0x75   : > { %1413 = vmatpush1.bf16.msra.mxu1 %v3393_v23  ;;  %1191 = vmatprep.subr.bf16.mxu0 %v3394_v24  ;;  %v3447_v61 = vld [vmem:[#allocation9 + $0x1a0] ss:$8 sps:$4 sm:$0xff]   ;;  %v3448_v62 = vld [vmem:[#allocation9 + $0x94] ss:$8 sps:$4 sm:$0xff]   ;;  %v3452_v0 = vld [vmem:[#allocation9 + $0x90] ss:$8 sps:$4 sm:$0xff]  }
  0x76   : > { %1414 = vmatprep.subr.bf16.mxu1 %v3396_v25  ;;  %1436 = vmatprep.mubr.bf16.mxu1 %v4152_v55  ;;  %v3450_v63 = vld [vmem:[#allocation9 + $0x194] ss:$8 sps:$4 sm:$0xff]   ;;  %v3453_v1 = vld [vmem:[#allocation9 + $0x190] ss:$8 sps:$4 sm:$0xff]   ;;  %v3454_v2 = vld [vmem:[#allocation9 + $0x84] ss:$8 sps:$4 sm:$0xff]  }
  0x77   : > { %v3456_v3 = vld [vmem:[#allocation9 + $0x184] ss:$8 sps:$4 sm:$0xff]   ;;  %v3458_v4 = vld [vmem:[#allocation9 + $0x80] ss:$8 sps:$4 sm:$0xff]   ;;  %s2021_s16 = smul.u32 304, %s4043_s4  ;;  %vm2177_vm7 = vcmask 7168  }
  0x78   : > { %1192 = vmatpush1.bf16.msra.mxu0 %v3398_v26  ;;  %v3459_v5 = vld [vmem:[#allocation9 + $0x180] ss:$8 sps:$4 sm:$0xff]   ;;  %v4163_v8 = vld [vmem:[%s4136_s19 + $0x24] ss:$16 sps:$4 sm:$0xff]   ;;  %v4169_v10 = vld [vmem:[%s4136_s19 + $0xec] ss:$16 sps:$4 sm:$0xff]  }
  0x79   : > { %1415 = vmatpush1.bf16.msra.mxu1 %v3399_v27  ;;  %1193 = vmatprep.subr.bf16.mxu0 %v3400_v28  ;;  %v4157_v6 = vld [vmem:[%s4136_s19] ss:$16 sps:$4 sm:$0xff]   ;;  %v4160_v7 = vld [vmem:[%s4136_s19 + $0x8] ss:$16 sps:$4 sm:$0xff]   ;;  %v4166_v9 = vld [vmem:[%s4136_s19 + $0xe4] ss:$16 sps:$4 sm:$0xff]  }
  0x7a   : > { %1416 = vmatprep.subr.bf16.mxu1 %v3402_v29  ;;  %v3468_v11 = vld [vmem:[%s4136_s19 + $0x2c] ss:$16 sps:$4 sm:$0xff]   ;;  %v4175_v12 = vld [vmem:[%s4136_s19 + $0xe0] ss:$16 sps:$4 sm:$0xff]   ;;  %v4180_v13 = vld [vmem:[%s4136_s19 + $0xe8] ss:$16 sps:$4 sm:$0xff]  }
  0x7b   : > { %v4184_v14 = vld [vmem:[%s4136_s19 + $0xc4] ss:$16 sps:$4 sm:$0xff]   ;;  %v4187_v15 = vld [vmem:[%s4136_s19 + $0xcc] ss:$16 sps:$4 sm:$0xff]   ;;  %v3470_v16 = vld [vmem:[%s4136_s19 + $0x20] ss:$16 sps:$4 sm:$0xff]  }
  0x7c   : > { %1194 = vmatpush1.bf16.msra.mxu0 %v3404_v30  ;;  %v3471_v17 = vld [vmem:[%s4136_s19 + $0x28] ss:$16 sps:$4 sm:$0xff]   ;;  %v3472_v18 = vld [vmem:[%s4136_s19 + $0x44] ss:$16 sps:$4 sm:$0xff]   ;;  %v3474_v19 = vld [vmem:[%s4136_s19 + $0x4c] ss:$16 sps:$4 sm:$0xff]  }
  0x7d   : > { %1417 = vmatpush1.bf16.msra.mxu1 %v3405_v31  ;;  %1195 = vmatprep.subr.bf16.mxu0 %v3406_v32  ;;  %v3490_v20 = vld [vmem:[%s4136_s19 + $0xa4] ss:$16 sps:$4 sm:$0xff]   ;;  %v4199_v21 = vld [vmem:[%s4136_s19 + $0xc0] ss:$16 sps:$4 sm:$0xff]   ;;  %v4202_v22 = vld [vmem:[%s4136_s19 + $0xc8] ss:$16 sps:$4 sm:$0xff]  }
  0x7e   : > { %1418 = vmatprep.subr.bf16.mxu1 %v3408_v33  ;;  %v3492_v23 = vld [vmem:[%s4136_s19 + $0xac] ss:$16 sps:$4 sm:$0xff]   ;;  %v4208_v24 = vld [vmem:[%s4136_s19 + $0xa0] ss:$16 sps:$4 sm:$0xff]   ;;  %v4211_v25 = vld [vmem:[%s4136_s19 + $0xa8] ss:$16 sps:$4 sm:$0xff]  }
  0x7f   : > { %v3484_v26 = vld [vmem:[%s4136_s19 + $0x84] ss:$16 sps:$4 sm:$0xff]   ;;  %v3486_v27 = vld [vmem:[%s4136_s19 + $0x8c] ss:$16 sps:$4 sm:$0xff]   ;;  %v3476_v28 = vld [vmem:[%s4136_s19 + $0x40] ss:$16 sps:$4 sm:$0xff]  }
  0x80   : > { %1196 = vmatpush1.bf16.msra.mxu0 %v3410_v34  ;;  %v3477_v29 = vld [vmem:[%s4136_s19 + $0x48] ss:$16 sps:$4 sm:$0xff]   ;;  %v3478_v30 = vld [vmem:[%s4136_s19 + $0x64] ss:$16 sps:$4 sm:$0xff]   ;;  %v3488_v31 = vld [vmem:[%s4136_s19 + $0x80] ss:$16 sps:$4 sm:$0xff]  }
  0x81   : > { %1419 = vmatpush1.bf16.msra.mxu1 %v3411_v35  ;;  %1197 = vmatprep.subr.bf16.mxu0 %v3412_v36  ;;  %v3489_v32 = vld [vmem:[%s4136_s19 + $0x88] ss:$16 sps:$4 sm:$0xff]   ;;  %v3480_v33 = vld [vmem:[%s4136_s19 + $0x6c] ss:$16 sps:$4 sm:$0xff]   ;;  %v3482_v34 = vld [vmem:[%s4136_s19 + $0x60] ss:$16 sps:$4 sm:$0xff]  }
  0x82   : > { %1420 = vmatprep.subr.bf16.mxu1 %v3414_v37  ;;  %v3483_v35 = vld [vmem:[%s4136_s19 + $0x68] ss:$16 sps:$4 sm:$0xff]   ;;  %v4229_v36 = vld [vmem:[%s4136_s19 + $0x1e4] ss:$16 sps:$4 sm:$0xff]   ;;  %v4232_v37 = vld [vmem:[%s4136_s19 + $0x1ec] ss:$16 sps:$4 sm:$0xff]  }
  0x83   : > { %p3273_p13 = scmp.ne.s32.totalorder %s4043_s4, 1 }
  0x84   : > { %1198 = vmatpush2.bf16.msra.mxu0 %v3416_v38  ;;  %v4239_v38 = vld [vmem:[%s4136_s19 + $0x1e0] ss:$16 sps:$4 sm:$0xff]  }
  0x85   : > { %1421 = vmatpush2.bf16.msra.mxu1 %v3417_v39  ;;  %1199 = vmatprep.subr.bf16.mxu0 %v3418_v40  ;;  %v4242_v39 = vld [vmem:[%s4136_s19 + $0x1e8] ss:$16 sps:$4 sm:$0xff]   ;;  %v4245_v40 = vld [vmem:[%s4136_s19 + $0x1c4] ss:$16 sps:$4 sm:$0xff]  }
  0x86   : > { %1422 = vmatprep.subr.bf16.mxu1 %v3420_v41  ;;  %v4248_v41 = vld [vmem:[%s4136_s19 + $0x1cc] ss:$16 sps:$4 sm:$0xff]  }
  0x88   : > { %1200 = vmatpush2.bf16.msra.mxu0 %v3422_v42  ;;  %v4255_v42 = vld [vmem:[%s4136_s19 + $0x1c0] ss:$16 sps:$4 sm:$0xff]  }
  0x89   : > { %1423 = vmatpush2.bf16.msra.mxu1 %v3423_v43  ;;  %1201 = vmatprep.subr.bf16.mxu0 %v3424_v44  ;;  %v4258_v43 = vld [vmem:[%s4136_s19 + $0x1c8] ss:$16 sps:$4 sm:$0xff]   ;;  %v4261_v44 = vld [vmem:[%s4136_s19 + $0x1a4] ss:$16 sps:$4 sm:$0xff]  }
  0x8a   : > { %1424 = vmatprep.subr.bf16.mxu1 %v3426_v45  ;;  %v4264_v45 = vld [vmem:[%s4136_s19 + $0x1ac] ss:$16 sps:$4 sm:$0xff]  }
  0x8c   : > { %1202 = vmatpush2.bf16.msra.mxu0 %v3428_v46  ;;  %v4273_v46 = vld [vmem:[%s4136_s19 + $0x1a0] ss:$16 sps:$4 sm:$0xff]  }
  0x8d   : > { %1425 = vmatpush2.bf16.msra.mxu1 %v3429_v47  ;;  %1203 = vmatprep.subr.bf16.mxu0 %v3430_v48  ;;  %v4276_v47 = vld [vmem:[%s4136_s19 + $0x1a8] ss:$16 sps:$4 sm:$0xff]   ;;  %v4281_v48 = vld [vmem:[%s4136_s19 + $0x184] ss:$16 sps:$4 sm:$0xff]  }
  0x8e   : > { %1426 = vmatprep.subr.bf16.mxu1 %v3432_v49  ;;  %v4284_v49 = vld [vmem:[%s4136_s19 + $0x18c] ss:$16 sps:$4 sm:$0xff]  }
  0x90   : > { %1204 = vmatpush2.bf16.msra.mxu0 %v3434_v50  ;;  %v4291_v50 = vld [vmem:[%s4136_s19 + $0x180] ss:$16 sps:$4 sm:$0xff]  }
  0x91   : > { %1427 = vmatpush2.bf16.msra.mxu1 %v3435_v51  ;;  %1205 = vmatprep.subr.bf16.mxu0 %v3436_v52  ;;  %v4294_v51 = vld [vmem:[%s4136_s19 + $0x188] ss:$16 sps:$4 sm:$0xff]   ;;  %v3526_v52 = vld [vmem:[%s4136_s19 + $0x164] ss:$16 sps:$4 sm:$0xff]  }
  0x92   : > { %1428 = vmatprep.subr.bf16.mxu1 %v3438_v54  ;;  %v3530_v54 = vld [vmem:[%s4136_s19 + $0x160] ss:$16 sps:$4 sm:$0xff]  }
  0x94   : > { %1206 = vmatpush2.bf16.msra.mxu0 %v3440_v56  ;;  %v3520_v56 = vld [vmem:[%s4136_s19 + $0x144] ss:$16 sps:$4 sm:$0xff]  }
  0x95   : > { %1429 = vmatpush2.bf16.msra.mxu1 %v3441_v57  ;;  %1207 = vmatprep.subr.bf16.mxu0 %v3442_v58  ;;  %v3522_v57 = vld [vmem:[%s4136_s19 + $0x14c] ss:$16 sps:$4 sm:$0xff]   ;;  %v3508_v58 = vld [vmem:[%s4136_s19 + $0x104] ss:$16 sps:$4 sm:$0xff]  }
  0x96   : > { %1430 = vmatprep.subr.bf16.mxu1 %v3444_v59  ;;  %v3524_v59 = vld [vmem:[%s4136_s19 + $0x140] ss:$16 sps:$4 sm:$0xff]  }
  0x98   : > { %1208 = vmatpush2.bf16.msra.mxu0 %v3446_v60  ;;  %v3525_v60 = vld [vmem:[%s4136_s19 + $0x148] ss:$16 sps:$4 sm:$0xff]  }
  0x99   : > { %1431 = vmatpush2.bf16.msra.mxu1 %v3447_v61  ;;  %1209 = vmatprep.subr.bf16.mxu0 %v3448_v62  ;;  %v3510_v61 = vld [vmem:[%s4136_s19 + $0x10c] ss:$16 sps:$4 sm:$0xff]   ;;  %v3514_v62 = vld [vmem:[%s4136_s19 + $0x124] ss:$16 sps:$4 sm:$0xff]  }
  0x9a   : > { %1432 = vmatprep.subr.bf16.mxu1 %v3450_v63  ;;  %v3516_v63 = vld [vmem:[%s4136_s19 + $0x12c] ss:$16 sps:$4 sm:$0xff]  }
  0x9c   : > { %1210 = vmatpush2.bf16.msra.mxu0 %v3452_v0  ;;  %v3518_v0 = vld [vmem:[%s4136_s19 + $0x120] ss:$16 sps:$4 sm:$0xff]  }
  0x9d   : > { %1433 = vmatpush2.bf16.msra.mxu1 %v3453_v1  ;;  %1211 = vmatprep.subr.bf16.mxu0 %v3454_v2  ;;  %v3519_v1 = vld [vmem:[%s4136_s19 + $0x128] ss:$16 sps:$4 sm:$0xff]   ;;  %v3512_v2 = vld [vmem:[%s4136_s19 + $0x100] ss:$16 sps:$4 sm:$0xff]  }
  0x9e   : > { %1434 = vmatprep.subr.bf16.mxu1 %v3456_v3  ;;  %v3513_v3 = vld [vmem:[%s4136_s19 + $0x108] ss:$16 sps:$4 sm:$0xff]  }
  0xa0   : > { %1212 = vmatpush2.bf16.msra.mxu0 %v3458_v4  ;;  %v3568_v4 = vld [vmem:[%s4136_s19 + $0x244] ss:$16 sps:$4 sm:$0xff]  }
  0xa1   : > { %1435 = vmatpush2.bf16.msra.mxu1 %v3459_v5  ;;  %2622 = vmatprep.subr.bf16.mxu0 %v4169_v10  ;;  %v3570_v5 = vld [vmem:[%s4136_s19 + $0x24c] ss:$16 sps:$4 sm:$0xff]  }
  0xa2   : > { %2540 = vmatprep.subr.bf16.mxu1 %v4166_v9 }
  0xa3   : > { %1214 = vmatmul.mubr.bf16.vlgmr.msra.gmra.mxu0 %v4157_v6 }
  0xa4   : > { %1437 = vmatmul.mubr.bf16.vlgmr.msra.gmra.mxu1 %v4160_v7  ;;  %1223 = vmatprep.mubr.bf16.mxu0 %v4163_v8 }
  0xa5   : > { %1446 = vmatprep.mubr.bf16.mxu1 %v3468_v11  ;;  %2541 = vmatpush1.bf16.msra.mxu1 %v4175_v12 }
  0xa6   : > { %2623 = vmatpush1.bf16.msra.mxu0 %v4180_v13  ;;  %2542 = vmatprep.subr.bf16.mxu1 %v4184_v14 }
  0xa7   : > { %2624 = vmatprep.subr.bf16.mxu0 %v4187_v15 }
  0xa9   : > { %2543 = vmatpush1.bf16.msra.mxu1 %v4199_v21 }
  0xaa   : > { %2625 = vmatpush1.bf16.msra.mxu0 %v4202_v22  ;;  %2544 = vmatprep.subr.bf16.mxu1 %v3490_v20 }
  0xab   : > { %2626 = vmatprep.subr.bf16.mxu0 %v3492_v23  ;;  %1224 = vmatmul.mubr.bf16.gmra.mxu0 %v3470_v16 }
  0xac   : > { %1447 = vmatmul.mubr.bf16.gmra.mxu1 %v3471_v17  ;;  %1233 = vmatprep.mubr.bf16.mxu0 %v3472_v18 }
  0xad   : > { %1456 = vmatprep.mubr.bf16.mxu1 %v3474_v19  ;;  %2545 = vmatpush1.bf16.msra.mxu1 %v4208_v24 }
  0xae   : > { %2627 = vmatpush1.bf16.msra.mxu0 %v4211_v25  ;;  %2546 = vmatprep.subr.bf16.mxu1 %v3484_v26 }
  0xaf   : > { %2628 = vmatprep.subr.bf16.mxu0 %v3486_v27 }
  0xb1   : > { %2547 = vmatpush1.bf16.msra.mxu1 %v3488_v31 }
  0xb2   : > { %2629 = vmatpush1.bf16.msra.mxu0 %v3489_v32  ;;  %2548 = vmatprep.subr.bf16.mxu1 %v3478_v30 }
  0xb3   : > { %2630 = vmatprep.subr.bf16.mxu0 %v3480_v33  ;;  %1234 = vmatmul.mubr.bf16.gmra.mxu0 %v3476_v28 }
  0xb4   : > { %1457 = vmatmul.mubr.bf16.gmra.mxu1 %v3477_v29  ;;  %1243 = vmatprep.mubr.bf16.mxu0 %v3478_v30 }
  0xb5   : > { %1466 = vmatprep.mubr.bf16.mxu1 %v3480_v33  ;;  %2549 = vmatpush1.bf16.msra.mxu1 %v3482_v34 }
  0xb6   : > { %2631 = vmatpush1.bf16.msra.mxu0 %v3483_v35  ;;  %2550 = vmatprep.subr.bf16.mxu1 %v3472_v18 }
  0xb7   : > { %2632 = vmatprep.subr.bf16.mxu0 %v3474_v19  ;;  %v469_v19 = vld [vmem:[#allocation11] sm:$0x3] }
  0xb9   : > { %2551 = vmatpush1.bf16.msra.mxu1 %v3476_v28 }
  0xba   : > { %2633 = vmatpush1.bf16.msra.mxu0 %v3477_v29  ;;  %2552 = vmatprep.subr.bf16.mxu1 %v4163_v8  ;;  %v3560_v8 = vld [vmem:[%s4136_s19 + $0x200] ss:$16 sps:$4 sm:$0xff]  }
  0xbb   : > { %2634 = vmatprep.subr.bf16.mxu0 %v3468_v11  ;;  %1244 = vmatmul.mubr.bf16.gmra.mxu0 %v3482_v34  ;;  %v3564_v11 = vld [vmem:[%s4136_s19 + $0x22c] ss:$16 sps:$4 sm:$0xff]  }
  0xbc   : > { %1467 = vmatmul.mubr.bf16.gmra.mxu1 %v3483_v35  ;;  %1253 = vmatprep.mubr.bf16.mxu0 %v3484_v26 }
  0xbd   : > { %1476 = vmatprep.mubr.bf16.mxu1 %v3486_v27  ;;  %2553 = vmatpush1.bf16.msra.mxu1 %v3470_v16  ;;  %v5268_v16 = vlaneseq }
  0xbe   : > { %2635 = vmatpush1.bf16.msra.mxu0 %v3471_v17  ;;  %2554 = vmatprep.subr.bf16.mxu1 %v4149_v53  ;;  %v3528_v53 = vld [vmem:[%s4136_s19 + $0x16c] ss:$16 sps:$4 sm:$0xff]  }
  0xbf   : > { %2636 = vmatprep.subr.bf16.mxu0 %v4152_v55  ;;  %v3531_v55 = vld [vmem:[%s4136_s19 + $0x168] ss:$16 sps:$4 sm:$0xff]   ;;  %v4349_v17 = vshrl.u32 %v5268_v16, 7 }
  0xc1   : > { %2555 = vmatpush1.bf16.msra.mxu1 %v4157_v6  ;;  %v3556_v6 = vld [vmem:[%s4136_s19 + $0x204] ss:$16 sps:$4 sm:$0xff]   ;;  %5292 = vst [vmem:[#allocation16_spill] sm:$0xff] %v4349_v17  ;;  %v4352_v18 = vsub.s32 1, %v4349_v17 }
  0xc2   : > { %2637 = vmatpush1.bf16.msra.mxu0 %v4160_v7  ;;  %2556 = vmatprep.subr.bf16.mxu1 %v4229_v36  ;;  %v3558_v7 = vld [vmem:[%s4136_s19 + $0x20c] ss:$16 sps:$4 sm:$0xff]  }
  0xc3   : > { %2638 = vmatprep.subr.bf16.mxu0 %v4232_v37  ;;  %1254 = vmatmul.mubr.bf16.gmra.mxu0 %v3488_v31  ;;  %5293 = vst [vmem:[#allocation17_spill] sm:$0xff] %v4352_v18 }
  0xc4   : > { %1477 = vmatmul.mubr.bf16.gmra.mxu1 %v3489_v32  ;;  %1263 = vmatprep.mubr.bf16.mxu0 %v3490_v20  ;;  %v4355_v20 = vsub.s32 0, %v4349_v17 }
  0xc5   : > { %1486 = vmatprep.mubr.bf16.mxu1 %v3492_v23  ;;  %2557 = vmatpush2.bf16.msra.mxu1 %v4239_v38 }
  0xc6   : > { %2639 = vmatpush2.bf16.msra.mxu0 %v4242_v39  ;;  %2558 = vmatprep.subr.bf16.mxu1 %v4245_v40  ;;  %5294 = vst [vmem:[#allocation18_spill] sm:$0xff] %v4355_v20 }
  0xc7   : > { %2640 = vmatprep.subr.bf16.mxu0 %v4248_v41 }
  0xc9   : > { %2559 = vmatpush2.bf16.msra.mxu1 %v4255_v42 }
  0xca   : > { %2641 = vmatpush2.bf16.msra.mxu0 %v4258_v43  ;;  %2560 = vmatprep.subr.bf16.mxu1 %v4261_v44 }
  0xcb   : > { %2642 = vmatprep.subr.bf16.mxu0 %v4264_v45  ;;  %1264 = vmatmul.mubr.bf16.gmra.mxu0 %v4208_v24  ;;  %v4361_v24 = vrot.slane %v469_v19, %v4355_v20  ;;  %v2056_v20 = vadd.s32 264, %v4349_v17 }
  0xcc   : > { %1487 = vmatmul.mubr.bf16.gmra.mxu1 %v4211_v25  ;;  %1273 = vmatprep.mubr.bf16.mxu0 %v4184_v14  ;;  %v3572_v14 = vld [vmem:[%s4136_s19 + $0x240] ss:$16 sps:$4 sm:$0xff]  }
  0xcd   : > { %1496 = vmatprep.mubr.bf16.mxu1 %v4187_v15  ;;  %2561 = vmatpush2.bf16.msra.mxu1 %v4273_v46  ;;  %v3573_v15 = vld [vmem:[%s4136_s19 + $0x248] ss:$16 sps:$4 sm:$0xff]  }
  0xce   : > { %2643 = vmatpush2.bf16.msra.mxu0 %v4276_v47  ;;  %2562 = vmatprep.subr.bf16.mxu1 %v4281_v48 }
  0xcf   : > { %2644 = vmatprep.subr.bf16.mxu0 %v4284_v49 }
  0xd1   : > { %2563 = vmatpush2.bf16.msra.mxu1 %v4291_v50 }
  0xd2   : > { %2645 = vmatpush2.bf16.msra.mxu0 %v4294_v51  ;;  %2564 = vmatprep.subr.bf16.mxu1 %v3526_v52 }
  0xd3   : > { %2646 = vmatprep.subr.bf16.mxu0 %v3528_v53  ;;  %1274 = vmatmul.mubr.bf16.gmra.mxu0 %v4199_v21  ;;  %v4358_v21 = vrot.slane %v469_v19, %v4352_v18 }
  0xd4   : > { %1497 = vmatmul.mubr.bf16.gmra.mxu1 %v4202_v22  ;;  %1283 = vmatprep.mubr.bf16.mxu0 %v4166_v9  ;;  %v3561_v9 = vld [vmem:[%s4136_s19 + $0x208] ss:$16 sps:$4 sm:$0xff]  }
  0xd5   : > { %1506 = vmatprep.mubr.bf16.mxu1 %v4169_v10  ;;  %2565 = vmatpush2.bf16.msra.mxu1 %v3530_v54  ;;  %v3562_v10 = vld [vmem:[%s4136_s19 + $0x224] ss:$16 sps:$4 sm:$0xff]  }
  0xd6   : > { %2647 = vmatpush2.bf16.msra.mxu0 %v3531_v55  ;;  %2566 = vmatprep.subr.bf16.mxu1 %v3520_v56 }
  0xd7   : > { %2648 = vmatprep.subr.bf16.mxu0 %v3522_v57 }
  0xd9   : > { %2567 = vmatpush2.bf16.msra.mxu1 %v3524_v59 }
  0xda   : > { %2649 = vmatpush2.bf16.msra.mxu0 %v3525_v60  ;;  %2568 = vmatprep.subr.bf16.mxu1 %v3514_v62 }
  0xdb   : > { %2650 = vmatprep.subr.bf16.mxu0 %v3516_v63  ;;  %1284 = vmatmul.mubr.bf16.gmra.mxu0 %v4175_v12  ;;  %v3566_v12 = vld [vmem:[%s4136_s19 + $0x220] ss:$16 sps:$4 sm:$0xff]  }
  0xdc   : > { %1507 = vmatmul.mubr.bf16.gmra.mxu1 %v4180_v13  ;;  %1293 = vmatprep.mubr.bf16.mxu0 %v3508_v58  ;;  %v3567_v13 = vld [vmem:[%s4136_s19 + $0x228] ss:$16 sps:$4 sm:$0xff]  }
  0xdd   : > { %1516 = vmatprep.mubr.bf16.mxu1 %v3510_v61  ;;  %2569 = vmatpush2.bf16.msra.mxu1 %v3518_v0 }
  0xde   : > { %2651 = vmatpush2.bf16.msra.mxu0 %v3519_v1  ;;  %2570 = vmatprep.subr.bf16.mxu1 %v3508_v58 }
  0xdf   : > { %2652 = vmatprep.subr.bf16.mxu0 %v3510_v61 }
  0xe1   : > { %2571 = vmatpush2.bf16.msra.mxu1 %v3512_v2 }
  0xe2   : > { %2653 = vmatpush2.bf16.msra.mxu0 %v3513_v3  ;;  %2591 = vmatprep.subr.bf16.mxu1 %v3568_v4 }
  0xe3   : > { %2673 = vmatprep.subr.bf16.mxu0 %v3570_v5  ;;  %1294 = vmatmul.mubr.bf16.gmra.mxu0 %v3512_v2 }
  0xe4   : > { %1517 = vmatmul.mubr.bf16.gmra.mxu1 %v3513_v3  ;;  %1303 = vmatprep.mubr.bf16.mxu0 %v3514_v62 }
  0xe5   : > { %1526 = vmatprep.mubr.bf16.mxu1 %v3516_v63 }
  0xeb   : > { %1304 = vmatmul.mubr.bf16.gmra.mxu0 %v3518_v0 }
  0xec   : > { %1527 = vmatmul.mubr.bf16.gmra.mxu1 %v3519_v1  ;;  %1313 = vmatprep.mubr.bf16.mxu0 %v3520_v56 }
  0xed   : > { %1536 = vmatprep.mubr.bf16.mxu1 %v3522_v57 }
  0xf3   : > { %1314 = vmatmul.mubr.bf16.gmra.mxu0 %v3524_v59 }
  0xf4   : > { %1537 = vmatmul.mubr.bf16.gmra.mxu1 %v3525_v60  ;;  %1323 = vmatprep.mubr.bf16.mxu0 %v3526_v52 }
  0xf5   : > { %1546 = vmatprep.mubr.bf16.mxu1 %v3528_v53 }
  0xfb   : > { %1324 = vmatmul.mubr.bf16.gmra.mxu0 %v3530_v54 }
  0xfc   : > { %1547 = vmatmul.mubr.bf16.gmra.mxu1 %v3531_v55  ;;  %1333 = vmatprep.mubr.bf16.mxu0 %v4281_v48 }
  0xfd   : > { %1556 = vmatprep.mubr.bf16.mxu1 %v4284_v49 }
 0x103   : > { %1334 = vmatmul.mubr.bf16.gmra.mxu0 %v4291_v50 }
 0x104   : > { %1557 = vmatmul.mubr.bf16.gmra.mxu1 %v4294_v51  ;;  %1343 = vmatprep.mubr.bf16.mxu0 %v4261_v44 }
 0x105   : > { %1566 = vmatprep.mubr.bf16.mxu1 %v4264_v45 }
 0x10b   : > { %1344 = vmatmul.mubr.bf16.gmra.mxu0 %v4273_v46 }
 0x10c   : > { %1567 = vmatmul.mubr.bf16.gmra.mxu1 %v4276_v47  ;;  %1353 = vmatprep.mubr.bf16.mxu0 %v4245_v40 }
 0x10d   : > { %1576 = vmatprep.mubr.bf16.mxu1 %v4248_v41 }
 0x113   : > { %1354 = vmatmul.mubr.bf16.gmra.mxu0 %v4255_v42 }
 0x114   : > { %1577 = vmatmul.mubr.bf16.gmra.mxu1 %v4258_v43  ;;  %1363 = vmatprep.mubr.bf16.mxu0 %v4229_v36 }
 0x115   : > { %1586 = vmatprep.mubr.bf16.mxu1 %v4232_v37 }
 0x11b   : > { %1364 = vmatmul.mubr.bf16.gmra.mxu0 %v4239_v38 }
 0x11c   : > { %1587 = vmatmul.mubr.bf16.gmra.mxu1 %v4242_v39  ;;  %1373 = vmatprep.mubr.bf16.mxu0 %v3556_v6 }
 0x11d   : > { %1596 = vmatprep.mubr.bf16.mxu1 %v3558_v7 }
 0x123   : > { %1374 = vmatmul.mubr.bf16.gmra.mxu0 %v3560_v8 }
 0x124   : > { %1597 = vmatmul.mubr.bf16.gmra.mxu1 %v3561_v9  ;;  %1383 = vmatprep.mubr.bf16.mxu0 %v3562_v10 }
 0x125   : > { %1606 = vmatprep.mubr.bf16.mxu1 %v3564_v11 }
 0x12b   : > { %1384 = vmatmul.mubr.bf16.gmra.mxu0 %v3566_v12 }
 0x12c   : > { %1607 = vmatmul.mubr.bf16.gmra.mxu1 %v3567_v13  ;;  %1393 = vmatprep.mubr.bf16.mxu0 %v3568_v4 }
 0x12d   : > { %1616 = vmatprep.mubr.bf16.mxu1 %v3570_v5 }
 0x133   : > { %1394 = vmatmul.mubr.bf16.gmra.mxu0 %v3572_v14 }
 0x134   : > { %1617 = vmatmul.mubr.bf16.gmra.mxu1 %v3573_v15 }
 0x163   : > { %v1215_v22 = vpop.f32.mrf.mxu0 }
 0x164   : > { %v1438_v23 = vpop.f32.mrf.mxu1  ;;  %v1216_v31 = vadd.f32 %v1215_v22, %v4361_v24 }
 0x165   : > { %v1217_v25 = vpop.f32.mrf.mxu0 }
 0x166   : > { %v1440_v26 = vpop.f32.mrf.mxu1  ;;  %v1218_v27 = vadd.f32 %v1217_v25, %v4358_v21  ;;  %v1439_v39 = vadd.f32 %v1438_v23, %v1216_v31 }
 0x167   : > { %v1219_v28 = vpop.f32.mrf.mxu0 }
 0x168   : > { %v1442_v29 = vpop.f32.mrf.mxu1  ;;  %v1441_v30 = vadd.f32 %v1440_v26, %v1218_v27  ;;  %v1220_v40 = vadd.f32 %v1219_v28, %v4361_v24 }
 0x169   : > { %v1221_v32 = vpop.f32.mrf.mxu0 }
 0x16a   : > { %v1444_v33 = vpop.f32.mrf.mxu1  ;;  %v1665_v34 = vmul.f32 0.5, %v1441_v30  ;;  %v1222_v35 = vadd.f32 %v1221_v32, %v4358_v21  ;;  %v1443_v49 = vadd.f32 %v1442_v29, %v1220_v40  ;;  %v4379_v29 = vld [vmem:[%s5260_s3] ss:$0 sm:$0xff] }
 0x16b   : > { %v1225_v36 = vpop.f32.mrf.mxu0 }
 0x16c   : > { %v1448_v37 = vpop.f32.mrf.mxu1  ;;  %3574 = vtanh.f32 %v1665_v34  ;;  %v1445_v38 = vadd.f32 %v1444_v33, %v1222_v35  ;;  %v1226_v45 = vadd.f32 %v1225_v36, %v4361_v24 }
 0x16d   : > { %v1227_v41 = vpop.f32.mrf.mxu0 }
 0x16e   : > { %v1450_v42 = vpop.f32.mrf.mxu1  ;;  %v1666_v43 = vmul.f32 0.5, %v1445_v38  ;;  %v1228_v44 = vadd.f32 %v1227_v41, %v4358_v21  ;;  %v1449_v54 = vadd.f32 %v1448_v37, %v1226_v45 }
 0x16f   : > { %v1229_v46 = vpop.f32.mrf.mxu0 }
 0x170   : > { %v1452_v47 = vpop.f32.mrf.mxu1  ;;  %3576 = vtanh.f32 %v1666_v43  ;;  %v1451_v48 = vadd.f32 %v1450_v42, %v1228_v44  ;;  %v1230_v58 = vadd.f32 %v1229_v46, %v4361_v24 }
 0x171   : > { %3578 = vtanh.f32 %v1439_v39  ;;  %v1231_v50 = vpop.f32.mrf.mxu0 }
 0x172   : > { %v1454_v51 = vpop.f32.mrf.mxu1  ;;  %v1667_v52 = vmul.f32 0.5, %v1451_v48  ;;  %v1232_v53 = vadd.f32 %v1231_v50, %v4358_v21  ;;  %v1453_v3 = vadd.f32 %v1452_v47, %v1230_v58 }
 0x173   : > { %v1235_v55 = vpop.f32.mrf.mxu0 }
 0x174   : > { %v1458_v56 = vpop.f32.mrf.mxu1  ;;  %3580 = vtanh.f32 %v1667_v52  ;;  %v1455_v57 = vadd.f32 %v1454_v51, %v1232_v53  ;;  %v1236_v4 = vadd.f32 %v1235_v55, %v4361_v24 }
 0x175   : > { %3582 = vtanh.f32 %v1443_v49  ;;  %v1237_v59 = vpop.f32.mrf.mxu0 }
 0x176   : > { %v1460_v60 = vpop.f32.mrf.mxu1  ;;  %v1668_v61 = vmul.f32 0.5, %v1455_v57  ;;  %v1238_v62 = vadd.f32 %v1237_v59, %v4358_v21  ;;  %3584 = vtanh.f32 %v1449_v54  ;;  %v1459_v15 = vadd.f32 %v1458_v56, %v1236_v4 }
 0x177   : > { %v1239_v63 = vpop.f32.mrf.mxu0 }
 0x178   : > { %v1462_v0 = vpop.f32.mrf.mxu1  ;;  %3586 = vtanh.f32 %v1668_v61  ;;  %v1461_v1 = vadd.f32 %v1460_v60, %v1238_v62  ;;  %v1240_v19 = vadd.f32 %v1239_v63, %v4361_v24 }
 0x179   : > { %v3575_v2 = vpop.eup %3574  ;;  %v1241_v5 = vpop.f32.mrf.mxu0 }
 0x17a   : > { %v1464_v6 = vpop.f32.mrf.mxu1  ;;  %v1669_v7 = vmul.f32 0.5, %v1461_v1  ;;  %v1242_v8 = vadd.f32 %v1241_v5, %v4358_v21  ;;  %v1741_v9 = vadd.f32 1.0, %v3575_v2  ;;  %v1463_v36 = vadd.f32 %v1462_v0, %v1240_v19 }
 0x17b   : > { %v1245_v10 = vpop.f32.mrf.mxu0 }
 0x17c   : > { %v1468_v11 = vpop.f32.mrf.mxu1  ;;  %3588 = vtanh.f32 %v1669_v7  ;;  %v1465_v12 = vadd.f32 %v1464_v6, %v1242_v8  ;;  %v1779_v13 = vmul.f32 0.5, %v1741_v9  ;;  %v1246_v37 = vadd.f32 %v1245_v10, %v4361_v24 }
 0x17d   : > { %v3577_v14 = vpop.eup %3576  ;;  %3590 = vtanh.f32 %v1453_v3  ;;  %v1247_v22 = vpop.f32.mrf.mxu0 }
 0x17e   : > { %v1470_v23 = vpop.f32.mrf.mxu1  ;;  %v3579_v25 = vpop.eup %3578  ;;  %v1742_v26 = vadd.f32 1.0, %v3577_v14  ;;  %v1670_v27 = vmul.f32 0.5, %v1465_v12  ;;  %v1248_v28 = vadd.f32 %v1247_v22, %v4358_v21  ;;  %v1469_v52 = vadd.f32 %v1468_v11, %v1246_v37 }
 0x17f   : > { %v1249_v30 = vpop.f32.mrf.mxu0  ;;  %v1817_v32 = vmul.f32 %v3579_v25, %v1779_v13 }
 0x180   : > { %v1472_v31 = vpop.f32.mrf.mxu1  ;;  %3592 = vtanh.f32 %v1670_v27  ;;  %v1471_v33 = vadd.f32 %v1470_v23, %v1248_v28  ;;  %v1780_v34 = vmul.f32 0.5, %v1742_v26  ;;  %v1250_v53 = vadd.f32 %v1249_v30, %v4361_v24 }
 0x181   : > { %v3581_v35 = vpop.eup %3580  ;;  %3594 = vtanh.f32 %v1459_v15  ;;  %v1251_v38 = vpop.f32.mrf.mxu0  ;;  %v1862_v40 = vmul.f32 %v4379_v29, %v1817_v32 }
 0x182   : > { %v1474_v39 = vpop.f32.mrf.mxu1  ;;  %v3583_v41 = vpop.eup %3582  ;;  %v1743_v42 = vadd.f32 1.0, %v3581_v35  ;;  %v1671_v43 = vmul.f32 0.5, %v1471_v33  ;;  %v1252_v44 = vadd.f32 %v1251_v38, %v4358_v21  ;;  %v1473_v2 = vadd.f32 %v1472_v31, %v1250_v53 }
 0x183   : > { %1900 = vadd.xlane.f32.xlu0 %v1862_v40  ;;  %v1255_v45 = vpop.f32.mrf.mxu0  ;;  %v1818_v47 = vmul.f32 %v3583_v41, %v1780_v34  ;;  %v3585_v48 = vpop.eup %3584 }
 0x184   : > { %v1478_v46 = vpop.f32.mrf.mxu1  ;;  %3596 = vtanh.f32 %v1671_v43  ;;  %v1475_v49 = vadd.f32 %v1474_v39, %v1252_v44  ;;  %v1781_v50 = vmul.f32 0.5, %v1743_v42  ;;  %v1256_v3 = vadd.f32 %v1255_v45, %v4361_v24 }
 0x185   : > { %v3587_v51 = vpop.eup %3586  ;;  %3598 = vtanh.f32 %v1463_v36  ;;  %v1257_v54 = vpop.f32.mrf.mxu0  ;;  %v1863_v56 = vmul.f32 %v4379_v29, %v1818_v47 }
 0x186   : > { %v1480_v55 = vpop.f32.mrf.mxu1  ;;  %v1672_v57 = vmul.f32 0.5, %v1475_v49  ;;  %v1258_v58 = vadd.f32 %v1257_v54, %v4358_v21  ;;  %v1819_v59 = vmul.f32 %v3585_v48, %v1781_v50  ;;  %v1744_v62 = vadd.f32 1.0, %v3587_v51 }
 0x187   : > { %1902 = vadd.xlane.f32.xlu0 %v1863_v56  ;;  %v1259_v60 = vpop.f32.mrf.mxu0  ;;  %v1479_v22 = vadd.f32 %v1478_v46, %v1256_v3 }
 0x188   : > { %v1482_v61 = vpop.f32.mrf.mxu1  ;;  %3600 = vtanh.f32 %v1672_v57  ;;  %v1481_v63 = vadd.f32 %v1480_v55, %v1258_v58  ;;  %v1864_v0 = vmul.f32 %v4379_v29, %v1819_v59  ;;  %v1782_v6 = vmul.f32 0.5, %v1744_v62 }
 0x189   : > { %v3589_v1 = vpop.eup %3588  ;;  %3602 = vtanh.f32 %v1469_v52  ;;  %v1261_v4 = vpop.f32.mrf.mxu0  ;;  %v1260_v23 = vadd.f32 %v1259_v60, %v4361_v24 }
 0x18a   : > { %v1484_v5 = vpop.f32.mrf.mxu1  ;;  %v3591_v7 = vpop.eup %3590  ;;  %v1745_v8 = vadd.f32 1.0, %v3589_v1  ;;  %v1673_v9 = vmul.f32 0.5, %v1481_v63  ;;  %v1262_v10 = vadd.f32 %v1261_v4, %v4358_v21 }
 0x18b   : > { %1904 = vadd.xlane.f32.xlu0 %v1864_v0  ;;  %v1265_v11 = vpop.f32.mrf.mxu0  ;;  %v1820_v13 = vmul.f32 %v3591_v7, %v1782_v6  ;;  %v1483_v39 = vadd.f32 %v1482_v61, %v1260_v23 }
 0x18c   : > { %v1488_v12 = vpop.f32.mrf.mxu1  ;;  %3604 = vtanh.f32 %v1673_v9  ;;  %v1485_v14 = vadd.f32 %v1484_v5, %v1262_v10  ;;  %v1783_v15 = vmul.f32 0.5, %v1745_v8  ;;  %v1266_v40 = vadd.f32 %v1265_v11, %v4361_v24 }
 0x18d   : > { %v3593_v19 = vpop.eup %3592  ;;  %3606 = vtanh.f32 %v1473_v2  ;;  %v1267_v25 = vpop.f32.mrf.mxu0  ;;  %v1865_v27 = vmul.f32 %v4379_v29, %v1820_v13 }
 0x18e   : > { %v1490_v26 = vpop.f32.mrf.mxu1  ;;  %v3595_v28 = vpop.eup %3594  ;;  %v1746_v30 = vadd.f32 1.0, %v3593_v19  ;;  %v1674_v31 = vmul.f32 0.5, %v1485_v14  ;;  %v1268_v32 = vadd.f32 %v1267_v25, %v4358_v21  ;;  %v1489_v54 = vadd.f32 %v1488_v12, %v1266_v40 }
 0x18f   : > { %1906 = vadd.xlane.f32.xlu1 %v1865_v27  ;;  %v1269_v33 = vpop.f32.mrf.mxu0  ;;  %v1821_v35 = vmul.f32 %v3595_v28, %v1783_v15 }
 0x190   : > { %v1492_v34 = vpop.f32.mrf.mxu1  ;;  %3608 = vtanh.f32 %v1674_v31  ;;  %v1491_v36 = vadd.f32 %v1490_v26, %v1268_v32  ;;  %v1784_v37 = vmul.f32 0.5, %v1746_v30  ;;  %v1270_v55 = vadd.f32 %v1269_v33, %v4361_v24 }
 0x191   : > { %v3597_v38 = vpop.eup %3596  ;;  %3610 = vtanh.f32 %v1479_v22  ;;  %v1271_v41 = vpop.f32.mrf.mxu0  ;;  %v1866_v43 = vmul.f32 %v4379_v29, %v1821_v35 }
 0x192   : > { %v1494_v42 = vpop.f32.mrf.mxu1  ;;  %v3599_v44 = vpop.eup %3598  ;;  %v1747_v45 = vadd.f32 1.0, %v3597_v38  ;;  %v1675_v46 = vmul.f32 0.5, %v1491_v36  ;;  %v1272_v47 = vadd.f32 %v1271_v41, %v4358_v21  ;;  %v1493_v5 = vadd.f32 %v1492_v34, %v1270_v55 }
 0x193   : > { %1908 = vadd.xlane.f32.xlu1 %v1866_v43  ;;  %v1275_v48 = vpop.f32.mrf.mxu0  ;;  %v1822_v50 = vmul.f32 %v3599_v44, %v1784_v37 }
 0x194   : > { %v1498_v49 = vpop.f32.mrf.mxu1  ;;  %3612 = vtanh.f32 %v1675_v46  ;;  %v1495_v51 = vadd.f32 %v1494_v42, %v1272_v47  ;;  %v1785_v52 = vmul.f32 0.5, %v1747_v45  ;;  %v1276_v6 = vadd.f32 %v1275_v48, %v4361_v24 }
 0x195   : > { %v3601_v53 = vpop.eup %3600  ;;  %3614 = vtanh.f32 %v1483_v39  ;;  %v1277_v56 = vpop.f32.mrf.mxu0  ;;  %v1867_v58 = vmul.f32 %v4379_v29, %v1822_v50 }
 0x196   : > { %v1500_v57 = vpop.f32.mrf.mxu1  ;;  %v3603_v59 = vpop.eup %3602  ;;  %v1748_v60 = vadd.f32 1.0, %v3601_v53  ;;  %v1676_v61 = vmul.f32 0.5, %v1495_v51  ;;  %v1278_v62 = vadd.f32 %v1277_v56, %v4358_v21  ;;  %v1499_v26 = vadd.f32 %v1498_v49, %v1276_v6 }
 0x197   : > { %1910 = vadd.xlane.f32.xlu1 %v1867_v58  ;;  %v1279_v63 = vpop.f32.mrf.mxu0  ;;  %v1823_v1 = vmul.f32 %v3603_v59, %v1785_v52 }
 0x198   : > { %v1502_v0 = vpop.f32.mrf.mxu1  ;;  %3616 = vtanh.f32 %v1676_v61  ;;  %v1501_v2 = vadd.f32 %v1500_v57, %v1278_v62  ;;  %v1786_v3 = vmul.f32 0.5, %v1748_v60  ;;  %v1280_v27 = vadd.f32 %v1279_v63, %v4361_v24 }
 0x199   : > { %v3605_v4 = vpop.eup %3604  ;;  %3618 = vtanh.f32 %v1489_v54  ;;  %v1281_v7 = vpop.f32.mrf.mxu0  ;;  %v1868_v9 = vmul.f32 %v4379_v29, %v1823_v1 }
 0x19a   : > { %v1504_v8 = vpop.f32.mrf.mxu1  ;;  %v3607_v10 = vpop.eup %3606  ;;  %v1749_v11 = vadd.f32 1.0, %v3605_v4  ;;  %v1677_v12 = vmul.f32 0.5, %v1501_v2  ;;  %v1282_v13 = vadd.f32 %v1281_v7, %v4358_v21  ;;  %v1503_v42 = vadd.f32 %v1502_v0, %v1280_v27 }
 0x19b   : > { %1912 = vadd.xlane.f32.xlu0 %v1868_v9  ;;  %v1285_v14 = vpop.f32.mrf.mxu0  ;;  %v1824_v19 = vmul.f32 %v3607_v10, %v1786_v3 }
 0x19c   : > { %v1508_v15 = vpop.f32.mrf.mxu1  ;;  %3620 = vtanh.f32 %v1677_v12  ;;  %v1505_v22 = vadd.f32 %v1504_v8, %v1282_v13  ;;  %v1787_v23 = vmul.f32 0.5, %v1749_v11  ;;  %v1286_v43 = vadd.f32 %v1285_v14, %v4361_v24 }
 0x19d   : > { %v3609_v25 = vpop.eup %3608  ;;  %3622 = vtanh.f32 %v1493_v5  ;;  %v1287_v28 = vpop.f32.mrf.mxu0  ;;  %v1869_v31 = vmul.f32 %v4379_v29, %v1824_v19 }
 0x19e   : > { %v1510_v30 = vpop.f32.mrf.mxu1  ;;  %v3611_v32 = vpop.eup %3610  ;;  %v1750_v33 = vadd.f32 1.0, %v3609_v25  ;;  %v1678_v34 = vmul.f32 0.5, %v1505_v22  ;;  %v1288_v35 = vadd.f32 %v1287_v28, %v4358_v21  ;;  %v1509_v57 = vadd.f32 %v1508_v15, %v1286_v43 }
 0x19f   : > { %1914 = vadd.xlane.f32.xlu1 %v1869_v31  ;;  %v1289_v36 = vpop.f32.mrf.mxu0  ;;  %v1825_v38 = vmul.f32 %v3611_v32, %v1787_v23 }
 0x1a0   : > { %v1512_v37 = vpop.f32.mrf.mxu1  ;;  %3624 = vtanh.f32 %v1678_v34  ;;  %v1511_v39 = vadd.f32 %v1510_v30, %v1288_v35  ;;  %v1788_v40 = vmul.f32 0.5, %v1750_v33  ;;  %v1290_v58 = vadd.f32 %v1289_v36, %v4361_v24 }
 0x1a1   : > { %v3613_v41 = vpop.eup %3612  ;;  %3626 = vtanh.f32 %v1499_v26  ;;  %v1291_v44 = vpop.f32.mrf.mxu0  ;;  %v1870_v46 = vmul.f32 %v4379_v29, %v1825_v38 }
 0x1a2   : > { %v1514_v45 = vpop.f32.mrf.mxu1  ;;  %v3615_v47 = vpop.eup %3614  ;;  %v1751_v48 = vadd.f32 1.0, %v3613_v41  ;;  %v1679_v49 = vmul.f32 0.5, %v1511_v39  ;;  %v1292_v50 = vadd.f32 %v1291_v44, %v4358_v21  ;;  %v1513_v8 = vadd.f32 %v1512_v37, %v1290_v58 }
 0x1a3   : > { %1916 = vadd.xlane.f32.xlu0 %v1870_v46  ;;  %v1295_v51 = vpop.f32.mrf.mxu0  ;;  %v1826_v53 = vmul.f32 %v3615_v47, %v1788_v40 }
 0x1a4   : > { %v1518_v52 = vpop.f32.mrf.mxu1  ;;  %3628 = vtanh.f32 %v1679_v49  ;;  %v1515_v54 = vadd.f32 %v1514_v45, %v1292_v50  ;;  %v1789_v55 = vmul.f32 0.5, %v1751_v48  ;;  %v1296_v9 = vadd.f32 %v1295_v51, %v4361_v24 }
 0x1a5   : > { %v3617_v56 = vpop.eup %3616  ;;  %3630 = vtanh.f32 %v1503_v42  ;;  %v1297_v59 = vpop.f32.mrf.mxu0  ;;  %v1871_v61 = vmul.f32 %v4379_v29, %v1826_v53 }
 0x1a6   : > { %v1520_v60 = vpop.f32.mrf.mxu1  ;;  %v3619_v62 = vpop.eup %3618  ;;  %v1752_v63 = vadd.f32 1.0, %v3617_v56  ;;  %v1680_v0 = vmul.f32 0.5, %v1515_v54  ;;  %v1298_v1 = vadd.f32 %v1297_v59, %v4358_v21  ;;  %v1519_v30 = vadd.f32 %v1518_v52, %v1296_v9 }
 0x1a7   : > { %1918 = vadd.xlane.f32.xlu1 %v1871_v61  ;;  %v1299_v2 = vpop.f32.mrf.mxu0  ;;  %v1827_v4 = vmul.f32 %v3619_v62, %v1789_v55 }
 0x1a8   : > { %v1522_v3 = vpop.f32.mrf.mxu1  ;;  %3632 = vtanh.f32 %v1680_v0  ;;  %v1521_v5 = vadd.f32 %v1520_v60, %v1298_v1  ;;  %v1790_v6 = vmul.f32 0.5, %v1752_v63  ;;  %v1300_v31 = vadd.f32 %v1299_v2, %v4361_v24 }
 0x1a9   : > { %v3621_v7 = vpop.eup %3620  ;;  %3634 = vtanh.f32 %v1509_v57  ;;  %v1301_v10 = vpop.f32.mrf.mxu0  ;;  %v1872_v12 = vmul.f32 %v4379_v29, %v1827_v4 }
 0x1aa   : > { %v1524_v11 = vpop.f32.mrf.mxu1  ;;  %v3623_v13 = vpop.eup %3622  ;;  %v1753_v14 = vadd.f32 1.0, %v3621_v7  ;;  %v1681_v15 = vmul.f32 0.5, %v1521_v5  ;;  %v1302_v19 = vadd.f32 %v1301_v10, %v4358_v21  ;;  %v1523_v45 = vadd.f32 %v1522_v3, %v1300_v31 }
 0x1ab   : > { %1920 = vadd.xlane.f32.xlu0 %v1872_v12  ;;  %v1305_v22 = vpop.f32.mrf.mxu0  ;;  %v1828_v25 = vmul.f32 %v3623_v13, %v1790_v6 }
 0x1ac   : > { %v1528_v23 = vpop.f32.mrf.mxu1  ;;  %3636 = vtanh.f32 %v1681_v15  ;;  %v1525_v26 = vadd.f32 %v1524_v11, %v1302_v19  ;;  %v1791_v27 = vmul.f32 0.5, %v1753_v14  ;;  %v1306_v46 = vadd.f32 %v1305_v22, %v4361_v24 }
 0x1ad   : > { %v3625_v28 = vpop.eup %3624  ;;  %3638 = vtanh.f32 %v1513_v8  ;;  %v1307_v32 = vpop.f32.mrf.mxu0  ;;  %v1873_v34 = vmul.f32 %v4379_v29, %v1828_v25 }
 0x1ae   : > { %v1530_v33 = vpop.f32.mrf.mxu1  ;;  %v3627_v35 = vpop.eup %3626  ;;  %v1754_v36 = vadd.f32 1.0, %v3625_v28  ;;  %v1682_v37 = vmul.f32 0.5, %v1525_v26  ;;  %v1308_v38 = vadd.f32 %v1307_v32, %v4358_v21  ;;  %v1529_v60 = vadd.f32 %v1528_v23, %v1306_v46 }
 0x1af   : > { %1922 = vadd.xlane.f32.xlu1 %v1873_v34  ;;  %v1309_v39 = vpop.f32.mrf.mxu0  ;;  %v1829_v41 = vmul.f32 %v3627_v35, %v1791_v27 }
 0x1b0   : > { %v1532_v40 = vpop.f32.mrf.mxu1  ;;  %3640 = vtanh.f32 %v1682_v37  ;;  %v1531_v42 = vadd.f32 %v1530_v33, %v1308_v38  ;;  %v1792_v43 = vmul.f32 0.5, %v1754_v36  ;;  %v1310_v61 = vadd.f32 %v1309_v39, %v4361_v24 }
 0x1b1   : > { %v3629_v44 = vpop.eup %3628  ;;  %3642 = vtanh.f32 %v1519_v30  ;;  %v1311_v47 = vpop.f32.mrf.mxu0  ;;  %v1874_v49 = vmul.f32 %v4379_v29, %v1829_v41 }
 0x1b2   : > { %v1534_v48 = vpop.f32.mrf.mxu1  ;;  %v3631_v50 = vpop.eup %3630  ;;  %v1755_v51 = vadd.f32 1.0, %v3629_v44  ;;  %v1683_v52 = vmul.f32 0.5, %v1531_v42  ;;  %v1312_v53 = vadd.f32 %v1311_v47, %v4358_v21  ;;  %v1533_v11 = vadd.f32 %v1532_v40, %v1310_v61 }
 0x1b3   : > { %1924 = vadd.xlane.f32.xlu0 %v1874_v49  ;;  %v1315_v54 = vpop.f32.mrf.mxu0  ;;  %v1830_v56 = vmul.f32 %v3631_v50, %v1792_v43 }
 0x1b4   : > { %v1538_v55 = vpop.f32.mrf.mxu1  ;;  %3644 = vtanh.f32 %v1683_v52  ;;  %v1535_v57 = vadd.f32 %v1534_v48, %v1312_v53  ;;  %v1793_v58 = vmul.f32 0.5, %v1755_v51  ;;  %v1316_v12 = vadd.f32 %v1315_v54, %v4361_v24 }
 0x1b5   : > { %v3633_v59 = vpop.eup %3632  ;;  %3646 = vtanh.f32 %v1523_v45  ;;  %v1317_v62 = vpop.f32.mrf.mxu0  ;;  %v1875_v0 = vmul.f32 %v4379_v29, %v1830_v56 }
 0x1b6   : > { %v1540_v63 = vpop.f32.mrf.mxu1  ;;  %v3635_v1 = vpop.eup %3634  ;;  %v1756_v2 = vadd.f32 1.0, %v3633_v59  ;;  %v1684_v3 = vmul.f32 0.5, %v1535_v57  ;;  %v1318_v4 = vadd.f32 %v1317_v62, %v4358_v21  ;;  %v1539_v33 = vadd.f32 %v1538_v55, %v1316_v12 }
 0x1b7   : > { %1926 = vadd.xlane.f32.xlu1 %v1875_v0  ;;  %v1319_v5 = vpop.f32.mrf.mxu0  ;;  %v1831_v7 = vmul.f32 %v3635_v1, %v1793_v58 }
 0x1b8   : > { %v1542_v6 = vpop.f32.mrf.mxu1  ;;  %3648 = vtanh.f32 %v1684_v3  ;;  %v1541_v8 = vadd.f32 %v1540_v63, %v1318_v4  ;;  %v1794_v9 = vmul.f32 0.5, %v1756_v2  ;;  %v1320_v34 = vadd.f32 %v1319_v5, %v4361_v24 }
 0x1b9   : > { %v3637_v10 = vpop.eup %3636  ;;  %3650 = vtanh.f32 %v1529_v60  ;;  %v1321_v13 = vpop.f32.mrf.mxu0  ;;  %v1876_v15 = vmul.f32 %v4379_v29, %v1831_v7 }
 0x1ba   : > { %v1544_v14 = vpop.f32.mrf.mxu1  ;;  %v3639_v19 = vpop.eup %3638  ;;  %v1757_v22 = vadd.f32 1.0, %v3637_v10  ;;  %v1685_v23 = vmul.f32 0.5, %v1541_v8  ;;  %v1322_v25 = vadd.f32 %v1321_v13, %v4358_v21  ;;  %v1543_v48 = vadd.f32 %v1542_v6, %v1320_v34 }
 0x1bb   : > { %1928 = vadd.xlane.f32.xlu0 %v1876_v15  ;;  %v1325_v26 = vpop.f32.mrf.mxu0  ;;  %v1832_v28 = vmul.f32 %v3639_v19, %v1794_v9 }
 0x1bc   : > { %v1548_v27 = vpop.f32.mrf.mxu1  ;;  %3652 = vtanh.f32 %v1685_v23  ;;  %v1545_v30 = vadd.f32 %v1544_v14, %v1322_v25  ;;  %v1795_v31 = vmul.f32 0.5, %v1757_v22  ;;  %v1326_v49 = vadd.f32 %v1325_v26, %v4361_v24 }
 0x1bd   : > { %v3641_v32 = vpop.eup %3640  ;;  %3654 = vtanh.f32 %v1533_v11  ;;  %v1327_v35 = vpop.f32.mrf.mxu0  ;;  %v1877_v37 = vmul.f32 %v4379_v29, %v1832_v28 }
 0x1be   : > { %v1550_v36 = vpop.f32.mrf.mxu1  ;;  %v3643_v38 = vpop.eup %3642  ;;  %v1758_v39 = vadd.f32 1.0, %v3641_v32  ;;  %v1686_v40 = vmul.f32 0.5, %v1545_v30  ;;  %v1328_v41 = vadd.f32 %v1327_v35, %v4358_v21  ;;  %v1549_v63 = vadd.f32 %v1548_v27, %v1326_v49 }
 0x1bf   : > { %1930 = vadd.xlane.f32.xlu1 %v1877_v37  ;;  %v1329_v42 = vpop.f32.mrf.mxu0  ;;  %v1833_v44 = vmul.f32 %v3643_v38, %v1795_v31 }
 0x1c0   : > { %v1552_v43 = vpop.f32.mrf.mxu1  ;;  %3656 = vtanh.f32 %v1686_v40  ;;  %v1551_v45 = vadd.f32 %v1550_v36, %v1328_v41  ;;  %v1796_v46 = vmul.f32 0.5, %v1758_v39  ;;  %v1330_v0 = vadd.f32 %v1329_v42, %v4361_v24 }
 0x1c1   : > { %v3645_v47 = vpop.eup %3644  ;;  %3658 = vtanh.f32 %v1539_v33  ;;  %v1331_v50 = vpop.f32.mrf.mxu0  ;;  %v1878_v52 = vmul.f32 %v4379_v29, %v1833_v44 }
 0x1c2   : > { %v1554_v51 = vpop.f32.mrf.mxu1  ;;  %v3647_v53 = vpop.eup %3646  ;;  %v1759_v54 = vadd.f32 1.0, %v3645_v47  ;;  %v1687_v55 = vmul.f32 0.5, %v1551_v45  ;;  %v1332_v56 = vadd.f32 %v1331_v50, %v4358_v21  ;;  %v1553_v14 = vadd.f32 %v1552_v43, %v1330_v0 }
 0x1c3   : > { %1932 = vadd.xlane.f32.xlu0 %v1878_v52  ;;  %v1335_v57 = vpop.f32.mrf.mxu0  ;;  %v1834_v59 = vmul.f32 %v3647_v53, %v1796_v46 }
 0x1c4   : > { %v1558_v58 = vpop.f32.mrf.mxu1  ;;  %3660 = vtanh.f32 %v1687_v55  ;;  %v1555_v60 = vadd.f32 %v1554_v51, %v1332_v56  ;;  %v1797_v61 = vmul.f32 0.5, %v1759_v54  ;;  %v1336_v15 = vadd.f32 %v1335_v57, %v4361_v24 }
 0x1c5   : > { %v3649_v62 = vpop.eup %3648  ;;  %3662 = vtanh.f32 %v1543_v48  ;;  %v1337_v1 = vpop.f32.mrf.mxu0  ;;  %v1879_v3 = vmul.f32 %v4379_v29, %v1834_v59 }
 0x1c6   : > { %v1560_v2 = vpop.f32.mrf.mxu1  ;;  %v3651_v4 = vpop.eup %3650  ;;  %v1760_v5 = vadd.f32 1.0, %v3649_v62  ;;  %v1688_v6 = vmul.f32 0.5, %v1555_v60  ;;  %v1338_v7 = vadd.f32 %v1337_v1, %v4358_v21  ;;  %v1559_v36 = vadd.f32 %v1558_v58, %v1336_v15 }
 0x1c7   : > { %1934 = vadd.xlane.f32.xlu1 %v1879_v3  ;;  %v1339_v8 = vpop.f32.mrf.mxu0  ;;  %v1835_v10 = vmul.f32 %v3651_v4, %v1797_v61 }
 0x1c8   : > { %v1562_v9 = vpop.f32.mrf.mxu1  ;;  %3664 = vtanh.f32 %v1688_v6  ;;  %v1561_v11 = vadd.f32 %v1560_v2, %v1338_v7  ;;  %v1798_v12 = vmul.f32 0.5, %v1760_v5  ;;  %v1340_v37 = vadd.f32 %v1339_v8, %v4361_v24 }
 0x1c9   : > { %v3653_v13 = vpop.eup %3652  ;;  %3666 = vtanh.f32 %v1549_v63  ;;  %v1341_v19 = vpop.f32.mrf.mxu0  ;;  %v1880_v23 = vmul.f32 %v4379_v29, %v1835_v10 }
 0x1ca   : > { %v1564_v22 = vpop.f32.mrf.mxu1  ;;  %v3655_v25 = vpop.eup %3654  ;;  %v1761_v26 = vadd.f32 1.0, %v3653_v13  ;;  %v1689_v27 = vmul.f32 0.5, %v1561_v11  ;;  %v1342_v28 = vadd.f32 %v1341_v19, %v4358_v21  ;;  %v1563_v51 = vadd.f32 %v1562_v9, %v1340_v37 }
 0x1cb   : > { %1936 = vadd.xlane.f32.xlu0 %v1880_v23  ;;  %v1345_v30 = vpop.f32.mrf.mxu0  ;;  %v1836_v32 = vmul.f32 %v3655_v25, %v1798_v12 }
 0x1cc   : > { %v1568_v31 = vpop.f32.mrf.mxu1  ;;  %3668 = vtanh.f32 %v1689_v27  ;;  %v1565_v33 = vadd.f32 %v1564_v22, %v1342_v28  ;;  %v1799_v34 = vmul.f32 0.5, %v1761_v26  ;;  %v1346_v52 = vadd.f32 %v1345_v30, %v4361_v24 }
 0x1cd   : > { %v3657_v35 = vpop.eup %3656  ;;  %3670 = vtanh.f32 %v1553_v14  ;;  %v1347_v38 = vpop.f32.mrf.mxu0  ;;  %v1881_v40 = vmul.f32 %v4379_v29, %v1836_v32 }
 0x1ce   : > { %v1570_v39 = vpop.f32.mrf.mxu1  ;;  %v3659_v41 = vpop.eup %3658  ;;  %v1762_v42 = vadd.f32 1.0, %v3657_v35  ;;  %v1690_v43 = vmul.f32 0.5, %v1565_v33  ;;  %v1348_v44 = vadd.f32 %v1347_v38, %v4358_v21  ;;  %v1569_v2 = vadd.f32 %v1568_v31, %v1346_v52 }
 0x1cf   : > { %1938 = vadd.xlane.f32.xlu1 %v1881_v40  ;;  %v1349_v45 = vpop.f32.mrf.mxu0  ;;  %v1837_v47 = vmul.f32 %v3659_v41, %v1799_v34 }
 0x1d0   : > { %v1572_v46 = vpop.f32.mrf.mxu1  ;;  %3672 = vtanh.f32 %v1690_v43  ;;  %v1571_v48 = vadd.f32 %v1570_v39, %v1348_v44  ;;  %v1800_v49 = vmul.f32 0.5, %v1762_v42  ;;  %v1350_v3 = vadd.f32 %v1349_v45, %v4361_v24 }
 0x1d1   : > { %v3661_v50 = vpop.eup %3660  ;;  %3674 = vtanh.f32 %v1559_v36  ;;  %v1351_v53 = vpop.f32.mrf.mxu0  ;;  %v1882_v55 = vmul.f32 %v4379_v29, %v1837_v47 }
 0x1d2   : > { %v1574_v54 = vpop.f32.mrf.mxu1  ;;  %v3663_v56 = vpop.eup %3662  ;;  %v1763_v57 = vadd.f32 1.0, %v3661_v50  ;;  %v1691_v58 = vmul.f32 0.5, %v1571_v48  ;;  %v1352_v59 = vadd.f32 %v1351_v53, %v4358_v21  ;;  %v1573_v22 = vadd.f32 %v1572_v46, %v1350_v3 }
 0x1d3   : > { %1940 = vadd.xlane.f32.xlu0 %v1882_v55  ;;  %v1355_v60 = vpop.f32.mrf.mxu0  ;;  %v1838_v62 = vmul.f32 %v3663_v56, %v1800_v49 }
 0x1d4   : > { %v1578_v61 = vpop.f32.mrf.mxu1  ;;  %3676 = vtanh.f32 %v1691_v58  ;;  %v1575_v63 = vadd.f32 %v1574_v54, %v1352_v59  ;;  %v1801_v0 = vmul.f32 0.5, %v1763_v57  ;;  %v1356_v23 = vadd.f32 %v1355_v60, %v4361_v24 }
 0x1d5   : > { %v3665_v1 = vpop.eup %3664  ;;  %3678 = vtanh.f32 %v1563_v51  ;;  %v1357_v4 = vpop.f32.mrf.mxu0  ;;  %v1883_v6 = vmul.f32 %v4379_v29, %v1838_v62 }
 0x1d6   : > { %v1580_v5 = vpop.f32.mrf.mxu1  ;;  %v3667_v7 = vpop.eup %3666  ;;  %v1764_v8 = vadd.f32 1.0, %v3665_v1  ;;  %v1692_v9 = vmul.f32 0.5, %v1575_v63  ;;  %v1358_v10 = vadd.f32 %v1357_v4, %v4358_v21  ;;  %v1579_v39 = vadd.f32 %v1578_v61, %v1356_v23 }
 0x1d7   : > { %1942 = vadd.xlane.f32.xlu1 %v1883_v6  ;;  %v1359_v11 = vpop.f32.mrf.mxu0  ;;  %v1839_v13 = vmul.f32 %v3667_v7, %v1801_v0 }
 0x1d8   : > { %v1582_v12 = vpop.f32.mrf.mxu1  ;;  %3680 = vtanh.f32 %v1692_v9  ;;  %v1581_v14 = vadd.f32 %v1580_v5, %v1358_v10  ;;  %v1802_v15 = vmul.f32 0.5, %v1764_v8  ;;  %v1360_v40 = vadd.f32 %v1359_v11, %v4361_v24 }
 0x1d9   : > { %v3669_v19 = vpop.eup %3668  ;;  %3682 = vtanh.f32 %v1569_v2  ;;  %v1361_v25 = vpop.f32.mrf.mxu0  ;;  %v1884_v27 = vmul.f32 %v4379_v29, %v1839_v13 }
 0x1da   : > { %v1584_v26 = vpop.f32.mrf.mxu1  ;;  %v3671_v28 = vpop.eup %3670  ;;  %v1765_v30 = vadd.f32 1.0, %v3669_v19  ;;  %v1693_v31 = vmul.f32 0.5, %v1581_v14  ;;  %v1362_v32 = vadd.f32 %v1361_v25, %v4358_v21  ;;  %v1583_v54 = vadd.f32 %v1582_v12, %v1360_v40 }
 0x1db   : > { %1944 = vadd.xlane.f32.xlu0 %v1884_v27  ;;  %v1365_v33 = vpop.f32.mrf.mxu0  ;;  %v1840_v35 = vmul.f32 %v3671_v28, %v1802_v15 }
 0x1dc   : > { %v1588_v34 = vpop.f32.mrf.mxu1  ;;  %3684 = vtanh.f32 %v1693_v31  ;;  %v1585_v36 = vadd.f32 %v1584_v26, %v1362_v32  ;;  %v1803_v37 = vmul.f32 0.5, %v1765_v30  ;;  %v1366_v55 = vadd.f32 %v1365_v33, %v4361_v24 }
 0x1dd   : > { %v3673_v38 = vpop.eup %3672  ;;  %3686 = vtanh.f32 %v1573_v22  ;;  %v1367_v41 = vpop.f32.mrf.mxu0  ;;  %v1885_v43 = vmul.f32 %v4379_v29, %v1840_v35 }
 0x1de   : > { %v1590_v42 = vpop.f32.mrf.mxu1  ;;  %v3675_v44 = vpop.eup %3674  ;;  %v1766_v45 = vadd.f32 1.0, %v3673_v38  ;;  %v1694_v46 = vmul.f32 0.5, %v1585_v36  ;;  %v1368_v47 = vadd.f32 %v1367_v41, %v4358_v21  ;;  %v1589_v5 = vadd.f32 %v1588_v34, %v1366_v55 }
 0x1df   : > { %1946 = vadd.xlane.f32.xlu1 %v1885_v43  ;;  %v1369_v48 = vpop.f32.mrf.mxu0  ;;  %v1841_v50 = vmul.f32 %v3675_v44, %v1803_v37 }
 0x1e0   : > { %v1592_v49 = vpop.f32.mrf.mxu1  ;;  %3688 = vtanh.f32 %v1694_v46  ;;  %v1591_v51 = vadd.f32 %v1590_v42, %v1368_v47  ;;  %v1804_v52 = vmul.f32 0.5, %v1766_v45  ;;  %v1370_v6 = vadd.f32 %v1369_v48, %v4361_v24 }
 0x1e1   : > { %v3677_v53 = vpop.eup %3676  ;;  %3690 = vtanh.f32 %v1579_v39  ;;  %v1371_v56 = vpop.f32.mrf.mxu0  ;;  %v1886_v58 = vmul.f32 %v4379_v29, %v1841_v50 }
 0x1e2   : > { %v1594_v57 = vpop.f32.mrf.mxu1  ;;  %v3679_v59 = vpop.eup %3678  ;;  %v1767_v60 = vadd.f32 1.0, %v3677_v53  ;;  %v1695_v61 = vmul.f32 0.5, %v1591_v51  ;;  %v1372_v62 = vadd.f32 %v1371_v56, %v4358_v21  ;;  %v1593_v27 = vadd.f32 %v1592_v49, %v1370_v6 }
 0x1e3   : > { %1948 = vadd.xlane.f32.xlu0 %v1886_v58  ;;  %v1375_v63 = vpop.f32.mrf.mxu0  ;;  %v1842_v1 = vmul.f32 %v3679_v59, %v1804_v52 }
 0x1e4   : > { %v1598_v0 = vpop.f32.mrf.mxu1  ;;  %3692 = vtanh.f32 %v1695_v61  ;;  %v1595_v2 = vadd.f32 %v1594_v57, %v1372_v62  ;;  %v1805_v3 = vmul.f32 0.5, %v1767_v60  ;;  %v1376_v14 = vadd.f32 %v1375_v63, %v4361_v24 }
 0x1e5   : > { %v3681_v4 = vpop.eup %3680  ;;  %3694 = vtanh.f32 %v1583_v54  ;;  %v1377_v7 = vpop.f32.mrf.mxu0  ;;  %v1887_v9 = vmul.f32 %v4379_v29, %v1842_v1 }
 0x1e6   : > { %v1600_v8 = vpop.f32.mrf.mxu1  ;;  %v3683_v10 = vpop.eup %3682  ;;  %v1768_v11 = vadd.f32 1.0, %v3681_v4  ;;  %v1696_v12 = vmul.f32 0.5, %v1595_v2  ;;  %v1378_v13 = vadd.f32 %v1377_v7, %v4358_v21  ;;  %v1599_v36 = vadd.f32 %v1598_v0, %v1376_v14 }
 0x1e7   : > { %1950 = vadd.xlane.f32.xlu1 %v1887_v9  ;;  %v1379_v15 = vpop.f32.mrf.mxu0  ;;  %v1843_v22 = vmul.f32 %v3683_v10, %v1805_v3 }
 0x1e8   : > { %v1602_v19 = vpop.f32.mrf.mxu1  ;;  %3696 = vtanh.f32 %v1696_v12  ;;  %v1601_v23 = vadd.f32 %v1600_v8, %v1378_v13  ;;  %v1806_v25 = vmul.f32 0.5, %v1768_v11  ;;  %v1380_v37 = vadd.f32 %v1379_v15, %v4361_v24 }
 0x1e9   : > { %v3685_v26 = vpop.eup %3684  ;;  %3698 = vtanh.f32 %v1589_v5  ;;  %v1381_v28 = vpop.f32.mrf.mxu0  ;;  %v1888_v31 = vmul.f32 %v4379_v29, %v1843_v22 }
 0x1ea   : > { %v1604_v30 = vpop.f32.mrf.mxu1  ;;  %v3687_v32 = vpop.eup %3686  ;;  %v1769_v33 = vadd.f32 1.0, %v3685_v26  ;;  %v1697_v34 = vmul.f32 0.5, %v1601_v23  ;;  %v1382_v35 = vadd.f32 %v1381_v28, %v4358_v21  ;;  %v1603_v51 = vadd.f32 %v1602_v19, %v1380_v37 }
 0x1eb   : > { %1952 = vadd.xlane.f32.xlu0 %v1888_v31  ;;  %v1385_v38 = vpop.f32.mrf.mxu0  ;;  %v1844_v40 = vmul.f32 %v3687_v32, %v1806_v25 }
 0x1ec   : > { %v1608_v39 = vpop.f32.mrf.mxu1  ;;  %3700 = vtanh.f32 %v1697_v34  ;;  %v1605_v41 = vadd.f32 %v1604_v30, %v1382_v35  ;;  %v1807_v42 = vmul.f32 0.5, %v1769_v33  ;;  %v1386_v52 = vadd.f32 %v1385_v38, %v4361_v24 }
 0x1ed   : > { %v3689_v43 = vpop.eup %3688  ;;  %3702 = vtanh.f32 %v1593_v27  ;;  %v1387_v44 = vpop.f32.mrf.mxu0  ;;  %v1889_v46 = vmul.f32 %v4379_v29, %v1844_v40  ;;  %v4469_v29 = vld [vmem:[%s5260_s3] ss:$0 sm:$0xff] }
 0x1ee   : > { %v1610_v45 = vpop.f32.mrf.mxu1  ;;  %v3691_v47 = vpop.eup %3690  ;;  %v1770_v48 = vadd.f32 1.0, %v3689_v43  ;;  %v1698_v49 = vmul.f32 0.5, %v1605_v41  ;;  %v1388_v50 = vadd.f32 %v1387_v44, %v4358_v21  ;;  %3704 = vtanh.f32 %v1599_v36 }
 0x1ef   : > { %1954 = vadd.xlane.f32.xlu1 %v1889_v46  ;;  %v1389_v53 = vpop.f32.mrf.mxu0  ;;  %v1845_v55 = vmul.f32 %v3691_v47, %v1807_v42  ;;  %v1609_v2 = vadd.f32 %v1608_v39, %v1386_v52 }
 0x1f0   : > { %v1612_v54 = vpop.f32.mrf.mxu1  ;;  %3706 = vtanh.f32 %v1698_v49  ;;  %v1611_v56 = vadd.f32 %v1610_v45, %v1388_v50  ;;  %v1808_v57 = vmul.f32 0.5, %v1770_v48  ;;  %v1390_v3 = vadd.f32 %v1389_v53, %v4361_v24 }
 0x1f1   : > { %v3693_v58 = vpop.eup %3692  ;;  %v1391_v59 = vpop.f32.mrf.mxu0  ;;  %v1890_v61 = vmul.f32 %v4469_v29, %v1845_v55  ;;  %3708 = vtanh.f32 %v1603_v51 }
 0x1f2   : > { %v1614_v60 = vpop.f32.mrf.mxu1  ;;  %v3695_v62 = vpop.eup %3694  ;;  %v1771_v63 = vadd.f32 1.0, %v3693_v58  ;;  %v1699_v0 = vmul.f32 0.5, %v1611_v56  ;;  %v1392_v1 = vadd.f32 %v1391_v59, %v4358_v21  ;;  %v1613_v22 = vadd.f32 %v1612_v54, %v1390_v3 }
 0x1f3   : > { %1956 = vadd.xlane.f32.xlu0 %v1890_v61  ;;  %v1395_v4 = vpop.f32.mrf.mxu0  ;;  %v1846_v6 = vmul.f32 %v3695_v62, %v1808_v57 }
 0x1f4   : > { %v1618_v5 = vpop.f32.mrf.mxu1  ;;  %3710 = vtanh.f32 %v1699_v0  ;;  %v1615_v7 = vadd.f32 %v1614_v60, %v1392_v1  ;;  %v1809_v8 = vmul.f32 0.5, %v1771_v63  ;;  %v1396_v23 = vadd.f32 %v1395_v4, %v4361_v24 }
 0x1f5   : > { %v3697_v9 = vpop.eup %3696  ;;  %v1397_v10 = vpop.f32.mrf.mxu0  ;;  %v1891_v12 = vmul.f32 %v4469_v29, %v1846_v6  ;;  %3712 = vtanh.f32 %v1609_v2 }
 0x1f6   : > { %v1620_v11 = vpop.f32.mrf.mxu1  ;;  %v3699_v13 = vpop.eup %3698  ;;  %v1772_v14 = vadd.f32 1.0, %v3697_v9  ;;  %v1700_v15 = vmul.f32 0.5, %v1615_v7  ;;  %v1398_v19 = vadd.f32 %v1397_v10, %v4358_v21  ;;  %v1619_v38 = vadd.f32 %v1618_v5, %v1396_v23 }
 0x1f7   : > { %1958 = vadd.xlane.f32.xlu1 %v1891_v12  ;;  %v1399_v25 = vpop.f32.mrf.mxu0  ;;  %v1847_v27 = vmul.f32 %v3699_v13, %v1809_v8 }
 0x1f8   : > { %v1622_v26 = vpop.f32.mrf.mxu1  ;;  %3714 = vtanh.f32 %v1700_v15  ;;  %v1621_v28 = vadd.f32 %v1620_v11, %v1398_v19  ;;  %v1810_v30 = vmul.f32 0.5, %v1772_v14  ;;  %v1400_v42 = vadd.f32 %v1399_v25, %v4361_v24 }
 0x1f9   : > { %v3701_v31 = vpop.eup %3700  ;;  %v1401_v32 = vpop.f32.mrf.mxu0  ;;  %v1892_v33 = vmul.f32 %v4469_v29, %v1847_v27  ;;  %3716 = vtanh.f32 %v1613_v22 }
 0x1fa   : > { %v3703_v34 = vpop.eup %3702  ;;  %v1773_v35 = vadd.f32 1.0, %v3701_v31  ;;  %v1701_v36 = vmul.f32 0.5, %v1621_v28  ;;  %v1402_v37 = vadd.f32 %v1401_v32, %v4358_v21  ;;  %v1624_v39 = vpop.f32.mrf.mxu1  ;;  %v1623_v50 = vadd.f32 %v1622_v26, %v1400_v42 }
 0x1fb   : > { %1960 = vadd.xlane.f32.xlu0 %v1892_v33  ;;  %v1848_v40 = vmul.f32 %v3703_v34, %v1810_v30  ;;  %v3705_v41 = vpop.eup %3704  ;;  %v4512_v32 = vstv %s2021_s16  ;;  %v2024_v33 = vadd.s32 8, %v4349_v17  ;;  %v2025_v34 = vadd.s32 16, %v4349_v17 }
 0x1fc   : > { %3718 = vtanh.f32 %v1701_v36  ;;  %v1625_v43 = vadd.f32 %v1624_v39, %v1402_v37  ;;  %v1811_v44 = vmul.f32 0.5, %v1773_v35  ;;  %v2026_v35 = vadd.s32 24, %v4349_v17 }
 0x1fd   : > { %v3707_v45 = vpop.eup %3706  ;;  %v1893_v46 = vmul.f32 %v4469_v29, %v1848_v40  ;;  %3720 = vtanh.f32 %v1619_v38  ;;  %v2027_v36 = vadd.s32 32, %v4349_v17  ;;  %v2028_v39 = vadd.s32 40, %v4349_v17 }
 0x1fe   : > { %v1774_v47 = vadd.f32 1.0, %v3707_v45  ;;  %v1702_v48 = vmul.f32 0.5, %v1625_v43  ;;  %v1849_v49 = vmul.f32 %v3705_v41, %v1811_v44  ;;  %v3709_v21 = vpop.eup %3708  ;;  %v2029_v40 = vadd.s32 48, %v4349_v17 }
 0x1ff   : > { %1962 = vadd.xlane.f32.xlu1 %v1893_v46  ;;  %v4526_v41 = vadd.s32 %v4512_v32, %v4349_v17  ;;  %v2030_v42 = vadd.s32 56, %v4349_v17  ;;  %v4530_v43 = vadd.s32 %v4512_v32, %v2024_v33  ;;  %v4533_v44 = vadd.s32 %v4512_v32, %v2025_v34 }
 0x200   : > { %3722 = vtanh.f32 %v1702_v48  ;;  %v1894_v51 = vmul.f32 %v4469_v29, %v1849_v49  ;;  %v1812_v52 = vmul.f32 0.5, %v1774_v47  ;;  %v4536_v45 = vadd.s32 %v4512_v32, %v2026_v35 }
 0x201   : > { %v3711_v53 = vpop.eup %3710  ;;  %3724 = vtanh.f32 %v1623_v50  ;;  %v2031_v46 = vadd.s32 64, %v4349_v17  ;;  %v4540_v47 = vadd.s32 %v4512_v32, %v2027_v36  ;;  %v2032_v48 = vadd.s32 72, %v4349_v17 }
 0x202   : > { %v1775_v54 = vadd.f32 1.0, %v3711_v53  ;;  %1964 = vadd.xlane.f32.xlu0 %v1894_v51  ;;  %v1850_v24 = vmul.f32 %v3709_v21, %v1812_v52  ;;  %v3713_v55 = vpop.eup %3712  ;;  %v2033_v49 = vadd.s32 80, %v4349_v17  ;;  %v2034_v21 = vadd.s32 88, %v4349_v17 }
 0x203   : > { %v4550_v52 = vadd.s32 %v4512_v32, %v2028_v39  ;;  %v4553_v53 = vadd.s32 %v4512_v32, %v2029_v40  ;;  %vm2100_vm2 = vcmp.lt.s32.totalorder %v4526_v41, 600  ;;  %vm2101_vm3 = vcmp.lt.s32.totalorder %v4530_v43, 600 }
 0x204   : > { %v1895_v56 = vmul.f32 %v4469_v29, %v1850_v24  ;;  %v1813_v57 = vmul.f32 0.5, %v1775_v54  ;;  %v2035_v54 = vadd.s32 96, %v4349_v17  ;;  %v2036_v24 = vadd.s32 104, %v4349_v17 }
 0x205   : > { %v3715_v58 = vpop.eup %3714  ;;  %vm2102_vm4 = vcmp.lt.s32.totalorder %v4533_v44, 600  ;;  %vm2104_vm5 = vcmp.lt.s32.totalorder %v4540_v47, 600  ;;  %vm2105_vm6 = vcmp.lt.s32.totalorder %v4550_v52, 600  ;;  %v2047_v36 = vadd.s32 192, %v4349_v17 }
 0x206   : > { %v1776_v59 = vadd.f32 1.0, %v3715_v58  ;;  %1966 = vadd.xlane.f32.xlu1 %v1895_v56  ;;  %v1851_v60 = vmul.f32 %v3713_v55, %v1813_v57  ;;  %v3717_v61 = vpop.eup %3716  ;;  %v4558_v55 = vadd.s32 %v4512_v32, %v2030_v42  ;;  %v2037_v56 = vadd.s32 112, %v4349_v17 }
 0x207   : > { %v2038_v57 = vadd.s32 120, %v4349_v17  ;;  %v2039_v58 = vadd.s32 128, %v4349_v17  ;;  %vm2103_vm8 = vcmp.lt.s32.totalorder %v4536_v45, 600  ;;  %vm2106_vm9 = vcmp.lt.s32.totalorder %v4553_v53, 600 }
 0x208   : > { %v1896_v62 = vmul.f32 %v4469_v29, %v1851_v60  ;;  %v1814_v63 = vmul.f32 0.5, %v1776_v59  ;;  %v4565_v59 = vadd.s32 %v4512_v32, %v2031_v46  ;;  %v2040_v60 = vadd.s32 136, %v4349_v17 }
 0x209   : > { %v3719_v0 = vpop.eup %3718  ;;  %v2048_v46 = vadd.s32 200, %v4349_v17  ;;  %vm2107_vm10 = vcmp.lt.s32.totalorder %v4558_v55, 600 }
 0x20a   : > { %v1777_v1 = vadd.f32 1.0, %v3719_v0  ;;  %1968 = vadd.xlane.f32.xlu0 %v1896_v62  ;;  %v1852_v2 = vmul.f32 %v3717_v61, %v1814_v63  ;;  %v3721_v3 = vpop.eup %3720  ;;  %v2041_v61 = vadd.s32 144, %v4349_v17  ;;  %v2042_v62 = vadd.s32 152, %v4349_v17 }
 0x20b   : > { %v4574_v63 = vadd.s32 %v4512_v32, %v2032_v48  ;;  %v4577_v0 = vadd.s32 %v4512_v32, %v2033_v49  ;;  %v4609_v33 = vadd.s32 %v4512_v32, %v2040_v60  ;;  %v2049_v48 = vadd.s32 208, %v4349_v17 }
 0x20c   : > { %v1897_v4 = vmul.f32 %v4469_v29, %v1852_v2  ;;  %v1815_v5 = vmul.f32 0.5, %v1777_v1  ;;  %v4487_v14 = vpop.xlane.xlu0 %1900  ;;  %v4580_v1 = vadd.s32 %v4512_v32, %v2034_v21  ;;  %v4612_v34 = vadd.s32 %v4512_v32, %v2041_v61 }
 0x20d   : > { %v3723_v6 = vpop.eup %3722  ;;  %v4615_v35 = vadd.s32 %v4512_v32, %v2042_v62  ;;  %v2050_v49 = vadd.s32 216, %v4349_v17  ;;  %vm2108_vm11 = vcmp.lt.s32.totalorder %v4565_v59, 600  ;;  %vm2109_vm12 = vcmp.lt.s32.totalorder %v4574_v63, 600 }
 0x20e   : > { %v1778_v7 = vadd.f32 1.0, %v3723_v6  ;;  %1970 = vadd.xlane.f32.xlu1 %v1897_v4  ;;  %v1853_v8 = vmul.f32 %v3721_v3, %v1815_v5  ;;  %v3725_v11 = vpop.eup %3724  ;;  %v2043_v4 = vadd.s32 160, %v4349_v17  ;;  %v4589_v5 = vadd.s32 %v4512_v32, %v2035_v54 }
 0x20f   : > { %v4592_v6 = vadd.s32 %v4512_v32, %v2036_v24  ;;  %v2051_v24 = vadd.s32 224, %v4349_v17  ;;  %v2053_v60 = vadd.s32 240, %v4349_v17  ;;  %v2054_v61 = vadd.s32 248, %v4349_v17 }
 0x210   : > { %v1898_v9 = vmul.f32 %v4469_v29, %v1853_v8  ;;  %v1816_v10 = vmul.f32 0.5, %v1778_v7  ;;  %v4491_v19 = vpop.xlane.xlu0 %1902  ;;  %v2044_v7 = vadd.s32 168, %v4349_v17  ;;  %v2045_v8 = vadd.s32 176, %v4349_v17 }
 0x211   : > { %v4624_v42 = vadd.s32 %v4512_v32, %v2043_v4  ;;  %v4664_v18 = vadd.s32 %v4512_v32, %v2048_v46  ;;  %vm2110_vm13 = vcmp.lt.s32.totalorder %v4577_v0, 600  ;;  %vm2111_vm14 = vcmp.lt.s32.totalorder %v4580_v1, 600 }
 0x212   : > { %1972 = vadd.xlane.f32.xlu0 %v1898_v9  ;;  %v1854_v12 = vmul.f32 %v3725_v11, %v1816_v10  ;;  %v4597_v9 = vadd.s32 %v4512_v32, %v2037_v56  ;;  %v4600_v10 = vadd.s32 %v4512_v32, %v2038_v57  ;;  %v4603_v11 = vadd.s32 %v4512_v32, %v2039_v58 }
 0x213   : > { %v4633_v21 = vadd.s32 %v4512_v32, %v2044_v7  ;;  %v4636_v54 = vadd.s32 %v4512_v32, %v2045_v8  ;;  %v2052_v56 = vadd.s32 232, %v4349_v17  ;;  %vm2112_vm15 = vcmp.lt.s32.totalorder %v4589_v5, 600 }
 0x214   : > { %v1899_v13 = vmul.f32 %v4469_v29, %v1854_v12  ;;  %v4495_v23 = vpop.xlane.xlu0 %1904  ;;  %v2046_v12 = vadd.s32 184, %v4349_v17  ;;  %vm2113_vm0 = vcmp.lt.s32.totalorder %v4592_v6, 600  ;;  %vm2114_vm1 = vcmp.lt.s32.totalorder %v4597_v9, 600 }
 0x216   : > { %1974 = vadd.xlane.f32.xlu1 %v1899_v13  ;;  %v4606_v13 = vld [vmem:[#allocation5] ss:$0 sm:$0xff]  ;;  %v4644_v58 = vadd.s32 %v4512_v32, %v2046_v12 }
 0x217   : > { %v1983_v57 = vadd.f32 %v4606_v13, %v4487_v14  ;;  %v1984_v62 = vadd.f32 %v4606_v13, %v4491_v19  ;;  %v1985_v4 = vadd.f32 %v4606_v13, %v4495_v23  ;;  %v4655_v14 = vadd.s32 %v4512_v32, %v2047_v36 }
 0x218   : > { %v4489_v15 = vpop.xlane.xlu1 %1906  ;;  %v4667_v19 = vadd.s32 %v4512_v32, %v2049_v48  ;;  %v4670_v23 = vadd.s32 %v4512_v32, %v2050_v49  ;;  %v2055_v36 = vadd.s32 256, %v4349_v17  ;;  %v4689_v48 = vadd.s32 %v4512_v32, %v2053_v60 }
 0x219   : > { %v4683_v46 = vsel %vm2100_vm2, %v1983_v57, -inf  ;;  %v4692_v49 = vadd.s32 %v4512_v32, %v2054_v61  ;;  %v4701_v41 = vsel %vm2102_vm4, %v1985_v4, -inf  ;;  %v1986_v57 = vadd.f32 %v4606_v13, %v4489_v15 }
 0x21a   : > { %5295 = vst [vmem:[#allocation19_spill] sm:$0xff] %v4683_v46  ;;  %5297 = vst [vmem:[#allocation21_spill] sm:$0xff] %v4701_v41  ;;  %v2178_v4 = vsel %vm2177_vm7, %v4683_v46, -inf  ;;  %vm2115_vm2 = vcmp.lt.s32.totalorder %v4600_v10, 600  ;;  %v2059_v46 = vadd.s32 288, %v4349_v17  ;;  %vm2117_vm4 = vcmp.lt.s32.totalorder %v4609_v33, 600 }
 0x21c   : > { %v4493_v22 = vpop.xlane.xlu1 %1908  ;;  %v4794_v63 = vadd.s32 %v4512_v32, %v2059_v46 }
 0x21d   : > { %v1987_v7 = vadd.f32 %v4606_v13, %v4493_v22  ;;  %v4674_v22 = vadd.s32 %v4512_v32, %v2051_v24  ;;  %v2057_v24 = vadd.s32 272, %v4349_v17 }
 0x21f   : > { %v4707_v60 = vsel %vm2104_vm5, %v1987_v7, -inf  ;;  %v4729_v7 = vadd.s32 %v4512_v32, %v2055_v36  ;;  %vm2118_vm5 = vcmp.lt.s32.totalorder %v4612_v34, 600 }
 0x220   : > { %v4497_v25 = vpop.xlane.xlu1 %1910  ;;  %5298 = vst [vmem:[#allocation22_spill] sm:$0xff] %v4707_v60  ;;  %v2182_v36 = vsel %vm2177_vm7, %v4707_v60, -inf }
 0x221   : > { %v1988_v8 = vadd.f32 %v4606_v13, %v4497_v25  ;;  %v4677_v25 = vadd.s32 %v4512_v32, %v2052_v56  ;;  %v4697_v56 = vsel %vm2101_vm3, %v1984_v62, -inf  ;;  %vm2116_vm3 = vcmp.lt.s32.totalorder %v4603_v11, 600 }
 0x222   : > { %5296 = vst [vmem:[#allocation20_spill] sm:$0xff] %v4697_v56 }
 0x223   : > { %v4712_v61 = vsel %vm2105_vm6, %v1988_v8, -inf  ;;  %v2058_v8 = vadd.s32 280, %v4349_v17  ;;  %vm2119_vm6 = vcmp.lt.s32.totalorder %v4615_v35, 600 }
 0x224   : > { %v4499_v26 = vpop.xlane.xlu0 %1912  ;;  %5299 = vst [vmem:[#allocation23_spill] sm:$0xff] %v4712_v61 }
 0x225   : > { %v1989_v43 = vadd.f32 %v4606_v13, %v4499_v26  ;;  %v4732_v26 = vadd.s32 %v4512_v32, %v2056_v20  ;;  %v4748_v20 = vsel %vm2103_vm8, %v1986_v57, -inf  ;;  %vm2120_vm8 = vcmp.lt.s32.totalorder %v4624_v42, 600 }
 0x226   : > { %5300 = vst [vmem:[#allocation24_spill] sm:$0xff] %v4748_v20 }
 0x228   : > { %v4501_v27 = vpop.xlane.xlu1 %1914 }
 0x229   : > { %v1990_v44 = vadd.f32 %v4606_v13, %v4501_v27  ;;  %v2179_v27 = vsel %vm2177_vm7, %v4697_v56, -inf  ;;  %v2184_v56 = vsel %vm2177_vm7, %v4712_v61, -inf }
 0x22b   : > { %v4763_v45 = vsel %vm2107_vm10, %v1990_v44, -inf  ;;  %vm2122_vm10 = vcmp.lt.s32.totalorder %v4636_v54, 600 }
 0x22c   : > { %v4503_v28 = vpop.xlane.xlu0 %1916 }
 0x22d   : > { %v1991_v62 = vadd.f32 %v4606_v13, %v4503_v28  ;;  %v4738_v28 = vadd.s32 %v4512_v32, %v2057_v24  ;;  %v4759_v24 = vsel %vm2106_vm9, %v1989_v43, -inf  ;;  %vm2121_vm9 = vcmp.lt.s32.totalorder %v4633_v21, 600 }
 0x22f   : > { %v4767_v57 = vsel %vm2108_vm11, %v1991_v62, -inf  ;;  %v4791_v62 = vadd.s32 %v4512_v32, %v2058_v8  ;;  %vm2123_vm11 = vcmp.lt.s32.totalorder %v4644_v58, 600 }
 0x230   : > { %v4505_v29 = vpop.xlane.xlu1 %1918 }
 0x231   : > { %v1992_v52 = vadd.f32 %v4606_v13, %v4505_v29  ;;  %v4744_v29 = vsel %vm2177_vm7, %v4701_v41, -inf }
 0x233   : > { %v4778_v53 = vsel %vm2109_vm12, %v1992_v52, -inf  ;;  %v2183_v52 = vmax.f32 %v2178_v4, %v2182_v36  ;;  %vm2124_vm12 = vcmp.lt.s32.totalorder %v4655_v14, 600 }
 0x234   : > { %v4508_v30 = vpop.xlane.xlu0 %1920  ;;  %5301 = vst [vmem:[#allocation25_spill] sm:$0xff] %v4778_v53  ;;  %v2192_v8 = vsel %vm2177_vm7, %v4778_v53, -inf }
 0x235   : > { %v1993_v61 = vadd.f32 %v4606_v13, %v4508_v30  ;;  %v2181_v30 = vsel %vm2177_vm7, %v4748_v20, -inf  ;;  %v2188_v20 = vsel %vm2177_vm7, %v4763_v45, -inf }
 0x237   : > { %v4808_v46 = vsel %vm2110_vm13, %v1993_v61, -inf  ;;  %vm2125_vm13 = vcmp.lt.s32.totalorder %v4664_v18, 600 }
 0x238   : > { %v4510_v31 = vpop.xlane.xlu1 %1922 }
 0x239   : > { %v1994_v55 = vadd.f32 %v4606_v13, %v4510_v31  ;;  %v2185_v31 = vmax.f32 %v2179_v27, %v2184_v56 }
 0x23b   : > { %v4819_v27 = vsel %vm2111_vm14, %v1994_v55, -inf  ;;  %vm2126_vm14 = vcmp.lt.s32.totalorder %v4667_v19, 600 }
 0x23c   : > { %v4518_v37 = vpop.xlane.xlu0 %1924 }
 0x23d   : > { %v1995_v59 = vadd.f32 %v4606_v13, %v4518_v37  ;;  %v2186_v37 = vsel %vm2177_vm7, %v4759_v24, -inf }
 0x23e   : > { %v2187_v6 = vmax.f32 %v4744_v29, %v2186_v37 }
 0x23f   : > { %v4823_v36 = vsel %vm2112_vm15, %v1995_v59, -inf  ;;  %v2189_v59 = vmax.f32 %v2181_v30, %v2188_v20  ;;  %vm2127_vm15 = vcmp.lt.s32.totalorder %v4670_v23, 600 }
 0x240   : > { %v4520_v38 = vpop.xlane.xlu1 %1926  ;;  %v2198_v29 = vsel %vm2177_vm7, %v4823_v36, -inf }
 0x241   : > { %v1996_v43 = vadd.f32 %v4606_v13, %v4520_v38  ;;  %v2060_v38 = vadd.s32 296, %v4349_v17 }
 0x243   : > { %v4827_v0 = vsel %vm2113_vm0, %v1996_v43, -inf  ;;  %v4846_v9 = vadd.s32 %v4512_v32, %v2060_v38  ;;  %vm2128_vm0 = vcmp.lt.s32.totalorder %v4674_v22, 600 }
 0x244   : > { %v4545_v50 = vpop.xlane.xlu0 %1928 }
 0x245   : > { %v1997_v44 = vadd.f32 %v4606_v13, %v4545_v50  ;;  %v2190_v50 = vsel %vm2177_vm7, %v4767_v57, -inf }
 0x246   : > { %v2191_v43 = vmax.f32 %v2183_v52, %v2190_v50 }
 0x247   : > { %v4833_v17 = vsel %vm2114_vm1, %v1997_v44, -inf  ;;  %v2193_v44 = vmax.f32 %v2185_v31, %v2192_v8  ;;  %vm2129_vm1 = vcmp.lt.s32.totalorder %v4677_v25, 600 }
 0x248   : > { %v4547_v51 = vpop.xlane.xlu1 %1930  ;;  %v2202_v32 = vsel %vm2177_vm7, %v4833_v17, -inf  ;;  %v2199_v8 = vmax.f32 %v2191_v43, %v2198_v29 }
 0x249   : > { %v1998_v61 = vadd.f32 %v4606_v13, %v4547_v51 }
 0x24b   : > { %v4861_v20 = vsel %vm2115_vm2, %v1998_v61, -inf  ;;  %vm2131_vm2 = vcmp.lt.s32.totalorder %v4692_v49, 600 }
 0x24c   : > { %v4582_v2 = vpop.xlane.xlu0 %1932 }
 0x24d   : > { %v1999_v1 = vadd.f32 %v4606_v13, %v4582_v2  ;;  %v2194_v2 = vsel %vm2177_vm7, %v4808_v46, -inf }
 0x24e   : > { %v2195_v38 = vmax.f32 %v2187_v6, %v2194_v2 }
 0x24f   : > { %v4866_v30 = vsel %vm2116_vm3, %v1999_v1, -inf  ;;  %vm2130_vm3 = vcmp.lt.s32.totalorder %v4689_v48, 600 }
 0x250   : > { %v4584_v3 = vpop.xlane.xlu1 %1934 }
 0x251   : > { %v2000_v55 = vadd.f32 %v4606_v13, %v4584_v3  ;;  %v2196_v3 = vsel %vm2177_vm7, %v4819_v27, -inf }
 0x252   : > { %v2197_v50 = vmax.f32 %v2189_v59, %v2196_v3 }
 0x253   : > { %v4870_v52 = vsel %vm2117_vm4, %v2000_v55, -inf  ;;  %v2203_v55 = vmax.f32 %v2195_v38, %v2202_v32  ;;  %vm2132_vm4 = vcmp.lt.s32.totalorder %v4729_v7, 600 }
 0x254   : > { %v4619_v39 = vpop.xlane.xlu0 %1936 }
 0x255   : > { %v2001_v5 = vadd.f32 %v4606_v13, %v4619_v39 }
 0x257   : > { %v4874_v31 = vsel %vm2118_vm5, %v2001_v5, -inf  ;;  %vm2133_vm5 = vcmp.lt.s32.totalorder %v4732_v26, 600 }
 0x258   : > { %v4621_v40 = vpop.xlane.xlu1 %1938  ;;  %v2210_v5 = vsel %vm2177_vm7, %v4874_v31, -inf }
 0x259   : > { %v2002_v51 = vadd.f32 %v4606_v13, %v4621_v40  ;;  %v2200_v40 = vsel %vm2177_vm7, %v4827_v0, -inf  ;;  %v2211_v54 = vmax.f32 %v2203_v55, %v2210_v5 }
 0x25a   : > { %v2201_v61 = vmax.f32 %v2193_v44, %v2200_v40 }
 0x25b   : > { %v4881_v10 = vsel %vm2119_vm6, %v2002_v51, -inf  ;;  %vm2135_vm6 = vcmp.lt.s32.totalorder %v4791_v62, 600 }
 0x25c   : > { %v4659_v12 = vpop.xlane.xlu0 %1940  ;;  %v2212_v6 = vsel %vm2177_vm7, %v4881_v10, -inf }
 0x25d   : > { %v2003_v37 = vadd.f32 %v4606_v13, %v4659_v12 }
 0x25f   : > { %v4907_v59 = vsel %vm2120_vm8, %v2003_v37, -inf  ;;  %vm2134_vm8 = vcmp.lt.s32.totalorder %v4738_v28, 600 }
 0x260   : > { %v4661_v16 = vpop.xlane.xlu1 %1942  ;;  %v2214_v58 = vsel %vm2177_vm7, %v4907_v59, -inf }
 0x261   : > { %v2004_v11 = vadd.f32 %v4606_v13, %v4661_v16  ;;  %v2204_v16 = vsel %vm2177_vm7, %v4861_v20, -inf }
 0x262   : > { %v2205_v44 = vmax.f32 %v2197_v50, %v2204_v16 }
 0x264   : > { %v4720_v15 = vpop.xlane.xlu0 %1944  ;;  %v2213_v37 = vmax.f32 %v2205_v44, %v2212_v6 }
 0x265   : > { %v2005_v33 = vadd.f32 %v4606_v13, %v4720_v15  ;;  %v2206_v15 = vsel %vm2177_vm7, %v4866_v30, -inf }
 0x266   : > { %v2207_v2 = vmax.f32 %v2199_v8, %v2206_v15 }
 0x267   : > { %v4918_v51 = vsel %vm2122_vm10, %v2005_v33, -inf  ;;  %vm2137_vm10 = vcmp.lt.s32.totalorder %v4846_v9, 600 }
 0x268   : > { %v4722_v47 = vpop.xlane.xlu1 %1946  ;;  %v2215_v50 = vmax.f32 %v2207_v2, %v2214_v58 }
 0x269   : > { %v2006_v34 = vadd.f32 %v4606_v13, %v4722_v47  ;;  %v2208_v47 = vsel %vm2177_vm7, %v4870_v52, -inf }
 0x26a   : > { %v2209_v3 = vmax.f32 %v2201_v61, %v2208_v47 }
 0x26b   : > { %v4922_v43 = vsel %vm2123_vm11, %v2006_v34, -inf  ;;  %vm2467_vm11 = vcmask 0  }
 0x26c   : > { %v4772_v60 = vpop.xlane.xlu0 %1948  ;;  %v2220_v33 = vsel %vm2177_vm7, %v4922_v43, -inf }
 0x26d   : > { %v2007_v1 = vadd.f32 %v4606_v13, %v4772_v60  ;;  %v4914_v60 = vsel %vm2121_vm9, %v2004_v11, -inf  ;;  %vm2136_vm9 = vcmp.lt.s32.totalorder %v4794_v63, 600  ;;  %v2218_v11 = vsel %vm2177_vm7, %v4918_v51, -inf }
 0x26e   : > { %v2219_v19 = vmax.f32 %v2211_v54, %v2218_v11  ;;  %v2221_v55 = vmax.f32 %v2213_v37, %v2220_v33 }
 0x26f   : > { %v4934_v32 = vsel %vm2124_vm12, %v2007_v1, -inf }
 0x270   : > { %v4774_v41 = vpop.xlane.xlu1 %1950  ;;  %v2222_v8 = vsel %vm2177_vm7, %v4934_v32, -inf }
 0x271   : > { %v2008_v42 = vadd.f32 %v4606_v13, %v4774_v41  ;;  %v2223_v44 = vmax.f32 %v2215_v50, %v2222_v8 }
 0x273   : > { %v4946_v34 = vsel %vm2125_vm13, %v2008_v42, -inf }
 0x274   : > { %v4813_v56 = vpop.xlane.xlu0 %1952 }
 0x275   : > { %v2009_v29 = vadd.f32 %v4606_v13, %v4813_v56  ;;  %v2216_v56 = vsel %vm2177_vm7, %v4914_v60, -inf }
 0x276   : > { %v2217_v1 = vmax.f32 %v2209_v3, %v2216_v56 }
 0x277   : > { %v4955_v61 = vsel %vm2126_vm14, %v2009_v29, -inf }
 0x278   : > { %v4815_v4 = vpop.xlane.xlu1 %1954  ;;  %v2226_v2 = vsel %vm2177_vm7, %v4955_v61, -inf }
 0x279   : > { %v2010_v41 = vadd.f32 %v4606_v13, %v4815_v4  ;;  %v2227_v56 = vmax.f32 %v2219_v19, %v2226_v2 }
 0x27c   : > { %v1957_v39 = vpop.xlane.xlu0 %1956 }
 0x27d   : > { %v2011_v14 = vadd.f32 %v4606_v13, %v1957_v39  ;;  %v4961_v39 = vsel %vm2127_vm15, %v2010_v41, -inf }
 0x27e   : > { %v2228_v3 = vsel %vm2177_vm7, %v4961_v39, -inf }
 0x27f   : > { %v4970_v5 = vsel %vm2128_vm0, %v2011_v14, -inf  ;;  %v2229_v41 = vmax.f32 %v2221_v55, %v2228_v3 }
 0x280   : > { %v1959_v53 = vpop.xlane.xlu1 %1958  ;;  %v2230_v48 = vsel %vm2177_vm7, %v4970_v5, -inf }
 0x281   : > { %v2012_v38 = vadd.f32 %v4606_v13, %v1959_v53 }
 0x283   : > { %v4974_v23 = vsel %vm2129_vm1, %v2012_v38, -inf }
 0x284   : > { %v1961_v35 = vpop.xlane.xlu0 %1960  ;;  %v2232_v58 = vsel %vm2177_vm7, %v4974_v23, -inf }
 0x285   : > { %v2013_v16 = vadd.f32 %v4606_v13, %v1961_v35  ;;  %v2224_v35 = vsel %vm2177_vm7, %v4946_v34, -inf }
 0x286   : > { %v2225_v54 = vmax.f32 %v2217_v1, %v2224_v35 }
 0x287   : > { %v4987_v22 = vsel %vm2130_vm3, %v2013_v16, -inf }
 0x288   : > { %v1963_v12 = vpop.xlane.xlu1 %1962  ;;  %v2234_v26 = vsel %vm2177_vm7, %v4987_v22, -inf  ;;  %v2233_v50 = vmax.f32 %v2225_v54, %v2232_v58 }
 0x289   : > { %v2014_v4 = vadd.f32 %v4606_v13, %v1963_v12  ;;  %v2235_v16 = vmax.f32 %v2227_v56, %v2234_v26  ;;  %v5303_v26 = vld [vmem:[#allocation19_spill] sm:$0xff] }
 0x28b   : > { %v1965_v21 = vpop.xlane.xlu0 %1964  ;;  %v4978_v6 = vsel %vm2131_vm2, %v2014_v4, -inf  ;;  %v2231_v4 = vmax.f32 %v2223_v44, %v2230_v48  ;;  %v5035_v48 = vld [vmem:[#allocation2] sm:$0x1] }
 0x28c   : > { %v2015_v53 = vadd.f32 %v4606_v13, %v1965_v21  ;;  %v2236_v7 = vsel %vm2177_vm7, %v4978_v6, -inf }
 0x28d   : > { %v2237_v28 = vmax.f32 %v2229_v41, %v2236_v7  ;;  %v5302_v7 = vld [vmem:[#allocation18_spill] sm:$0xff] }
 0x28e   : > { %v4991_v29 = vsel %vm2132_vm4, %v2015_v53, -inf }
 0x28f   : > { %v1967_v40 = vpop.xlane.xlu1 %1966  ;;  %v2238_v11 = vsel %vm2177_vm7, %v4991_v29, -inf }
 0x290   : > { %v2016_v12 = vadd.f32 %v4606_v13, %v1967_v40 }
 0x292   : > { %v4995_v49 = vsel %vm2133_vm5, %v2016_v12, -inf }
 0x293   : > { %v1969_v15 = vpop.xlane.xlu0 %1968  ;;  %v2240_v33 = vsel %vm2177_vm7, %v4995_v49, -inf }
 0x294   : > { %v2017_v42 = vadd.f32 %v4606_v13, %v1969_v15  ;;  %v2241_v53 = vmax.f32 %v2233_v50, %v2240_v33 }
 0x296   : > { %v5012_v62 = vsel %vm2134_vm8, %v2017_v42, -inf }
 0x297   : > { %v1971_v18 = vpop.xlane.xlu1 %1970  ;;  %v2242_v63 = vsel %vm2177_vm7, %v5012_v62, -inf }
 0x298   : > { %v2018_v47 = vadd.f32 %v4606_v13, %v1971_v18  ;;  %v2239_v18 = vmax.f32 %v2231_v4, %v2238_v11  ;;  %v2243_v19 = vmax.f32 %v2235_v16, %v2242_v63  ;;  %v5304_v11 = vld [vmem:[#allocation20_spill] sm:$0xff] }
 0x299   : > { %v5306_v4 = vld [vmem:[#allocation24_spill] sm:$0xff] }
 0x29a   : > { %v4999_v21 = vsel %vm2135_vm6, %v2018_v47, -inf }
 0x29b   : > { %v1973_v25 = vpop.xlane.xlu0 %1972  ;;  %v2244_v14 = vsel %vm2177_vm7, %v4999_v21, -inf }
 0x29c   : > { %v2019_v40 = vadd.f32 %v4606_v13, %v1973_v25  ;;  %v2245_v12 = vmax.f32 %v2237_v28, %v2244_v14  ;;  %v5305_v14 = vld [vmem:[#allocation21_spill] sm:$0xff]  ;;  %v5307_v28 = vld [vmem:[#allocation22_spill] sm:$0xff] }
 0x29e   : > { %v5016_v37 = vsel %vm2136_vm9, %v2019_v40, -inf  ;;  %v2251_v35 = vmax.f32 %v2243_v19, %v2245_v12 }
 0x29f   : > { %v1975_v38 = vpop.xlane.xlu1 %1974  ;;  %v2246_v15 = vsel %vm2177_vm7, %v5016_v37, -inf }
 0x2a0   : > { %v2020_v8 = vadd.f32 %v4606_v13, %v1975_v38  ;;  %v2247_v55 = vmax.f32 %v2239_v18, %v2246_v15  ;;  %v5308_v15 = vld [vmem:[#allocation23_spill] sm:$0xff] }
 0x2a2   : > { %v5031_v47 = vsel %vm2137_vm10, %v2020_v8, -inf }
 0x2a3   : > { %v2248_v1 = vsel %vm2177_vm7, %v5031_v47, -inf }
 0x2a4   : > { %v2249_v13 = vmax.f32 %v2241_v53, %v2248_v1 }
 0x2a6   : > { %v2250_v42 = vmax.f32 %v2247_v55, %v2249_v13 }
 0x2a8   : > { %v2252_v44 = vmax.f32 %v2250_v42, %v2251_v35  ;;  %v5309_v35 = vld [vmem:[#allocation25_spill] sm:$0xff] }
 0x2aa   : > { %v2253_v2 = vrot.slane %v2252_v44, 4 }
 0x2ac   : > { %v2254_v3 = vmax.f32 %v2252_v44, %v2253_v2 }
 0x2ae   : > { %v2255_v25 = vrot.slane %v2254_v3, 2 }
 0x2b0   : > { %v2256_v40 = vmax.f32 %v2254_v3, %v2255_v25 }
 0x2b2   : > { %v2257_v54 = vrot.slane %v2256_v40, 1 }
 0x2b4   : > { %v2258_v58 = vmax.f32 %v2256_v40, %v2257_v54 }
 0x2b6   : > { %v5038_v9 = vmax.f32 %v5035_v48, %v2258_v58 }
 0x2b8   : > { %2805 = vst.msk [vmem:[#allocation2] sm:$0x1] %vm2467_vm11, %v5038_v9  ;;  %v5044_v41 = vrot.slane %v5038_v9, %v5302_v7 }
 0x2ba   : > { %v2269_v56 = vsub.f32 %v5303_v26, %v5044_v41  ;;  %v2270_v33 = vsub.f32 %v5304_v11, %v5044_v41  ;;  %v2271_v38 = vsub.f32 %v5305_v14, %v5044_v41  ;;  %v2272_v50 = vsub.f32 %v5306_v4, %v5044_v41 }
 0x2bb   : > { %v2273_v8 = vsub.f32 %v5307_v28, %v5044_v41  ;;  %v2274_v18 = vsub.f32 %v5308_v15, %v5044_v41  ;;  %v2275_v1 = vsub.f32 %v4759_v24, %v5044_v41  ;;  %v2276_v19 = vsub.f32 %v4763_v45, %v5044_v41 }
 0x2bc   : > { %v2307_v16 = vmul.f32 1.442695, %v2269_v56  ;;  %v2309_v63 = vmul.f32 1.442695, %v2270_v33  ;;  %v2311_v53 = vmul.f32 1.442695, %v2271_v38  ;;  %v2277_v13 = vsub.f32 %v4767_v57, %v5044_v41 }
 0x2bd   : > { %v2313_v12 = vmul.f32 1.442695, %v2272_v50  ;;  %v2315_v55 = vmul.f32 1.442695, %v2273_v8  ;;  %v2278_v42 = vsub.f32 %v5309_v35, %v5044_v41  ;;  %v2317_v44 = vmul.f32 1.442695, %v2274_v18 }
 0x2be   : > { %3726 = vpow2.f32 %v2307_v16  ;;  %v2279_v2 = vsub.f32 %v4808_v46, %v5044_v41  ;;  %v2319_v3 = vmul.f32 1.442695, %v2275_v1  ;;  %v2280_v24 = vsub.f32 %v4819_v27, %v5044_v41 }
 0x2bf   : > { %3728 = vpow2.f32 %v2309_v63  ;;  %v2321_v45 = vmul.f32 1.442695, %v2276_v19  ;;  %v2281_v25 = vsub.f32 %v4823_v36, %v5044_v41  ;;  %v2323_v40 = vmul.f32 1.442695, %v2277_v13 }
 0x2c0   : > { %3730 = vpow2.f32 %v2311_v53  ;;  %v2282_v57 = vsub.f32 %v4827_v0, %v5044_v41  ;;  %v2325_v54 = vmul.f32 1.442695, %v2278_v42  ;;  %v2283_v58 = vsub.f32 %v4833_v17, %v5044_v41 }
 0x2c1   : > { %3732 = vpow2.f32 %v2313_v12  ;;  %v2285_v46 = vsub.f32 %v4866_v30, %v5044_v41  ;;  %v2327_v26 = vmul.f32 1.442695, %v2279_v2  ;;  %v2284_v27 = vsub.f32 %v4861_v20, %v5044_v41 }
 0x2c2   : > { %3734 = vpow2.f32 %v2315_v55  ;;  %v2286_v36 = vsub.f32 %v4870_v52, %v5044_v41  ;;  %v2329_v56 = vmul.f32 1.442695, %v2280_v24  ;;  %v2287_v0 = vsub.f32 %v4874_v31, %v5044_v41 }
 0x2c3   : > { %3736 = vpow2.f32 %v2317_v44  ;;  %v2288_v11 = vsub.f32 %v4881_v10, %v5044_v41  ;;  %v2331_v17 = vmul.f32 1.442695, %v2281_v25  ;;  %v2289_v30 = vsub.f32 %v4907_v59, %v5044_v41 }
 0x2c4   : > { %3738 = vpow2.f32 %v2319_v3  ;;  %v2290_v33 = vsub.f32 %v4914_v60, %v5044_v41  ;;  %v2333_v20 = vmul.f32 1.442695, %v2282_v57  ;;  %v2291_v52 = vsub.f32 %v4918_v51, %v5044_v41 }
 0x2c5   : > { %3740 = vpow2.f32 %v2321_v45  ;;  %v2292_v14 = vsub.f32 %v4922_v43, %v5044_v41  ;;  %v2339_v31 = vmul.f32 1.442695, %v2285_v46  ;;  %v2293_v10 = vsub.f32 %v4934_v32, %v5044_v41 }
 0x2c6   : > { %3742 = vpow2.f32 %v2323_v40  ;;  %v2294_v59 = vsub.f32 %v4946_v34, %v5044_v41  ;;  %v2341_v4 = vmul.f32 1.442695, %v2286_v36  ;;  %v2295_v50 = vsub.f32 %v4955_v61, %v5044_v41 }
 0x2c7   : > { %3744 = vpow2.f32 %v2325_v54  ;;  %v2343_v51 = vmul.f32 1.442695, %v2287_v0  ;;  %v2345_v8 = vmul.f32 1.442695, %v2288_v11  ;;  %v2296_v34 = vsub.f32 %v4961_v39, %v5044_v41 }
 0x2c8   : > { %3746 = vpow2.f32 %v2327_v26  ;;  %v2335_v15 = vmul.f32 1.442695, %v2283_v58  ;;  %v2297_v61 = vsub.f32 %v4970_v5, %v5044_v41  ;;  %v2337_v53 = vmul.f32 1.442695, %v2284_v27 }
 0x2c9   : > { %3748 = vpow2.f32 %v2329_v56  ;;  %v2298_v19 = vsub.f32 %v4974_v23, %v5044_v41  ;;  %v2347_v55 = vmul.f32 1.442695, %v2289_v30  ;;  %v2349_v39 = vmul.f32 1.442695, %v2290_v33 }
 0x2ca   : > { %3750 = vpow2.f32 %v2331_v17  ;;  %v2299_v2 = vsub.f32 %v4987_v22, %v5044_v41  ;;  %v2351_v3 = vmul.f32 1.442695, %v2291_v52  ;;  %v2300_v25 = vsub.f32 %v4978_v6, %v5044_v41 }
 0x2cb   : > { %v3727_v38 = vpop.eup %3726  ;;  %3752 = vpow2.f32 %v2333_v20  ;;  %v2353_v40 = vmul.f32 1.442695, %v2292_v14  ;;  %v2301_v58 = vsub.f32 %v4991_v29, %v5044_v41  ;;  %v2355_v46 = vmul.f32 1.442695, %v2293_v10 }
 0x2cc   : > { %v3729_v60 = vpop.eup %3728  ;;  %v2385_v28 = vsel %vm2177_vm7, %v3727_v38, 0.0  ;;  %3754 = vpow2.f32 %v2339_v31  ;;  %v2357_v27 = vmul.f32 1.442695, %v2294_v59  ;;  %v2302_v6 = vsub.f32 %v4995_v49, %v5044_v41 }
 0x2cd   : > { %v3731_v43 = vpop.eup %3730  ;;  %v2386_v16 = vsel %vm2177_vm7, %v3729_v60, 0.0  ;;  %v2469_v63 = vpack.c.bf16 %v3729_v60, %v3727_v38  ;;  %3756 = vpow2.f32 %v2341_v4  ;;  %v2359_v11 = vmul.f32 1.442695, %v2295_v50 }
 0x2ce   : > { %v3733_v32 = vpop.eup %3732  ;;  %v2387_v18 = vadd.f32 %v2386_v16, %v2385_v28  ;;  %v2388_v12 = vsel %vm2177_vm7, %v3731_v43, 0.0  ;;  %3758 = vpow2.f32 %v2343_v51  ;;  %v2303_v29 = vsub.f32 %v5012_v62, %v5044_v41 }
 0x2cf   : > { %2488 = vxpose.xlu1.c.b16.start [1/8] (narrow) %v2469_v63, 16  ;;  %v3735_v1 = vpop.eup %3734  ;;  %3760 = vpow2.f32 %v2345_v8  ;;  %v2390_v35 = vsel %vm2177_vm7, %v3733_v32, 0.0  ;;  %v2470_v42 = vpack.c.bf16 %v3733_v32, %v3731_v43  ;;  %v2361_v33 = vmul.f32 1.442695, %v2296_v34 }
 0x2d0   : > { %v2389_v13 = vadd.f32 %v2388_v12, %v2387_v18  ;;  %v3737_v44 = vpop.eup %3736  ;;  %3762 = vpow2.f32 %v2335_v15  ;;  %v2392_v57 = vsel %vm2177_vm7, %v3735_v1, 0.0  ;;  %v2304_v14 = vsub.f32 %v4999_v21, %v5044_v41 }
 0x2d1   : > { %v3739_v45 = vpop.eup %3738  ;;  %3764 = vpow2.f32 %v2337_v53  ;;  %v2394_v36 = vsel %vm2177_vm7, %v3737_v44, 0.0  ;;  %v2471_v56 = vpack.c.bf16 %v3737_v44, %v3735_v1  ;;  %v2367_v31 = vmul.f32 1.442695, %v2299_v2 }
 0x2d2   : > { %v2391_v24 = vadd.f32 %v2390_v35, %v2389_v13  ;;  %v3741_v54 = vpop.eup %3740  ;;  %3766 = vpow2.f32 %v2347_v55  ;;  %v2396_v20 = vsel %vm2177_vm7, %v3739_v45, 0.0  ;;  %v2369_v10 = vmul.f32 1.442695, %v2300_v25 }
 0x2d3   : > { %2489 = vxpose.xlu1.c.b16.cont [2/8] (narrow) %v2470_v42, 16  ;;  %v3743_v22 = vpop.eup %3742  ;;  %3768 = vpow2.f32 %v2349_v39  ;;  %v2398_v59 = vsel %vm2177_vm7, %v3741_v54, 0.0  ;;  %v2472_v4 = vpack.c.bf16 %v3741_v54, %v3739_v45  ;;  %v2305_v60 = vsub.f32 %v5016_v37, %v5044_v41 }
 0x2d4   : > { %v2393_v26 = vadd.f32 %v2392_v57, %v2391_v24  ;;  %v3745_v0 = vpop.eup %3744  ;;  %3770 = vpow2.f32 %v2351_v3  ;;  %v2371_v50 = vmul.f32 1.442695, %v2301_v58  ;;  %v2306_v21 = vsub.f32 %v5031_v47, %v5044_v41 }
 0x2d5   : > { %v5120_v30 = vpop.eup %3746  ;;  %3772 = vpow2.f32 %v2353_v40  ;;  %v2373_v43 = vmul.f32 1.442695, %v2302_v6  ;;  %v2400_v8 = vsel %vm2177_vm7, %v3743_v22, 0.0  ;;  %v2375_v63 = vmul.f32 1.442695, %v2303_v29 }
 0x2d6   : > { %v2395_v17 = vadd.f32 %v2394_v36, %v2393_v26  ;;  %v3749_v52 = vpop.eup %3748  ;;  %3774 = vpow2.f32 %v2355_v46  ;;  %v2377_v32 = vmul.f32 1.442695, %v2304_v14  ;;  %v2402_v15 = vsel %vm2177_vm7, %v3745_v0, 0.0 }
 0x2d7   : > { %2490 = vxpose.xlu1.c.b16.cont [3/8] (narrow) %v2471_v56, 16  ;;  %v5127_v38 = vpop.eup %3750  ;;  %3776 = vpow2.f32 %v2357_v27  ;;  %v2473_v47 = vpack.c.bf16 %v3745_v0, %v3743_v22  ;;  %v2379_v12 = vmul.f32 1.442695, %v2305_v60  ;;  %v2381_v13 = vmul.f32 1.442695, %v2306_v21 }
 0x2d8   : > { %v2397_v49 = vadd.f32 %v2396_v20, %v2395_v17  ;;  %v5130_v62 = vpop.eup %3752  ;;  %3778 = vpow2.f32 %v2359_v11  ;;  %v2404_v39 = vsel %vm2177_vm7, %v5120_v30, 0.0  ;;  %v2260_v35 = vsub.f32 %v5035_v48, %v5038_v9 }
 0x2d9   : > { %v5134_v28 = vpop.eup %3754  ;;  %3780 = vpow2.f32 %v2361_v33  ;;  %v2363_v44 = vmul.f32 1.442695, %v2297_v61  ;;  %v2365_v2 = vmul.f32 1.442695, %v2298_v19  ;;  %v2406_v45 = vsel %vm2177_vm7, %v3749_v52, 0.0 }
 0x2da   : > { %v2399_v51 = vadd.f32 %v2398_v59, %v2397_v49  ;;  %v5139_v16 = vpop.eup %3756  ;;  %3782 = vpow2.f32 %v2367_v31  ;;  %v2474_v48 = vpack.c.bf16 %v3749_v52, %v5120_v30  ;;  %v2408_v23 = vsel %vm2177_vm7, %v5127_v38, 0.0 }
 0x2db   : > { %2491 = vxpose.xlu1.c.b16.cont [4/8] (narrow) %v2472_v4, 16  ;;  %v5141_v37 = vpop.eup %3758  ;;  %3784 = vpow2.f32 %v2369_v10  ;;  %v2477_v18 = vpack.c.bf16 %v5139_v16, %v5134_v28  ;;  %v2261_v41 = vmul.f32 1.442695, %v2260_v35  ;;  %v2410_v54 = vsel %vm2177_vm7, %v5130_v62, 0.0 }
 0x2dc   : > { %v2401_v34 = vadd.f32 %v2400_v8, %v2399_v51  ;;  %v5146_v53 = vpop.eup %3760  ;;  %3786 = vpow2.f32 %v2371_v50  ;;  %v2475_v46 = vpack.c.bf16 %v5130_v62, %v5127_v38  ;;  %v2416_v52 = vsel %vm2177_vm7, %v5134_v28, 0.0 }
 0x2dd   : > { %v3763_v55 = vpop.eup %3762  ;;  %3788 = vpow2.f32 %v2373_v43  ;;  %2504 = vxpose.xlu0.c.b16.start [1/8] (narrow) %v2477_v18, 16  ;;  %v2478_v25 = vpack.c.bf16 %v5146_v53, %v5141_v37  ;;  %v2418_v10 = vsel %vm2177_vm7, %v5139_v16, 0.0  ;;  %v2420_v51 = vsel %vm2177_vm7, %v5141_v37, 0.0 }
 0x2de   : > { %v2403_v1 = vadd.f32 %v2402_v15, %v2401_v34  ;;  %v3765_v42 = vpop.eup %3764  ;;  %3790 = vpow2.f32 %v2375_v63  ;;  %v2412_v36 = vsel %vm2177_vm7, %v3763_v55, 0.0  ;;  %v2422_v63 = vsel %vm2177_vm7, %v5146_v53, 0.0 }
 0x2df   : > { %2492 = vxpose.xlu1.c.b16.cont [5/8] (narrow) %v2473_v47, 16  ;;  %v3767_v24 = vpop.eup %3766  ;;  %3792 = vpow2.f32 %v2377_v32  ;;  %v2414_v11 = vsel %vm2177_vm7, %v3765_v42, 0.0  ;;  %v2476_v30 = vpack.c.bf16 %v3765_v42, %v3763_v55 }
 0x2e0   : > { %v2405_v3 = vadd.f32 %v2404_v39, %v2403_v1  ;;  %v3769_v9 = vpop.eup %3768  ;;  %3794 = vpow2.f32 %v2379_v12  ;;  %v2424_v18 = vsel %vm2177_vm7, %v3767_v24, 0.0 }
 0x2e1   : > { %v3771_v5 = vpop.eup %3770  ;;  %3796 = vpow2.f32 %v2381_v13  ;;  %2505 = vxpose.xlu0.c.b16.cont [2/8] (narrow) %v2478_v25, 16  ;;  %v2479_v58 = vpack.c.bf16 %v3769_v9, %v3767_v24  ;;  %v2426_v1 = vsel %vm2177_vm7, %v3769_v9, 0.0 }
 0x2e2   : > { %v2407_v40 = vadd.f32 %v2406_v45, %v2405_v3  ;;  %v3773_v61 = vpop.eup %3772  ;;  %3798 = vpow2.f32 %v2363_v44  ;;  %v2428_v13 = vsel %vm2177_vm7, %v3771_v5, 0.0 }
 0x2e3   : > { %2493 = vxpose.xlu1.c.b16.cont [6/8] (narrow) %v2474_v48, 16  ;;  %v3775_v57 = vpop.eup %3774  ;;  %3800 = vpow2.f32 %v2365_v2  ;;  %v2480_v17 = vpack.c.bf16 %v3773_v61, %v3771_v5  ;;  %v2430_v53 = vsel %vm2177_vm7, %v3773_v61, 0.0 }
 0x2e4   : > { %v2409_v19 = vadd.f32 %v2408_v23, %v2407_v40  ;;  %v3777_v26 = vpop.eup %3776  ;;  %3802 = vpow2.f32 %v2261_v41  ;;  %v2432_v42 = vsel %vm2177_vm7, %v3775_v57, 0.0 }
 0x2e5   : > { %v3779_v27 = vpop.eup %3778  ;;  %2506 = vxpose.xlu0.c.b16.cont [3/8] (narrow) %v2479_v58, 16  ;;  %v2481_v59 = vpack.c.bf16 %v3777_v26, %v3775_v57  ;;  %v2434_v2 = vsel %vm2177_vm7, %v3777_v26, 0.0 }
 0x2e6   : > { %v2411_v22 = vadd.f32 %v2410_v54, %v2409_v19  ;;  %v3781_v56 = vpop.eup %3780  ;;  %v2436_v24 = vsel %vm2177_vm7, %v3779_v27, 0.0 }
 0x2e7   : > { %2494 = vxpose.xlu1.c.b16.cont [7/8] (narrow) %v2475_v46, 16  ;;  %v3783_v6 = vpop.eup %3782  ;;  %v2482_v32 = vpack.c.bf16 %v3781_v56, %v3779_v27  ;;  %v2438_v25 = vsel %vm2177_vm7, %v3781_v56, 0.0 }
 0x2e8   : > { %v2413_v0 = vadd.f32 %v2412_v36, %v2411_v22  ;;  %v3785_v29 = vpop.eup %3784  ;;  %v2444_v41 = vsel %vm2177_vm7, %v3783_v6, 0.0  ;;  %v3976_v36 = vmov 0  }
 0x2e9   : > { %v3787_v20 = vpop.eup %3786  ;;  %2507 = vxpose.xlu0.c.b16.cont [4/8] (narrow) %v2480_v17, 16  ;;  %v2484_v14 = vpack.c.bf16 %v3785_v29, %v3783_v6  ;;  %v2446_v19 = vsel %vm2177_vm7, %v3785_v29, 0.0 }
 0x2ea   : > { %v2415_v33 = vadd.f32 %v2414_v11, %v2413_v0  ;;  %v3789_v31 = vpop.eup %3788  ;;  %v2448_v54 = vsel %vm2177_vm7, %v3787_v20, 0.0 }
 0x2eb   : > { %2495 = vxpose.xlu1.c.b16.end [8/8] (narrow) %v2476_v30, 16  ;;  %v3791_v38 = vpop.eup %3790  ;;  %v2485_v4 = vpack.c.bf16 %v3789_v31, %v3787_v20  ;;  %v2450_v46 = vsel %vm2177_vm7, %v3789_v31, 0.0 }
 0x2ec   : > { %v2417_v49 = vadd.f32 %v2416_v52, %v2415_v33  ;;  %v3793_v62 = vpop.eup %3792  ;;  %v2452_v22 = vsel %vm2177_vm7, %v3791_v38, 0.0 }
 0x2ed   : > { %v3795_v50 = vpop.eup %3794  ;;  %2508 = vxpose.xlu0.c.b16.cont [5/8] (narrow) %v2481_v59, 16  ;;  %v2486_v21 = vpack.c.bf16 %v3793_v62, %v3791_v38  ;;  %v2454_v56 = vsel %vm2177_vm7, %v3793_v62, 0.0  ;;  %v3805_v62 = vld [vmem:[%s4136_s19 + $0x240] ss:$16 sps:$4 sm:$0xff]  }
 0x2ee   : > { %v2419_v60 = vadd.f32 %v2418_v10, %v2417_v49  ;;  %v3797_v28 = vpop.eup %3796  ;;  %v2456_v6 = vsel %vm2177_vm7, %v3795_v50, 0.0 }
 0x2ef   : > { %v3799_v8 = vpop.eup %3798  ;;  %v2487_v34 = vpack.c.bf16 %v3797_v28, %v3795_v50  ;;  %v2458_v17 = vsel %vm2177_vm7, %v3797_v28, 0.0  ;;  %v3807_v50 = vld [vmem:[%s4136_s19 + $0x224] ss:$16 sps:$4 sm:$0xff]   ;;  %v3810_v28 = vld [vmem:[%s4136_s19 + $0x228] ss:$16 sps:$4 sm:$0xff]  }
 0x2f0   : > { %v2421_v43 = vadd.f32 %v2420_v51, %v2419_v60  ;;  %v3801_v15 = vpop.eup %3800  ;;  %v2440_v9 = vsel %vm2177_vm7, %v3799_v8, 0.0  ;;  %v3806_v60 = vld [vmem:[%s4136_s19 + $0x248] ss:$16 sps:$4 sm:$0xff]   ;;  %v3808_v51 = vld [vmem:[%s4136_s19 + $0x22c] ss:$16 sps:$4 sm:$0xff]  }
 0x2f1   : > { %2509 = vxpose.xlu0.c.b16.cont [6/8] (narrow) %v2482_v32, 16  ;;  %v3803_v47 = vpop.eup %3802  ;;  %v2483_v37 = vpack.c.bf16 %v3801_v15, %v3799_v8  ;;  %v2442_v5 = vsel %vm2177_vm7, %v3801_v15, 0.0  ;;  %v3812_v8 = vld [vmem:[%s4136_s19 + $0x20c] ss:$16 sps:$4 sm:$0xff]   ;;  %v3814_v32 = vld [vmem:[%s4136_s19 + $0x208] ss:$16 sps:$4 sm:$0xff]  }
 0x2f2   : > { %v2423_v16 = vadd.f32 %v2422_v63, %v2421_v43  ;;  %v3811_v43 = vld [vmem:[%s4136_s19 + $0x204] ss:$16 sps:$4 sm:$0xff]   ;;  %v3813_v63 = vld [vmem:[%s4136_s19 + $0x200] ss:$16 sps:$4 sm:$0xff]   ;;  %vm2536_vm7 = vcmask 392192  }
 0x2f4   : > { %v2425_v12 = vadd.f32 %v2424_v18, %v2423_v16 }
 0x2f5   : > { %2704 = vxpose.xlu1.b32.start.end [1/1] (short) (narrow) %v3803_v47, 8  ;;  %2510 = vxpose.xlu0.c.b16.cont [7/8] (narrow) %v2483_v37, 16 }
 0x2f6   : > { %v2427_v55 = vadd.f32 %v2426_v1, %v2425_v12 }
 0x2f8   : > { %v2429_v39 = vadd.f32 %v2428_v13, %v2427_v55 }
 0x2f9   : > { %2511 = vxpose.xlu0.c.b16.end [8/8] (narrow) %v2484_v14, 16  ;;  %v2383_v14 = vld [vmem:[#allocation3] sm:$0x1] }
 0x2fa   : > { %v2431_v35 = vadd.f32 %v2430_v53, %v2429_v39  ;;  %v2384_v38 = vmul.f32 %v3803_v47, %v2383_v14  ;;  %v2736_v39 = vld [vmem:[#allocation4] sm:$0xf]  ;;  %v5310_v53 = vld [vmem:[#allocation16_spill] sm:$0xff] }
 0x2fc   : > { %v2433_v44 = vadd.f32 %v2432_v42, %v2431_v35  ;;  %v2753_v35 = vsub.s32 2, %v5310_v53  ;;  %v2757_v42 = vsub.s32 3, %v5310_v53 }
 0x2fd   : > { %2520 = vxpose.xlu0.c.b16.start [1/3] (short) (narrow) %v2485_v4, 16 }
 0x2fe   : > { %v2435_v3 = vadd.f32 %v2434_v2, %v2433_v44  ;;  %v2746_v44 = vrot.slane %v2736_v39, %v5302_v7  ;;  %v5311_v2 = vld [vmem:[#allocation17_spill] sm:$0xff] }
 0x300   : > { %v2437_v45 = vadd.f32 %v2436_v24, %v2435_v3  ;;  %v2750_v3 = vrot.slane %v2736_v39, %v5311_v2  ;;  %v3977_v24 = vmov 1966171168  }
 0x301   : > { %2521 = vxpose.xlu0.c.b16.cont [2/3] (short) (narrow) %v2486_v21, 16  ;;  %v3809_v21 = vld [vmem:[%s4136_s19 + $0x220] ss:$16 sps:$4 sm:$0xff]  }
 0x302   : > { %v2439_v48 = vadd.f32 %v2438_v25, %v2437_v45  ;;  %v2778_v45 = vunpack.c.l.s4 %v3977_v24  ;;  %v2754_v25 = vrot.slane %v2736_v39, %v2753_v35 }
 0x304   : > { %v2441_v40 = vadd.f32 %v2440_v9, %v2439_v48  ;;  %v2758_v48 = vrot.slane %v2736_v39, %v2757_v42 }
 0x305   : > { %2522 = vxpose.xlu0.c.b16.end [3/3] (short) (narrow) %v2487_v34, 16 }
 0x306   : > { %v2443_v23 = vadd.f32 %v2442_v5, %v2441_v40 }
 0x308   : > { %v2445_v61 = vadd.f32 %v2444_v41, %v2443_v23 }
 0x30a   : > { %v2447_v57 = vadd.f32 %v2446_v19, %v2445_v61  ;;  %v2779_v61 = vunpack.c.0.s8 %v2778_v45 }
 0x30c   : > { %v2449_v58 = vadd.f32 %v2448_v54, %v2447_v57 }
 0x30e   : > { %v2451_v26 = vadd.f32 %v2450_v46, %v2449_v58  ;;  %3363 = vset.pattern.permute.xlu0 %v3976_v36 }
 0x310   : > { %v2453_v27 = vadd.f32 %v2452_v22, %v2451_v26 }
 0x312   : > { %v2455_v0 = vadd.f32 %v2454_v56, %v2453_v27  ;;  %v2782_v27 = vsub.s32 %v2779_v61, %v5310_v53 }
 0x313   : > { %3362 = vset.pattern.permute.xlu1 %v3976_v36 }
 0x314   : > { %v2457_v11 = vadd.f32 %v2456_v6, %v2455_v0 }
 0x316   : > { %v2459_v30 = vadd.f32 %v2458_v17, %v2457_v11 }
 0x318   : > { %v2460_v29 = vrot.slane %v2459_v30, 4 }
 0x31a   : > { %v2461_v33 = vadd.f32 %v2460_v29, %v2459_v30 }
 0x31c   : > { %v2462_v20 = vrot.slane %v2461_v33, 2 }
 0x31e   : > { %v2463_v52 = vadd.f32 %v2462_v20, %v2461_v33 }
 0x320   : > { %v2464_v31 = vrot.slane %v2463_v52, 1 }
 0x322   : > { %v2465_v49 = vadd.f32 %v2464_v31, %v2463_v52 }
 0x324   : > { %v2466_v10 = vadd.f32 %v2465_v49, %v2384_v38  ;;  %v5312_v49 = vlaneseq }
 0x326   : > { %2468 = vst.msk [vmem:[#allocation3] sm:$0x1] %vm2467_vm11, %v2466_v10  ;;  %vm2802_vm12 = vcmp.lt.s32.totalorder %v5312_v49, 512 }
 0x331   : > { %v2496_v59 = vpop.trf.xlu1 }
 0x33f   : > { %v2512_v4 = vpop.trf.xlu0 }
 0x340   : > { %2572 = vmatprep.mubr.bf16.mxu1 %v2512_v4  ;;  %2654 = vmatprep.mubr.bf16.mxu0 %v2512_v4 }
 0x341   : > { %2573 = vmatmul.mubr.bf16.vlgmr.msra.gmra.mxu1 %v2496_v59  ;;  %2655 = vmatmul.mubr.bf16.vlgmr.msra.gmra.mxu0 %v2496_v59 }
 0x342   : > { %2592 = vmatpush1.bf16.msra.mxu1 %v3805_v62  ;;  %2674 = vmatpush1.bf16.msra.mxu0 %v3806_v60 }
 0x343   : > { %2593 = vmatprep.subr.bf16.mxu1 %v3807_v50  ;;  %2675 = vmatprep.subr.bf16.mxu0 %v3808_v51 }
 0x344   : > { %2613 = vmatprep.mubr.bf16.mxu1 %v3976_v36  ;;  %2695 = vmatprep.mubr.bf16.mxu0 %v3976_v36 }
 0x346   : > { %2594 = vmatpush1.bf16.msra.mxu1 %v3809_v21  ;;  %2676 = vmatpush1.bf16.msra.mxu0 %v3810_v28 }
 0x347   : > { %2595 = vmatprep.subr.bf16.mxu1 %v3811_v43  ;;  %2677 = vmatprep.subr.bf16.mxu0 %v3812_v8 }
 0x34a   : > { %2596 = vmatpush1.bf16.msra.mxu1 %v3813_v63  ;;  %2678 = vmatpush1.bf16.msra.mxu0 %v3814_v32 }
 0x35f   : > { %v2528_v34 = vpop.trf.xlu0 }
 0x360   : > { %3271 = vmatmul.mubr.msk.bf16.vlgmr.msra.gmra.mxu1 %vm2536_vm7, %v2528_v34  ;;  %3272 = vmatmul.mubr.msk.bf16.vlgmr.msra.gmra.mxu0 %vm2536_vm7, %v2528_v34 }
 0x371   : > { %v2720_v15 = vpop.trf.xlu1 }
 0x372   : > { %2739 = vperm.xlu1 %3362, %v2720_v15  }
 0x3ed   : > { %v2740_v9 = vpop.permute.xlu1 %2739 }
 0x3ee   : > { %v2763_v23 = vmul.f32 %v2746_v44, %v2740_v9  ;;  %v2764_v41 = vmul.f32 %v2750_v3, %v2740_v9  ;;  %v2765_v54 = vmul.f32 %v2754_v25, %v2740_v9  ;;  %v2766_v7 = vmul.f32 %v2758_v48, %v2740_v9 }
 0x401   : > { %v2574_v16 = vpop.f32.mrf.mxu1  ;;  %v2656_v18 = vpop.f32.mrf.mxu0 }
 0x403   : > { %v2576_v47 = vpop.f32.mrf.mxu1  ;;  %v2658_v12 = vpop.f32.mrf.mxu0 }
 0x405   : > { %v2578_v1 = vpop.f32.mrf.mxu1  ;;  %v2660_v37 = vpop.f32.mrf.mxu0 }
 0x407   : > { %v2579_v55 = vpop.f32.mrf.mxu1  ;;  %v2661_v13 = vpop.f32.mrf.mxu0 }
 0x420   : > { %v2615_v40 = vpop.f32.mrf.mxu1  ;;  %v2697_v5 = vpop.f32.mrf.mxu0 }
 0x421   : > { %v2616_v19 = vadd.f32 %v2615_v40, %v2574_v16  ;;  %v2698_v57 = vadd.f32 %v2697_v5, %v2656_v18 }
 0x422   : > { %v2617_v58 = vpop.f32.mrf.mxu1  ;;  %v2699_v46 = vpop.f32.mrf.mxu0 }
 0x423   : > { %v2618_v26 = vadd.f32 %v2617_v58, %v2576_v47  ;;  %v2700_v22 = vadd.f32 %v2699_v46, %v2658_v12  ;;  %v2767_v0 = vadd.f32 %v2763_v23, %v2616_v19  ;;  %v2769_v6 = vadd.f32 %v2765_v54, %v2698_v57 }
 0x424   : > { %v2619_v36 = vpop.f32.mrf.mxu1  ;;  %v2701_v56 = vpop.f32.mrf.mxu0 }
 0x425   : > { %v2768_v11 = vadd.f32 %v2764_v41, %v2618_v26  ;;  %v2770_v17 = vadd.f32 %v2766_v7, %v2700_v22 }
 0x426   : > { %v2620_v30 = vpop.f32.mrf.mxu1  ;;  %v2702_v29 = vpop.f32.mrf.mxu0 }
 0x427   : > { %v2775_v33 = vcombine.low %v2767_v0, %v2768_v11  ;;  %v2776_v20 = vcombine.low %v2769_v6, %v2770_v17 }
 0x429   : > { %v2783_v52 = vrot.slane %v2775_v33, %v2782_v27  ;;  %v2790_v14 = vrot.slane %v2776_v20, %v2782_v27 }
 0x42b   : > { %v2791_v31 = vcombine.low %v2783_v52, %v2790_v14  ;;  %2809 = sbr.rel (%p3273_p13) target bundleno = 1541 (0x605), region = 68 }
 0x42d   : > { %v2798_v38 = vrot.slane %v2791_v31, %v2782_v27 }
 0x42f   : > { %2804 = vst.msk [vmem:[#allocation4] sm:$0xf] %vm2802_vm12, %v2798_v38 }
 0x430   : > { %v2810_v10 = vld [vmem:[#allocation3] sm:$0x1]  ;;  %v3978_v4 = vmov 0   ;;  %v3979_v62 = vmov 1983009808   ;;  %v5313_v21 = vld [vmem:[#allocation16_spill] sm:$0xff] }
 0x431   : > { %3817 = vrcp.f32 %v2810_v10  ;;  %v2881_v60 = vunpack.c.l.s4 %v3979_v62  ;;  %v2855_v51 = vld [vmem:[%s5262_s5] sm:$0xff]  ;;  %v5315_v37 = vld [vmem:[#allocation17_spill] sm:$0xff]  ;;  %vm3040_vm13 = vcmask 8192  }
 0x432   : > { %v2879_v43 = vcombine.high %v2855_v51, %v2855_v51  ;;  %v5314_v47 = vld [vmem:[#allocation18_spill] sm:$0xff] }
 0x433   : > { %v2882_v50 = vunpack.c.0.s8 %v2881_v60  ;;  %v2856_v44 = vld [vmem:[%s5263_s6] sm:$0x1] }
 0x435   : > { %v2885_v28 = vsub.s32 %v2882_v50, %v5313_v21 }
 0x436   : > { %v2812_v16 = vld [vmem:[#allocation4] sm:$0xf] }
 0x437   : > { %v2886_v8 = vrot.slane %v2855_v51, %v2885_v28  ;;  %v2893_v63 = vrot.slane %v2879_v43, %v2885_v28 }
 0x439   : > { %v2894_v32 = vcombine.high %v2886_v8, %v2886_v8  ;;  %v2895_v34 = vcombine.high %v2893_v63, %v2893_v63 }
 0x43b   : > { %2930 = vmatprep.subr.mxu0 %v2894_v32  ;;  %3000 = vmatprep.subr.mxu1 %v2895_v34 }
 0x43c   : > { %2931 = vmatpush1.xpose.msra.mxu0 %v2886_v8  ;;  %3001 = vmatpush1.xpose.msra.mxu1 %v2893_v63 }
 0x43e   : > { %v3818_v59 = vpop.eup %3817 }
 0x43f   : > { %2813 = vxpose.xlu0.b32.start.end [1/1] (short) (narrow) %v3818_v59, 8 }
 0x468   : > { %3815 = vset.pattern.permute.xlu0 %v3978_v4 }
 0x4bb   : > { %v2829_v15 = vpop.trf.xlu0 }
 0x4bc   : > { %2847 = vperm.xlu0 %3815, %v2829_v15  }
 0x537   : > { %v2848_v18 = vpop.permute.xlu0 %2847 }
 0x538   : > { %v2852_v12 = vrot.slane %v2848_v18, %v5314_v47 }
 0x53a   : > { %v2854_v1 = vmul.f32 %v2852_v12, %v2812_v16 }
 0x53c   : > { %v2865_v55 = vrot.slane %v2854_v1, %v5315_v37  ;;  %v2873_v13 = vrot.slane %v2854_v1, %v2757_v42  ;;  %v2861_v39 = vrot.slane %v2854_v1, %v5314_v47  ;;  %v2869_v53 = vrot.slane %v2854_v1, %v2753_v35 }
 0x53e   : > { %2964 = vmatprep.mubr.f32.mxu0 %v2865_v55  ;;  %3034 = vmatprep.mubr.f32.mxu1 %v2873_v13 }
 0x53f   : > { %2965 = vmatmul.mubr.f32.vlgmr.msra.gmra.mxu0 %v2861_v39  ;;  %3035 = vmatmul.mubr.f32.vlgmr.msra.gmra.mxu1 %v2869_v53 }
 0x5ff   : > { %v2966_v2 = vpop.f32.mrf.mxu0  ;;  %v3036_v3 = vpop.f32.mrf.mxu1 }
 0x600   : > { %v2967_v24 = vadd.f32 %v2966_v2, %v2856_v44 }
 0x601   : > { %v2968_v45 = vpop.f32.mrf.mxu0  ;;  %v3038_v25 = vpop.f32.mrf.mxu1 }
 0x602   : > { %v3037_v42 = vadd.f32 %v3036_v3, %v2967_v24 }
 0x604   : > { %3041 = vst.msk [vmem:[#allocation12] sm:$0x1] %vm3040_vm13, %v3037_v42 }
 0x605 PF: > { %p3313_p12 = scmp.eq.s32.totalorder %s4043_s4, 1  ;;  %s3980_s24 = smov [#allocation12]  }
 0x606   : > { %s3049_s25 = sshll.u32 %s3980_s24, 4  ;;  %s3050_s25 = int_to_ptr.vmem [resolvable:$true] %s3049_s25 }
 0x607   : > { %s3899_s9 = scalar_lea.vmem %s3050_s25, 16  ;;  %s3905_s10 = scalar_lea.vmem %s3050_s25, 32 }
 0x608   : > { %p3900_p1 = scmp.ne.s32.totalorder %s3050_s25, %s3899_s9  ;;  %p3906_p0 = scmp.lt.s32.totalorder %s3050_s25, %s3050_s25 }
 0x609   : > { %p3907_p2 = scmp.lt.s32.totalorder %s3905_s10, %s3899_s9 }
 0x60a   : > { %p3901_p4 = pnand %p3900_p1, %p3313_p12 }
 0x60b   : > { %p3908_p8 = por %p3907_p2, %p3906_p0 }
 0x60c   : > { %p3902_p9 = pneg %p3901_p4 }
 0x60e   : > { %p3909_p10 = pnand %p3908_p8, %p3902_p9 }
 0x610   : > { %3912 = shalt.err (!%p3909_p10)
}
 0x611   : > { %3294 = dma.vmem_to_hbm [thread:$0]  (%p3313_p12), %s3050_s25, 16, %s5264_s7, [#allocation8]  }
 0x612   : > { %3948 = dma.done.wait (%p3313_p12), [#allocation8], 16  }
 0x613   : > { %3950 = vsyncadd (%p3313_p12), [#allocation8], 4294967280 }
 0x614 PF: > { %s5316_s15 = smov %s4098_s26  ;;  %p21_p7 = scmp.ge.s32.totalorder %s4087_s22, 4  }
 0x615   : > { %s5317_s26 = smov %s3957_s27  ;;  %s5318_s27 = smov %s3961_s28 }
 0x616   : > { %s5319_s28 = smov %s5316_s15  ;;  %s5320_s29 = smov %s4087_s22 }
 0x617   :  { %23 = sbr.rel (!%p21_p7) target bundleno = 8 (0x8), region = 101 }
 0x61c   :  { %3062 = vsyncpa [#allocation7], 1 }
 0x61d   :  { %3064 = vsyncpa [#allocation7 + $0x1], 1 }
 0x61e   :  { %3065 = vsyncpa [#allocation10], 1 }
 0x61f   :  { %3066 = vsyncpa [#allocation8], 1 }
 0x620   :  { %3068 = vsyncpa [#allocation8 + $0x1], 1 }

</bundles_post_ra>
